<compile_context>
chip_gen: v5e
topology: v5e:2x2
jax: 0.10.0
libtpu: 0.0.40
codegen_flags: <defaults>
</compile_context>

<pallas_src>
import functools
import math

import jax
import jax.numpy as jnp
from jax.experimental import pallas as pl
from jax.experimental.pallas import tpu as pltpu


# ------------------------------ fused kernel -------------------------------- #

def _make_kernel(*, K, W, Ci, S1, P1, RS1, CS1, S2, A2, P2, pool2_pos):
    """Builds the per-image kernel body for fixed (static) geometry.

    Flattened-index scheme (per image):
      x_flat row  s0 = y*W + x                      (stride W along y, 1 along x)
      conv1 row   s1 = y1*W + x1                    (same strides; S1 rows computed)
      pool1 row   t1 = (2*W)*py + 2*px = RS1*py+CS1*px   (valid rows only)
      conv2 row   s2 = RS1*y2 + CS1*x2              (S2 rows computed)
      pool2 row   u  = 2*RS1*py2 + 2*CS1*px2        (Hp2*Wp2 valid rows)
    Rows in between are garbage (finite) and are never read by later stages.
    """
    taps = [(ky, kx) for ky in range(K) for kx in range(K)]

    def kernel(x_ref, w1_ref, b1_ref, w2_ref, b2_ref, wl_ref, bl_ref,
               out_ref, c1_ref, p1_ref, c2_ref, p2_ref):
        # ---------- conv1 + bias + ReLU : K*K shifted whole-array products ----
        for t, (ky, kx) in enumerate(taps):
            d = ky * W + kx
            xs = x_ref[pl.ds(d, S1), :]                      # (S1, Ci)
            w = w1_ref[t]                                    # (Ci, C1)
            if Ci == 1:
                prod = xs * w                                # rank-1 product (VPU)
            else:
                prod = jnp.dot(xs, w, preferred_element_type=jnp.float32)
            if t == 0:
                c1_ref[...] = prod
            else:
                c1_ref[...] += prod
        c1_ref[...] = jnp.maximum(c1_ref[...] + b1_ref[...], 0.0)

        # ---------- maxpool 2x2 : two shifted whole-array maxima --------------
        a1 = jnp.maximum(c1_ref[pl.ds(0, S1 - 1), :],
                         c1_ref[pl.ds(1, S1 - 1), :])        # x-pair max
        p1_ref[...] = jnp.maximum(a1[:P1, :], a1[W:W + P1, :])   # y-pair max

        # ---------- conv2 + bias + ReLU : K*K shifted MXU matmuls -------------
        for t, (ky, kx) in enumerate(taps):
            d = RS1 * ky + CS1 * kx
            ps = p1_ref[pl.ds(d, S2), :]                     # (S2, C1)
            prod = jnp.dot(ps, w2_ref[t],
                           preferred_element_type=jnp.float32)   # (S2, C2)
            if t == 0:
                c2_ref[...] = prod
            else:
                c2_ref[...] += prod
        c2_ref[...] = jnp.maximum(c2_ref[...] + b2_ref[...], 0.0)

        # ---------- maxpool 2x2 ------------------------------------------------
        a2 = jnp.maximum(c2_ref[pl.ds(0, A2), :],
                         c2_ref[pl.ds(CS1, A2), :])          # x-pair max
        p2_ref[...] = jnp.maximum(a2[:P2, :], a2[RS1:RS1 + P2, :])   # y-pair max

        # ---------- linear + ReLU (PyTorch flatten order folded into wl) ------
        acc = bl_ref[...].astype(jnp.float32)                # (1, O)
        for j, u in enumerate(pool2_pos):                    # Hp2*Wp2 positions
            acc = acc + jnp.dot(p2_ref[u:u + 1, :], wl_ref[j],
                                preferred_element_type=jnp.float32)
        out_ref[...] = jnp.maximum(acc, 0.0).astype(out_ref.dtype)

    return kernel


# ------------------------------ wrappers ------------------------------------- #

def prepare_cnn_params(params):
    """One-time weight relayout (belongs in model init, not the forward path)."""
    w1, b1 = params["w1"], params["b1"]        # (C1, Ci, K, K), (C1,)
    w2, b2 = params["w2"], params["b2"]        # (C2, C1, K, K), (C2,)
    wl, bl = params["wl"], params["bl"]        # (O, C2*Hp2*Wp2), (O,)
    C1, Ci, K, _ = w1.shape
    C2 = w2.shape[0]
    O, F = wl.shape
    P = F // C2                                # number of pooled spatial positions
    assert P * C2 == F, "linear_size must be C2 * Hp2 * Wp2"
    return dict(
        w1=jnp.transpose(w1, (2, 3, 1, 0)).reshape(K * K, Ci, C1),
        b1=b1.reshape(1, C1),
        w2=jnp.transpose(w2, (2, 3, 1, 0)).reshape(K * K, C1, C2),
        b2=b2.reshape(1, C2),
        # fold the NCHW .view(N,-1) flatten order into the linear weight:
        wl=jnp.transpose(wl.reshape(O, C2, P), (2, 1, 0)),   # (P, C2, O)
        bl=bl.reshape(1, O),
    )


@jax.jit
def cnn_forward(x, prep):
    """Fused Pallas forward of the PyTorch `Cnn` module.  x: (N, Ci, H, W)."""
    w1_r, b1r = prep["w1"], prep["b1"]
    w2_r, b2r = prep["w2"], prep["b2"]
    wl_r, blr = prep["wl"], prep["bl"]

    N, Ci, H, W = x.shape
    KK, Ci_w, C1 = w1_r.shape
    K = math.isqrt(KK)
    C2 = w2_r.shape[2]
    P, _, O = wl_r.shape
    assert Ci == Ci_w

    H1, W1 = H - K + 1, W - K + 1              # conv1 output
    Hp1, Wp1 = H1 // 2, W1 // 2                # pool1 output (floor, PyTorch default)
    H2, W2 = Hp1 - K + 1, Wp1 - K + 1          # conv2 output
    Hp2, Wp2 = H2 // 2, W2 // 2                # pool2 output
    assert P == Hp2 * Wp2, "linear_size mismatch with input resolution"

    S0 = H * W
    S1 = (H1 - 1) * W + W1                     # conv1 flattened rows computed
    P1 = S1 - 1 - W                            # pool1 flattened rows computed
    RS1, CS1 = 2 * W, 2                        # pooled-row strides after pool1
    S2 = RS1 * (H2 - 1) + CS1 * (W2 - 1) + 1   # conv2 flattened rows computed
    A2 = S2 - CS1
    P2 = A2 - RS1                              # pool2 flattened rows computed
    pool2_pos = [2 * RS1 * py + 2 * CS1 * px
                 for py in range(Hp2) for px in range(Wp2)]

    # For Ci == 1 this transpose is layout-free; it presents the kernel with a
    # (spatial-rows, channel-lanes) slab it can slice with constant offsets.
    x_flat = jnp.transpose(x, (0, 2, 3, 1)).reshape(N, S0, Ci)

    kernel = _make_kernel(K=K, W=W, Ci=Ci, S1=S1, P1=P1, RS1=RS1, CS1=CS1,
                          S2=S2, A2=A2, P2=P2, pool2_pos=pool2_pos)

    out = pl.pallas_call(
        kernel,
        out_shape=jax.ShapeDtypeStruct((N, 1, O), x.dtype),
        grid=(N,),
        in_specs=[
            pl.BlockSpec((None, S0, Ci), lambda n: (n, 0, 0)),   # per-image input
            pl.BlockSpec((KK, Ci, C1), lambda n: (0, 0, 0)),     # conv1 weights
            pl.BlockSpec((1, C1), lambda n: (0, 0)),             # conv1 bias
            pl.BlockSpec((KK, C1, C2), lambda n: (0, 0, 0)),     # conv2 weights
            pl.BlockSpec((1, C2), lambda n: (0, 0)),             # conv2 bias
            pl.BlockSpec((P, C2, O), lambda n: (0, 0, 0)),       # linear weights
            pl.BlockSpec((1, O), lambda n: (0, 0)),              # linear bias
        ],
        out_specs=pl.BlockSpec((None, 1, O), lambda n: (n, 0, 0)),
        scratch_shapes=[
            pltpu.VMEM((S1, C1), jnp.float32),   # conv1 accumulator / activation
            pltpu.VMEM((P1, C1), jnp.float32),   # pool1 output (strided-valid rows)
            pltpu.VMEM((S2, C2), jnp.float32),   # conv2 accumulator / activation
            pltpu.VMEM((P2, C2), jnp.float32),   # pool2 output (strided-valid rows)
        ],
        compiler_params=pltpu.CompilerParams(
            dimension_semantics=("parallel",)),  # engages v7x's 2nd TensorCore
    )(x_flat, w1_r, b1r, w2_r, b2r, wl_r, blr)
    return out.reshape(N, O)


# ------------------------- reference (pure JAX) ------------------------------ #

def cnn_reference(x, p):
    def conv(x, w, b):
        y = jax.lax.conv_general_dilated(
            x, w, (1, 1), "VALID",
            dimension_numbers=("NCHW", "OIHW", "NCHW"),
            precision=jax.lax.Precision.HIGHEST)
        return jnp.maximum(y + b[None, :, None, None], 0.0)

    def pool(x):
        return jax.lax.reduce_window(
            x, -jnp.inf, jax.lax.max, (1, 1, 2, 2), (1, 1, 2, 2), "VALID")

    out = pool(conv(x, p["w1"], p["b1"]))
    out = pool(conv(out, p["w2"], p["b2"]))
    out = out.reshape(x.shape[0], -1)
    return jnp.maximum(out @ p["wl"].T + p["bl"], 0.0)


# ------------------------------ main ----------------------------------------- #

def init_params(key, in1=1, out1=10, k=3, linear_size=80, n_out=2):
    k1, k2, k3, k4, k5, k6 = jax.random.split(key, 6)
    return dict(
        w1=jax.random.normal(k1, (out1, in1, k, k), jnp.float32) * 0.1,
        b1=jax.random.normal(k2, (out1,), jnp.float32) * 0.1,
        w2=jax.random.normal(k3, (2 * out1, out1, k, k), jnp.float32) * 0.05,
        b2=jax.random.normal(k4, (2 * out1,), jnp.float32) * 0.05,
        wl=jax.random.normal(k5, (n_out, linear_size), jnp.float32) * 0.1,
        bl=jax.random.normal(k6, (n_out,), jnp.float32) * 0.1,
    )


if __name__ == "__main__":
    # Cnn(n_classes=2, in1=1, out1=10, linear_size=80, k_size=3)
    # 16x16 input -> conv1 14x14 -> pool 7x7 -> conv2 5x5 -> pool 2x2
    # -> flatten 20*2*2 = 80 -> Linear(80, 2) -> ReLU
    key = jax.random.PRNGKey(0)
    pkey, xkey = jax.random.split(key)
    params = init_params(pkey, in1=1, out1=10, k=3, linear_size=80, n_out=2)
    x = jax.random.normal(xkey, (2, 1, 16, 16), jnp.float32)

    prep = jax.block_until_ready(prepare_cnn_params(params))  # one-time relayout
    out = jax.block_until_ready(cnn_forward(x, prep))
    ref = jax.block_until_ready(cnn_reference(x, params))

    assert out.shape == (2, 2), out.shape
    assert jnp.all(jnp.isfinite(out))
    assert jnp.allclose(out, ref, atol=1e-2, rtol=1e-2), (out, ref)
    print("KERNEL_OK")
</pallas_src>

<mosaic_0001>
module attributes {stable_mosaic.version = 11 : i64} {
  func.func @kernel(%arg0: i32, %arg1: memref<1x256x1xf32, #tpu.memory_space<vmem>>, %arg2: memref<9x1x10xf32, #tpu.memory_space<vmem>>, %arg3: memref<1x10xf32, #tpu.memory_space<vmem>>, %arg4: memref<9x10x20xf32, #tpu.memory_space<vmem>>, %arg5: memref<1x20xf32, #tpu.memory_space<vmem>>, %arg6: memref<4x20x2xf32, #tpu.memory_space<vmem>>, %arg7: memref<1x2xf32, #tpu.memory_space<vmem>>, %arg8: memref<1x1x2xf32, #tpu.memory_space<vmem>>, %arg9: memref<222x10xf32, #tpu.memory_space<vmem>>, %arg10: memref<205x10xf32, #tpu.memory_space<vmem>>, %arg11: memref<137x20xf32, #tpu.memory_space<vmem>>, %arg12: memref<103x20xf32, #tpu.memory_space<vmem>>) attributes {dimension_semantics = [#tpu.dimension_semantics<parallel>], iteration_bounds = array<i64: 2>, scalar_prefetch = 0 : i64, scratch_operands = 4 : i64, tpu.core_type = #tpu.core_type<tc>, window_params = [{transform_indices = @transform_0, window_bounds = array<i64: 1, 256, 1>}, {pipeline_mode = #tpu.pipeline_mode<synchronous>, transform_indices = @transform_1, window_bounds = array<i64: 9, 1, 10>}, {pipeline_mode = #tpu.pipeline_mode<synchronous>, transform_indices = @transform_2, window_bounds = array<i64: 1, 10>}, {pipeline_mode = #tpu.pipeline_mode<synchronous>, transform_indices = @transform_3, window_bounds = array<i64: 9, 10, 20>}, {pipeline_mode = #tpu.pipeline_mode<synchronous>, transform_indices = @transform_4, window_bounds = array<i64: 1, 20>}, {pipeline_mode = #tpu.pipeline_mode<synchronous>, transform_indices = @transform_5, window_bounds = array<i64: 4, 20, 2>}, {pipeline_mode = #tpu.pipeline_mode<synchronous>, transform_indices = @transform_6, window_bounds = array<i64: 1, 2>}, {transform_indices = @transform_7, window_bounds = array<i64: 1, 1, 2>}]} {
    %c0 = arith.constant 0 : index
    %c0_0 = arith.constant 0 : index
    %c0_1 = arith.constant 0 : index
    %0 = vector.load %arg1[%c0, %c0_0, %c0_1] : memref<1x256x1xf32, #tpu.memory_space<vmem>>, vector<1x222x1xf32>
    %1 = vector.shape_cast %0 : vector<1x222x1xf32> to vector<222x1xf32>
    %c0_2 = arith.constant 0 : index
    %c0_3 = arith.constant 0 : index
    %c0_4 = arith.constant 0 : index
    %2 = vector.load %arg2[%c0_2, %c0_3, %c0_4] : memref<9x1x10xf32, #tpu.memory_space<vmem>>, vector<1x1x10xf32>
    %3 = vector.shape_cast %2 : vector<1x1x10xf32> to vector<1x10xf32>
    %4 = vector.broadcast %1 : vector<222x1xf32> to vector<222x10xf32>
    %5 = vector.broadcast %3 : vector<1x10xf32> to vector<222x10xf32>
    %6 = arith.mulf %4, %5 : vector<222x10xf32>
    %c0_5 = arith.constant 0 : index
    %c0_6 = arith.constant 0 : index
    %7 = vector.load %arg9[%c0_5, %c0_6] : memref<222x10xf32, #tpu.memory_space<vmem>>, vector<222x10xf32>
    tpu.vector_store %arg9[%c0_5, %c0_6], %6 {strides = array<i32>} : memref<222x10xf32, #tpu.memory_space<vmem>>, vector<222x10xf32>,
    %c0_7 = arith.constant 0 : index
    %c1 = arith.constant 1 : index
    %c0_8 = arith.constant 0 : index
    %8 = vector.load %arg1[%c0_7, %c1, %c0_8] : memref<1x256x1xf32, #tpu.memory_space<vmem>>, vector<1x222x1xf32>
    %9 = vector.shape_cast %8 : vector<1x222x1xf32> to vector<222x1xf32>
    %c1_9 = arith.constant 1 : index
    %c0_10 = arith.constant 0 : index
    %c0_11 = arith.constant 0 : index
    %10 = vector.load %arg2[%c1_9, %c0_10, %c0_11] : memref<9x1x10xf32, #tpu.memory_space<vmem>>, vector<1x1x10xf32>
    %11 = vector.shape_cast %10 : vector<1x1x10xf32> to vector<1x10xf32>
    %12 = vector.broadcast %9 : vector<222x1xf32> to vector<222x10xf32>
    %13 = vector.broadcast %11 : vector<1x10xf32> to vector<222x10xf32>
    %14 = arith.mulf %12, %13 : vector<222x10xf32>
    %c0_12 = arith.constant 0 : index
    %c0_13 = arith.constant 0 : index
    %15 = vector.load %arg9[%c0_12, %c0_13] : memref<222x10xf32, #tpu.memory_space<vmem>>, vector<222x10xf32>
    %16 = arith.addf %15, %14 : vector<222x10xf32>
    %c0_14 = arith.constant 0 : index
    %c0_15 = arith.constant 0 : index
    %17 = vector.load %arg9[%c0_14, %c0_15] : memref<222x10xf32, #tpu.memory_space<vmem>>, vector<222x10xf32>
    tpu.vector_store %arg9[%c0_14, %c0_15], %16 {strides = array<i32>} : memref<222x10xf32, #tpu.memory_space<vmem>>, vector<222x10xf32>,
    %c0_16 = arith.constant 0 : index
    %c2 = arith.constant 2 : index
    %c0_17 = arith.constant 0 : index
    %18 = vector.load %arg1[%c0_16, %c2, %c0_17] : memref<1x256x1xf32, #tpu.memory_space<vmem>>, vector<1x222x1xf32>
    %19 = vector.shape_cast %18 : vector<1x222x1xf32> to vector<222x1xf32>
    %c2_18 = arith.constant 2 : index
    %c0_19 = arith.constant 0 : index
    %c0_20 = arith.constant 0 : index
    %20 = vector.load %arg2[%c2_18, %c0_19, %c0_20] : memref<9x1x10xf32, #tpu.memory_space<vmem>>, vector<1x1x10xf32>
    %21 = vector.shape_cast %20 : vector<1x1x10xf32> to vector<1x10xf32>
    %22 = vector.broadcast %19 : vector<222x1xf32> to vector<222x10xf32>
    %23 = vector.broadcast %21 : vector<1x10xf32> to vector<222x10xf32>
    %24 = arith.mulf %22, %23 : vector<222x10xf32>
    %c0_21 = arith.constant 0 : index
    %c0_22 = arith.constant 0 : index
    %25 = vector.load %arg9[%c0_21, %c0_22] : memref<222x10xf32, #tpu.memory_space<vmem>>, vector<222x10xf32>
    %26 = arith.addf %25, %24 : vector<222x10xf32>
    %c0_23 = arith.constant 0 : index
    %c0_24 = arith.constant 0 : index
    %27 = vector.load %arg9[%c0_23, %c0_24] : memref<222x10xf32, #tpu.memory_space<vmem>>, vector<222x10xf32>
    tpu.vector_store %arg9[%c0_23, %c0_24], %26 {strides = array<i32>} : memref<222x10xf32, #tpu.memory_space<vmem>>, vector<222x10xf32>,
    %c0_25 = arith.constant 0 : index
    %c16 = arith.constant 16 : index
    %c0_26 = arith.constant 0 : index
    %28 = vector.load %arg1[%c0_25, %c16, %c0_26] : memref<1x256x1xf32, #tpu.memory_space<vmem>>, vector<1x222x1xf32>
    %29 = vector.shape_cast %28 : vector<1x222x1xf32> to vector<222x1xf32>
    %c3 = arith.constant 3 : index
    %c0_27 = arith.constant 0 : index
    %c0_28 = arith.constant 0 : index
    %30 = vector.load %arg2[%c3, %c0_27, %c0_28] : memref<9x1x10xf32, #tpu.memory_space<vmem>>, vector<1x1x10xf32>
    %31 = vector.shape_cast %30 : vector<1x1x10xf32> to vector<1x10xf32>
    %32 = vector.broadcast %29 : vector<222x1xf32> to vector<222x10xf32>
    %33 = vector.broadcast %31 : vector<1x10xf32> to vector<222x10xf32>
    %34 = arith.mulf %32, %33 : vector<222x10xf32>
    %c0_29 = arith.constant 0 : index
    %c0_30 = arith.constant 0 : index
    %35 = vector.load %arg9[%c0_29, %c0_30] : memref<222x10xf32, #tpu.memory_space<vmem>>, vector<222x10xf32>
    %36 = arith.addf %35, %34 : vector<222x10xf32>
    %c0_31 = arith.constant 0 : index
    %c0_32 = arith.constant 0 : index
    %37 = vector.load %arg9[%c0_31, %c0_32] : memref<222x10xf32, #tpu.memory_space<vmem>>, vector<222x10xf32>
    tpu.vector_store %arg9[%c0_31, %c0_32], %36 {strides = array<i32>} : memref<222x10xf32, #tpu.memory_space<vmem>>, vector<222x10xf32>,
    %c0_33 = arith.constant 0 : index
    %c17 = arith.constant 17 : index
    %c0_34 = arith.constant 0 : index
    %38 = vector.load %arg1[%c0_33, %c17, %c0_34] : memref<1x256x1xf32, #tpu.memory_space<vmem>>, vector<1x222x1xf32>
    %39 = vector.shape_cast %38 : vector<1x222x1xf32> to vector<222x1xf32>
    %c4 = arith.constant 4 : index
    %c0_35 = arith.constant 0 : index
    %c0_36 = arith.constant 0 : index
    %40 = vector.load %arg2[%c4, %c0_35, %c0_36] : memref<9x1x10xf32, #tpu.memory_space<vmem>>, vector<1x1x10xf32>
    %41 = vector.shape_cast %40 : vector<1x1x10xf32> to vector<1x10xf32>
    %42 = vector.broadcast %39 : vector<222x1xf32> to vector<222x10xf32>
    %43 = vector.broadcast %41 : vector<1x10xf32> to vector<222x10xf32>
    %44 = arith.mulf %42, %43 : vector<222x10xf32>
    %c0_37 = arith.constant 0 : index
    %c0_38 = arith.constant 0 : index
    %45 = vector.load %arg9[%c0_37, %c0_38] : memref<222x10xf32, #tpu.memory_space<vmem>>, vector<222x10xf32>
    %46 = arith.addf %45, %44 : vector<222x10xf32>
    %c0_39 = arith.constant 0 : index
    %c0_40 = arith.constant 0 : index
    %47 = vector.load %arg9[%c0_39, %c0_40] : memref<222x10xf32, #tpu.memory_space<vmem>>, vector<222x10xf32>
    tpu.vector_store %arg9[%c0_39, %c0_40], %46 {strides = array<i32>} : memref<222x10xf32, #tpu.memory_space<vmem>>, vector<222x10xf32>,
    %c0_41 = arith.constant 0 : index
    %c18 = arith.constant 18 : index
    %c0_42 = arith.constant 0 : index
    %48 = vector.load %arg1[%c0_41, %c18, %c0_42] : memref<1x256x1xf32, #tpu.memory_space<vmem>>, vector<1x222x1xf32>
    %49 = vector.shape_cast %48 : vector<1x222x1xf32> to vector<222x1xf32>
    %c5 = arith.constant 5 : index
    %c0_43 = arith.constant 0 : index
    %c0_44 = arith.constant 0 : index
    %50 = vector.load %arg2[%c5, %c0_43, %c0_44] : memref<9x1x10xf32, #tpu.memory_space<vmem>>, vector<1x1x10xf32>
    %51 = vector.shape_cast %50 : vector<1x1x10xf32> to vector<1x10xf32>
    %52 = vector.broadcast %49 : vector<222x1xf32> to vector<222x10xf32>
    %53 = vector.broadcast %51 : vector<1x10xf32> to vector<222x10xf32>
    %54 = arith.mulf %52, %53 : vector<222x10xf32>
    %c0_45 = arith.constant 0 : index
    %c0_46 = arith.constant 0 : index
    %55 = vector.load %arg9[%c0_45, %c0_46] : memref<222x10xf32, #tpu.memory_space<vmem>>, vector<222x10xf32>
    %56 = arith.addf %55, %54 : vector<222x10xf32>
    %c0_47 = arith.constant 0 : index
    %c0_48 = arith.constant 0 : index
    %57 = vector.load %arg9[%c0_47, %c0_48] : memref<222x10xf32, #tpu.memory_space<vmem>>, vector<222x10xf32>
    tpu.vector_store %arg9[%c0_47, %c0_48], %56 {strides = array<i32>} : memref<222x10xf32, #tpu.memory_space<vmem>>, vector<222x10xf32>,
    %c0_49 = arith.constant 0 : index
    %c32 = arith.constant 32 : index
    %c0_50 = arith.constant 0 : index
    %58 = vector.load %arg1[%c0_49, %c32, %c0_50] : memref<1x256x1xf32, #tpu.memory_space<vmem>>, vector<1x222x1xf32>
    %59 = vector.shape_cast %58 : vector<1x222x1xf32> to vector<222x1xf32>
    %c6 = arith.constant 6 : index
    %c0_51 = arith.constant 0 : index
    %c0_52 = arith.constant 0 : index
    %60 = vector.load %arg2[%c6, %c0_51, %c0_52] : memref<9x1x10xf32, #tpu.memory_space<vmem>>, vector<1x1x10xf32>
    %61 = vector.shape_cast %60 : vector<1x1x10xf32> to vector<1x10xf32>
    %62 = vector.broadcast %59 : vector<222x1xf32> to vector<222x10xf32>
    %63 = vector.broadcast %61 : vector<1x10xf32> to vector<222x10xf32>
    %64 = arith.mulf %62, %63 : vector<222x10xf32>
    %c0_53 = arith.constant 0 : index
    %c0_54 = arith.constant 0 : index
    %65 = vector.load %arg9[%c0_53, %c0_54] : memref<222x10xf32, #tpu.memory_space<vmem>>, vector<222x10xf32>
    %66 = arith.addf %65, %64 : vector<222x10xf32>
    %c0_55 = arith.constant 0 : index
    %c0_56 = arith.constant 0 : index
    %67 = vector.load %arg9[%c0_55, %c0_56] : memref<222x10xf32, #tpu.memory_space<vmem>>, vector<222x10xf32>
    tpu.vector_store %arg9[%c0_55, %c0_56], %66 {strides = array<i32>} : memref<222x10xf32, #tpu.memory_space<vmem>>, vector<222x10xf32>,
    %c0_57 = arith.constant 0 : index
    %c33 = arith.constant 33 : index
    %c0_58 = arith.constant 0 : index
    %68 = vector.load %arg1[%c0_57, %c33, %c0_58] : memref<1x256x1xf32, #tpu.memory_space<vmem>>, vector<1x222x1xf32>
    %69 = vector.shape_cast %68 : vector<1x222x1xf32> to vector<222x1xf32>
    %c7 = arith.constant 7 : index
    %c0_59 = arith.constant 0 : index
    %c0_60 = arith.constant 0 : index
    %70 = vector.load %arg2[%c7, %c0_59, %c0_60] : memref<9x1x10xf32, #tpu.memory_space<vmem>>, vector<1x1x10xf32>
    %71 = vector.shape_cast %70 : vector<1x1x10xf32> to vector<1x10xf32>
    %72 = vector.broadcast %69 : vector<222x1xf32> to vector<222x10xf32>
    %73 = vector.broadcast %71 : vector<1x10xf32> to vector<222x10xf32>
    %74 = arith.mulf %72, %73 : vector<222x10xf32>
    %c0_61 = arith.constant 0 : index
    %c0_62 = arith.constant 0 : index
    %75 = vector.load %arg9[%c0_61, %c0_62] : memref<222x10xf32, #tpu.memory_space<vmem>>, vector<222x10xf32>
    %76 = arith.addf %75, %74 : vector<222x10xf32>
    %c0_63 = arith.constant 0 : index
    %c0_64 = arith.constant 0 : index
    %77 = vector.load %arg9[%c0_63, %c0_64] : memref<222x10xf32, #tpu.memory_space<vmem>>, vector<222x10xf32>
    tpu.vector_store %arg9[%c0_63, %c0_64], %76 {strides = array<i32>} : memref<222x10xf32, #tpu.memory_space<vmem>>, vector<222x10xf32>,
    %c0_65 = arith.constant 0 : index
    %c34 = arith.constant 34 : index
    %c0_66 = arith.constant 0 : index
    %78 = vector.load %arg1[%c0_65, %c34, %c0_66] : memref<1x256x1xf32, #tpu.memory_space<vmem>>, vector<1x222x1xf32>
    %79 = vector.shape_cast %78 : vector<1x222x1xf32> to vector<222x1xf32>
    %c8 = arith.constant 8 : index
    %c0_67 = arith.constant 0 : index
    %c0_68 = arith.constant 0 : index
    %80 = vector.load %arg2[%c8, %c0_67, %c0_68] : memref<9x1x10xf32, #tpu.memory_space<vmem>>, vector<1x1x10xf32>
    %81 = vector.shape_cast %80 : vector<1x1x10xf32> to vector<1x10xf32>
    %82 = vector.broadcast %79 : vector<222x1xf32> to vector<222x10xf32>
    %83 = vector.broadcast %81 : vector<1x10xf32> to vector<222x10xf32>
    %84 = arith.mulf %82, %83 : vector<222x10xf32>
    %c0_69 = arith.constant 0 : index
    %c0_70 = arith.constant 0 : index
    %85 = vector.load %arg9[%c0_69, %c0_70] : memref<222x10xf32, #tpu.memory_space<vmem>>, vector<222x10xf32>
    %86 = arith.addf %85, %84 : vector<222x10xf32>
    %c0_71 = arith.constant 0 : index
    %c0_72 = arith.constant 0 : index
    %87 = vector.load %arg9[%c0_71, %c0_72] : memref<222x10xf32, #tpu.memory_space<vmem>>, vector<222x10xf32>
    tpu.vector_store %arg9[%c0_71, %c0_72], %86 {strides = array<i32>} : memref<222x10xf32, #tpu.memory_space<vmem>>, vector<222x10xf32>,
    %c0_73 = arith.constant 0 : index
    %c0_74 = arith.constant 0 : index
    %88 = vector.load %arg9[%c0_73, %c0_74] : memref<222x10xf32, #tpu.memory_space<vmem>>, vector<222x10xf32>
    %c0_75 = arith.constant 0 : index
    %c0_76 = arith.constant 0 : index
    %89 = vector.load %arg3[%c0_75, %c0_76] : memref<1x10xf32, #tpu.memory_space<vmem>>, vector<1x10xf32>
    %90 = vector.broadcast %89 : vector<1x10xf32> to vector<222x10xf32>
    %91 = arith.addf %88, %90 : vector<222x10xf32>
    %cst = arith.constant 0.000000e+00 : f32
    %92 = vector.broadcast %cst : f32 to vector<222x10xf32>
    %93 = arith.maximumf %91, %92 : vector<222x10xf32>
    %c0_77 = arith.constant 0 : index
    %c0_78 = arith.constant 0 : index
    %94 = vector.load %arg9[%c0_77, %c0_78] : memref<222x10xf32, #tpu.memory_space<vmem>>, vector<222x10xf32>
    tpu.vector_store %arg9[%c0_77, %c0_78], %93 {strides = array<i32>} : memref<222x10xf32, #tpu.memory_space<vmem>>, vector<222x10xf32>,
    %c0_79 = arith.constant 0 : index
    %c0_80 = arith.constant 0 : index
    %95 = vector.load %arg9[%c0_79, %c0_80] : memref<222x10xf32, #tpu.memory_space<vmem>>, vector<221x10xf32>
    %c1_81 = arith.constant 1 : index
    %c0_82 = arith.constant 0 : index
    %96 = vector.load %arg9[%c1_81, %c0_82] : memref<222x10xf32, #tpu.memory_space<vmem>>, vector<221x10xf32>
    %97 = arith.maximumf %95, %96 : vector<221x10xf32>
    %98 = vector.extract_strided_slice %97 {offsets = [0, 0], sizes = [205, 10], strides = [1, 1]} : vector<221x10xf32> to vector<205x10xf32>
    %99 = vector.extract_strided_slice %97 {offsets = [16, 0], sizes = [205, 10], strides = [1, 1]} : vector<221x10xf32> to vector<205x10xf32>
    %100 = arith.maximumf %98, %99 : vector<205x10xf32>
    %c0_83 = arith.constant 0 : index
    %c0_84 = arith.constant 0 : index
    %101 = vector.load %arg10[%c0_83, %c0_84] : memref<205x10xf32, #tpu.memory_space<vmem>>, vector<205x10xf32>
    tpu.vector_store %arg10[%c0_83, %c0_84], %100 {strides = array<i32>} : memref<205x10xf32, #tpu.memory_space<vmem>>, vector<205x10xf32>,
    %c0_85 = arith.constant 0 : index
    %c0_86 = arith.constant 0 : index
    %102 = vector.load %arg10[%c0_85, %c0_86] : memref<205x10xf32, #tpu.memory_space<vmem>>, vector<137x10xf32>
    %c0_87 = arith.constant 0 : index
    %c0_88 = arith.constant 0 : index
    %c0_89 = arith.constant 0 : index
    %103 = vector.load %arg4[%c0_87, %c0_88, %c0_89] : memref<9x10x20xf32, #tpu.memory_space<vmem>>, vector<1x10x20xf32>
    %104 = vector.shape_cast %103 : vector<1x10x20xf32> to vector<10x20xf32>
    %cst_90 = arith.constant dense<0.000000e+00> : vector<137x20xf32>
    %105 = tpu.matmul %102, %104, %cst_90 {dimension_numbers = #tpu.dot_dimension_numbers<[1], [0], [0], [1], [0, 0, 1, 1], [], []>} : vector<137x10xf32>, vector<10x20xf32>, vector<137x20xf32> -> vector<137x20xf32>
    %c0_91 = arith.constant 0 : index
    %c0_92 = arith.constant 0 : index
    %106 = vector.load %arg11[%c0_91, %c0_92] : memref<137x20xf32, #tpu.memory_space<vmem>>, vector<137x20xf32>
    tpu.vector_store %arg11[%c0_91, %c0_92], %105 {strides = array<i32>} : memref<137x20xf32, #tpu.memory_space<vmem>>, vector<137x20xf32>,
    %c2_93 = arith.constant 2 : index
    %c0_94 = arith.constant 0 : index
    %107 = vector.load %arg10[%c2_93, %c0_94] : memref<205x10xf32, #tpu.memory_space<vmem>>, vector<137x10xf32>
    %c1_95 = arith.constant 1 : index
    %c0_96 = arith.constant 0 : index
    %c0_97 = arith.constant 0 : index
    %108 = vector.load %arg4[%c1_95, %c0_96, %c0_97] : memref<9x10x20xf32, #tpu.memory_space<vmem>>, vector<1x10x20xf32>
    %109 = vector.shape_cast %108 : vector<1x10x20xf32> to vector<10x20xf32>
    %cst_98 = arith.constant dense<0.000000e+00> : vector<137x20xf32>
    %110 = tpu.matmul %107, %109, %cst_98 {dimension_numbers = #tpu.dot_dimension_numbers<[1], [0], [0], [1], [0, 0, 1, 1], [], []>} : vector<137x10xf32>, vector<10x20xf32>, vector<137x20xf32> -> vector<137x20xf32>
    %c0_99 = arith.constant 0 : index
    %c0_100 = arith.constant 0 : index
    %111 = vector.load %arg11[%c0_99, %c0_100] : memref<137x20xf32, #tpu.memory_space<vmem>>, vector<137x20xf32>
    %112 = arith.addf %111, %110 : vector<137x20xf32>
    %c0_101 = arith.constant 0 : index
    %c0_102 = arith.constant 0 : index
    %113 = vector.load %arg11[%c0_101, %c0_102] : memref<137x20xf32, #tpu.memory_space<vmem>>, vector<137x20xf32>
    tpu.vector_store %arg11[%c0_101, %c0_102], %112 {strides = array<i32>} : memref<137x20xf32, #tpu.memory_space<vmem>>, vector<137x20xf32>,
    %c4_103 = arith.constant 4 : index
    %c0_104 = arith.constant 0 : index
    %114 = vector.load %arg10[%c4_103, %c0_104] : memref<205x10xf32, #tpu.memory_space<vmem>>, vector<137x10xf32>
    %c2_105 = arith.constant 2 : index
    %c0_106 = arith.constant 0 : index
    %c0_107 = arith.constant 0 : index
    %115 = vector.load %arg4[%c2_105, %c0_106, %c0_107] : memref<9x10x20xf32, #tpu.memory_space<vmem>>, vector<1x10x20xf32>
    %116 = vector.shape_cast %115 : vector<1x10x20xf32> to vector<10x20xf32>
    %cst_108 = arith.constant dense<0.000000e+00> : vector<137x20xf32>
    %117 = tpu.matmul %114, %116, %cst_108 {dimension_numbers = #tpu.dot_dimension_numbers<[1], [0], [0], [1], [0, 0, 1, 1], [], []>} : vector<137x10xf32>, vector<10x20xf32>, vector<137x20xf32> -> vector<137x20xf32>
    %c0_109 = arith.constant 0 : index
    %c0_110 = arith.constant 0 : index
    %118 = vector.load %arg11[%c0_109, %c0_110] : memref<137x20xf32, #tpu.memory_space<vmem>>, vector<137x20xf32>
    %119 = arith.addf %118, %117 : vector<137x20xf32>
    %c0_111 = arith.constant 0 : index
    %c0_112 = arith.constant 0 : index
    %120 = vector.load %arg11[%c0_111, %c0_112] : memref<137x20xf32, #tpu.memory_space<vmem>>, vector<137x20xf32>
    tpu.vector_store %arg11[%c0_111, %c0_112], %119 {strides = array<i32>} : memref<137x20xf32, #tpu.memory_space<vmem>>, vector<137x20xf32>,
    %c32_113 = arith.constant 32 : index
    %c0_114 = arith.constant 0 : index
    %121 = vector.load %arg10[%c32_113, %c0_114] : memref<205x10xf32, #tpu.memory_space<vmem>>, vector<137x10xf32>
    %c3_115 = arith.constant 3 : index
    %c0_116 = arith.constant 0 : index
    %c0_117 = arith.constant 0 : index
    %122 = vector.load %arg4[%c3_115, %c0_116, %c0_117] : memref<9x10x20xf32, #tpu.memory_space<vmem>>, vector<1x10x20xf32>
    %123 = vector.shape_cast %122 : vector<1x10x20xf32> to vector<10x20xf32>
    %cst_118 = arith.constant dense<0.000000e+00> : vector<137x20xf32>
    %124 = tpu.matmul %121, %123, %cst_118 {dimension_numbers = #tpu.dot_dimension_numbers<[1], [0], [0], [1], [0, 0, 1, 1], [], []>} : vector<137x10xf32>, vector<10x20xf32>, vector<137x20xf32> -> vector<137x20xf32>
    %c0_119 = arith.constant 0 : index
    %c0_120 = arith.constant 0 : index
    %125 = vector.load %arg11[%c0_119, %c0_120] : memref<137x20xf32, #tpu.memory_space<vmem>>, vector<137x20xf32>
    %126 = arith.addf %125, %124 : vector<137x20xf32>
    %c0_121 = arith.constant 0 : index
    %c0_122 = arith.constant 0 : index
    %127 = vector.load %arg11[%c0_121, %c0_122] : memref<137x20xf32, #tpu.memory_space<vmem>>, vector<137x20xf32>
    tpu.vector_store %arg11[%c0_121, %c0_122], %126 {strides = array<i32>} : memref<137x20xf32, #tpu.memory_space<vmem>>, vector<137x20xf32>,
    %c34_123 = arith.constant 34 : index
    %c0_124 = arith.constant 0 : index
    %128 = vector.load %arg10[%c34_123, %c0_124] : memref<205x10xf32, #tpu.memory_space<vmem>>, vector<137x10xf32>
    %c4_125 = arith.constant 4 : index
    %c0_126 = arith.constant 0 : index
    %c0_127 = arith.constant 0 : index
    %129 = vector.load %arg4[%c4_125, %c0_126, %c0_127] : memref<9x10x20xf32, #tpu.memory_space<vmem>>, vector<1x10x20xf32>
    %130 = vector.shape_cast %129 : vector<1x10x20xf32> to vector<10x20xf32>
    %cst_128 = arith.constant dense<0.000000e+00> : vector<137x20xf32>
    %131 = tpu.matmul %128, %130, %cst_128 {dimension_numbers = #tpu.dot_dimension_numbers<[1], [0], [0], [1], [0, 0, 1, 1], [], []>} : vector<137x10xf32>, vector<10x20xf32>, vector<137x20xf32> -> vector<137x20xf32>
    %c0_129 = arith.constant 0 : index
    %c0_130 = arith.constant 0 : index
    %132 = vector.load %arg11[%c0_129, %c0_130] : memref<137x20xf32, #tpu.memory_space<vmem>>, vector<137x20xf32>
    %133 = arith.addf %132, %131 : vector<137x20xf32>
    %c0_131 = arith.constant 0 : index
    %c0_132 = arith.constant 0 : index
    %134 = vector.load %arg11[%c0_131, %c0_132] : memref<137x20xf32, #tpu.memory_space<vmem>>, vector<137x20xf32>
    tpu.vector_store %arg11[%c0_131, %c0_132], %133 {strides = array<i32>} : memref<137x20xf32, #tpu.memory_space<vmem>>, vector<137x20xf32>,
    %c36 = arith.constant 36 : index
    %c0_133 = arith.constant 0 : index
    %135 = vector.load %arg10[%c36, %c0_133] : memref<205x10xf32, #tpu.memory_space<vmem>>, vector<137x10xf32>
    %c5_134 = arith.constant 5 : index
    %c0_135 = arith.constant 0 : index
    %c0_136 = arith.constant 0 : index
    %136 = vector.load %arg4[%c5_134, %c0_135, %c0_136] : memref<9x10x20xf32, #tpu.memory_space<vmem>>, vector<1x10x20xf32>
    %137 = vector.shape_cast %136 : vector<1x10x20xf32> to vector<10x20xf32>
    %cst_137 = arith.constant dense<0.000000e+00> : vector<137x20xf32>
    %138 = tpu.matmul %135, %137, %cst_137 {dimension_numbers = #tpu.dot_dimension_numbers<[1], [0], [0], [1], [0, 0, 1, 1], [], []>} : vector<137x10xf32>, vector<10x20xf32>, vector<137x20xf32> -> vector<137x20xf32>
    %c0_138 = arith.constant 0 : index
    %c0_139 = arith.constant 0 : index
    %139 = vector.load %arg11[%c0_138, %c0_139] : memref<137x20xf32, #tpu.memory_space<vmem>>, vector<137x20xf32>
    %140 = arith.addf %139, %138 : vector<137x20xf32>
    %c0_140 = arith.constant 0 : index
    %c0_141 = arith.constant 0 : index
    %141 = vector.load %arg11[%c0_140, %c0_141] : memref<137x20xf32, #tpu.memory_space<vmem>>, vector<137x20xf32>
    tpu.vector_store %arg11[%c0_140, %c0_141], %140 {strides = array<i32>} : memref<137x20xf32, #tpu.memory_space<vmem>>, vector<137x20xf32>,
    %c64 = arith.constant 64 : index
    %c0_142 = arith.constant 0 : index
    %142 = vector.load %arg10[%c64, %c0_142] : memref<205x10xf32, #tpu.memory_space<vmem>>, vector<137x10xf32>
    %c6_143 = arith.constant 6 : index
    %c0_144 = arith.constant 0 : index
    %c0_145 = arith.constant 0 : index
    %143 = vector.load %arg4[%c6_143, %c0_144, %c0_145] : memref<9x10x20xf32, #tpu.memory_space<vmem>>, vector<1x10x20xf32>
    %144 = vector.shape_cast %143 : vector<1x10x20xf32> to vector<10x20xf32>
    %cst_146 = arith.constant dense<0.000000e+00> : vector<137x20xf32>
    %145 = tpu.matmul %142, %144, %cst_146 {dimension_numbers = #tpu.dot_dimension_numbers<[1], [0], [0], [1], [0, 0, 1, 1], [], []>} : vector<137x10xf32>, vector<10x20xf32>, vector<137x20xf32> -> vector<137x20xf32>
    %c0_147 = arith.constant 0 : index
    %c0_148 = arith.constant 0 : index
    %146 = vector.load %arg11[%c0_147, %c0_148] : memref<137x20xf32, #tpu.memory_space<vmem>>, vector<137x20xf32>
    %147 = arith.addf %146, %145 : vector<137x20xf32>
    %c0_149 = arith.constant 0 : index
    %c0_150 = arith.constant 0 : index
    %148 = vector.load %arg11[%c0_149, %c0_150] : memref<137x20xf32, #tpu.memory_space<vmem>>, vector<137x20xf32>
    tpu.vector_store %arg11[%c0_149, %c0_150], %147 {strides = array<i32>} : memref<137x20xf32, #tpu.memory_space<vmem>>, vector<137x20xf32>,
    %c66 = arith.constant 66 : index
    %c0_151 = arith.constant 0 : index
    %149 = vector.load %arg10[%c66, %c0_151] : memref<205x10xf32, #tpu.memory_space<vmem>>, vector<137x10xf32>
    %c7_152 = arith.constant 7 : index
    %c0_153 = arith.constant 0 : index
    %c0_154 = arith.constant 0 : index
    %150 = vector.load %arg4[%c7_152, %c0_153, %c0_154] : memref<9x10x20xf32, #tpu.memory_space<vmem>>, vector<1x10x20xf32>
    %151 = vector.shape_cast %150 : vector<1x10x20xf32> to vector<10x20xf32>
    %cst_155 = arith.constant dense<0.000000e+00> : vector<137x20xf32>
    %152 = tpu.matmul %149, %151, %cst_155 {dimension_numbers = #tpu.dot_dimension_numbers<[1], [0], [0], [1], [0, 0, 1, 1], [], []>} : vector<137x10xf32>, vector<10x20xf32>, vector<137x20xf32> -> vector<137x20xf32>
    %c0_156 = arith.constant 0 : index
    %c0_157 = arith.constant 0 : index
    %153 = vector.load %arg11[%c0_156, %c0_157] : memref<137x20xf32, #tpu.memory_space<vmem>>, vector<137x20xf32>
    %154 = arith.addf %153, %152 : vector<137x20xf32>
    %c0_158 = arith.constant 0 : index
    %c0_159 = arith.constant 0 : index
    %155 = vector.load %arg11[%c0_158, %c0_159] : memref<137x20xf32, #tpu.memory_space<vmem>>, vector<137x20xf32>
    tpu.vector_store %arg11[%c0_158, %c0_159], %154 {strides = array<i32>} : memref<137x20xf32, #tpu.memory_space<vmem>>, vector<137x20xf32>,
    %c68 = arith.constant 68 : index
    %c0_160 = arith.constant 0 : index
    %156 = vector.load %arg10[%c68, %c0_160] : memref<205x10xf32, #tpu.memory_space<vmem>>, vector<137x10xf32>
    %c8_161 = arith.constant 8 : index
    %c0_162 = arith.constant 0 : index
    %c0_163 = arith.constant 0 : index
    %157 = vector.load %arg4[%c8_161, %c0_162, %c0_163] : memref<9x10x20xf32, #tpu.memory_space<vmem>>, vector<1x10x20xf32>
    %158 = vector.shape_cast %157 : vector<1x10x20xf32> to vector<10x20xf32>
    %cst_164 = arith.constant dense<0.000000e+00> : vector<137x20xf32>
    %159 = tpu.matmul %156, %158, %cst_164 {dimension_numbers = #tpu.dot_dimension_numbers<[1], [0], [0], [1], [0, 0, 1, 1], [], []>} : vector<137x10xf32>, vector<10x20xf32>, vector<137x20xf32> -> vector<137x20xf32>
    %c0_165 = arith.constant 0 : index
    %c0_166 = arith.constant 0 : index
    %160 = vector.load %arg11[%c0_165, %c0_166] : memref<137x20xf32, #tpu.memory_space<vmem>>, vector<137x20xf32>
    %161 = arith.addf %160, %159 : vector<137x20xf32>
    %c0_167 = arith.constant 0 : index
    %c0_168 = arith.constant 0 : index
    %162 = vector.load %arg11[%c0_167, %c0_168] : memref<137x20xf32, #tpu.memory_space<vmem>>, vector<137x20xf32>
    tpu.vector_store %arg11[%c0_167, %c0_168], %161 {strides = array<i32>} : memref<137x20xf32, #tpu.memory_space<vmem>>, vector<137x20xf32>,
    %c0_169 = arith.constant 0 : index
    %c0_170 = arith.constant 0 : index
    %163 = vector.load %arg11[%c0_169, %c0_170] : memref<137x20xf32, #tpu.memory_space<vmem>>, vector<137x20xf32>
    %c0_171 = arith.constant 0 : index
    %c0_172 = arith.constant 0 : index
    %164 = vector.load %arg5[%c0_171, %c0_172] : memref<1x20xf32, #tpu.memory_space<vmem>>, vector<1x20xf32>
    %165 = vector.broadcast %164 : vector<1x20xf32> to vector<137x20xf32>
    %166 = arith.addf %163, %165 : vector<137x20xf32>
    %cst_173 = arith.constant 0.000000e+00 : f32
    %167 = vector.broadcast %cst_173 : f32 to vector<137x20xf32>
    %168 = arith.maximumf %166, %167 : vector<137x20xf32>
    %c0_174 = arith.constant 0 : index
    %c0_175 = arith.constant 0 : index
    %169 = vector.load %arg11[%c0_174, %c0_175] : memref<137x20xf32, #tpu.memory_space<vmem>>, vector<137x20xf32>
    tpu.vector_store %arg11[%c0_174, %c0_175], %168 {strides = array<i32>} : memref<137x20xf32, #tpu.memory_space<vmem>>, vector<137x20xf32>,
    %c0_176 = arith.constant 0 : index
    %c0_177 = arith.constant 0 : index
    %170 = vector.load %arg11[%c0_176, %c0_177] : memref<137x20xf32, #tpu.memory_space<vmem>>, vector<135x20xf32>
    %c2_178 = arith.constant 2 : index
    %c0_179 = arith.constant 0 : index
    %171 = vector.load %arg11[%c2_178, %c0_179] : memref<137x20xf32, #tpu.memory_space<vmem>>, vector<135x20xf32>
    %172 = arith.maximumf %170, %171 : vector<135x20xf32>
    %173 = vector.extract_strided_slice %172 {offsets = [0, 0], sizes = [103, 20], strides = [1, 1]} : vector<135x20xf32> to vector<103x20xf32>
    %174 = vector.extract_strided_slice %172 {offsets = [32, 0], sizes = [103, 20], strides = [1, 1]} : vector<135x20xf32> to vector<103x20xf32>
    %175 = arith.maximumf %173, %174 : vector<103x20xf32>
    %c0_180 = arith.constant 0 : index
    %c0_181 = arith.constant 0 : index
    %176 = vector.load %arg12[%c0_180, %c0_181] : memref<103x20xf32, #tpu.memory_space<vmem>>, vector<103x20xf32>
    tpu.vector_store %arg12[%c0_180, %c0_181], %175 {strides = array<i32>} : memref<103x20xf32, #tpu.memory_space<vmem>>, vector<103x20xf32>,
    %c0_182 = arith.constant 0 : index
    %c0_183 = arith.constant 0 : index
    %177 = vector.load %arg7[%c0_182, %c0_183] : memref<1x2xf32, #tpu.memory_space<vmem>>, vector<1x2xf32>
    %c0_184 = arith.constant 0 : index
    %c0_185 = arith.constant 0 : index
    %178 = vector.load %arg12[%c0_184, %c0_185] : memref<103x20xf32, #tpu.memory_space<vmem>>, vector<1x20xf32>
    %c0_186 = arith.constant 0 : index
    %c0_187 = arith.constant 0 : index
    %c0_188 = arith.constant 0 : index
    %179 = vector.load %arg6[%c0_186, %c0_187, %c0_188] : memref<4x20x2xf32, #tpu.memory_space<vmem>>, vector<1x20x2xf32>
    %180 = vector.shape_cast %179 : vector<1x20x2xf32> to vector<20x2xf32>
    %cst_189 = arith.constant dense<0.000000e+00> : vector<1x2xf32>
    %181 = tpu.matmul %178, %180, %cst_189 {dimension_numbers = #tpu.dot_dimension_numbers<[1], [0], [0], [1], [0, 0, 1, 1], [], []>} : vector<1x20xf32>, vector<20x2xf32>, vector<1x2xf32> -> vector<1x2xf32>
    %182 = arith.addf %177, %181 : vector<1x2xf32>
    %c4_190 = arith.constant 4 : index
    %c0_191 = arith.constant 0 : index
    %183 = vector.load %arg12[%c4_190, %c0_191] : memref<103x20xf32, #tpu.memory_space<vmem>>, vector<1x20xf32>
    %c1_192 = arith.constant 1 : index
    %c0_193 = arith.constant 0 : index
    %c0_194 = arith.constant 0 : index
    %184 = vector.load %arg6[%c1_192, %c0_193, %c0_194] : memref<4x20x2xf32, #tpu.memory_space<vmem>>, vector<1x20x2xf32>
    %185 = vector.shape_cast %184 : vector<1x20x2xf32> to vector<20x2xf32>
    %cst_195 = arith.constant dense<0.000000e+00> : vector<1x2xf32>
    %186 = tpu.matmul %183, %185, %cst_195 {dimension_numbers = #tpu.dot_dimension_numbers<[1], [0], [0], [1], [0, 0, 1, 1], [], []>} : vector<1x20xf32>, vector<20x2xf32>, vector<1x2xf32> -> vector<1x2xf32>
    %187 = arith.addf %182, %186 : vector<1x2xf32>
    %c64_196 = arith.constant 64 : index
    %c0_197 = arith.constant 0 : index
    %188 = vector.load %arg12[%c64_196, %c0_197] : memref<103x20xf32, #tpu.memory_space<vmem>>, vector<1x20xf32>
    %c2_198 = arith.constant 2 : index
    %c0_199 = arith.constant 0 : index
    %c0_200 = arith.constant 0 : index
    %189 = vector.load %arg6[%c2_198, %c0_199, %c0_200] : memref<4x20x2xf32, #tpu.memory_space<vmem>>, vector<1x20x2xf32>
    %190 = vector.shape_cast %189 : vector<1x20x2xf32> to vector<20x2xf32>
    %cst_201 = arith.constant dense<0.000000e+00> : vector<1x2xf32>
    %191 = tpu.matmul %188, %190, %cst_201 {dimension_numbers = #tpu.dot_dimension_numbers<[1], [0], [0], [1], [0, 0, 1, 1], [], []>} : vector<1x20xf32>, vector<20x2xf32>, vector<1x2xf32> -> vector<1x2xf32>
    %192 = arith.addf %187, %191 : vector<1x2xf32>
    %c68_202 = arith.constant 68 : index
    %c0_203 = arith.constant 0 : index
    %193 = vector.load %arg12[%c68_202, %c0_203] : memref<103x20xf32, #tpu.memory_space<vmem>>, vector<1x20xf32>
    %c3_204 = arith.constant 3 : index
    %c0_205 = arith.constant 0 : index
    %c0_206 = arith.constant 0 : index
    %194 = vector.load %arg6[%c3_204, %c0_205, %c0_206] : memref<4x20x2xf32, #tpu.memory_space<vmem>>, vector<1x20x2xf32>
    %195 = vector.shape_cast %194 : vector<1x20x2xf32> to vector<20x2xf32>
    %cst_207 = arith.constant dense<0.000000e+00> : vector<1x2xf32>
    %196 = tpu.matmul %193, %195, %cst_207 {dimension_numbers = #tpu.dot_dimension_numbers<[1], [0], [0], [1], [0, 0, 1, 1], [], []>} : vector<1x20xf32>, vector<20x2xf32>, vector<1x2xf32> -> vector<1x2xf32>
    %197 = arith.addf %192, %196 : vector<1x2xf32>
    %cst_208 = arith.constant 0.000000e+00 : f32
    %198 = vector.broadcast %cst_208 : f32 to vector<1x2xf32>
    %199 = arith.maximumf %197, %198 : vector<1x2xf32>
    %c0_209 = arith.constant 0 : index
    %c0_210 = arith.constant 0 : index
    %c0_211 = arith.constant 0 : index
    %200 = vector.load %arg8[%c0_209, %c0_210, %c0_211] : memref<1x1x2xf32, #tpu.memory_space<vmem>>, vector<1x1x2xf32>
    %201 = vector.shape_cast %200 : vector<1x1x2xf32> to vector<1x2xf32>
    %202 = vector.shape_cast %199 : vector<1x2xf32> to vector<1x1x2xf32>
    tpu.vector_store %arg8[%c0_209, %c0_210, %c0_211], %202 {strides = array<i32>} : memref<1x1x2xf32, #tpu.memory_space<vmem>>, vector<1x1x2xf32>,
    return
  }
  func.func @transform_0(%arg0: i32) -> (i32, i32, i32) {
    %c0_i32 = arith.constant 0 : i32
    %c0_i32_0 = arith.constant 0 : i32
    %c0_i32_1 = arith.constant 0 : i32
    return %arg0, %c0_i32, %c0_i32_0 : i32, i32, i32
  }
  func.func @transform_1(%arg0: i32) -> (i32, i32, i32) {
    %c0_i32 = arith.constant 0 : i32
    %c0_i32_0 = arith.constant 0 : i32
    %c0_i32_1 = arith.constant 0 : i32
    %c0_i32_2 = arith.constant 0 : i32
    return %c0_i32, %c0_i32_0, %c0_i32_1 : i32, i32, i32
  }
  func.func @transform_2(%arg0: i32) -> (i32, i32) {
    %c0_i32 = arith.constant 0 : i32
    %c0_i32_0 = arith.constant 0 : i32
    %c0_i32_1 = arith.constant 0 : i32
    return %c0_i32, %c0_i32_0 : i32, i32
  }
  func.func @transform_3(%arg0: i32) -> (i32, i32, i32) {
    %c0_i32 = arith.constant 0 : i32
    %c0_i32_0 = arith.constant 0 : i32
    %c0_i32_1 = arith.constant 0 : i32
    %c0_i32_2 = arith.constant 0 : i32
    return %c0_i32, %c0_i32_0, %c0_i32_1 : i32, i32, i32
  }
  func.func @transform_4(%arg0: i32) -> (i32, i32) {
    %c0_i32 = arith.constant 0 : i32
    %c0_i32_0 = arith.constant 0 : i32
    %c0_i32_1 = arith.constant 0 : i32
    return %c0_i32, %c0_i32_0 : i32, i32
  }
  func.func @transform_5(%arg0: i32) -> (i32, i32, i32) {
    %c0_i32 = arith.constant 0 : i32
    %c0_i32_0 = arith.constant 0 : i32
    %c0_i32_1 = arith.constant 0 : i32
    %c0_i32_2 = arith.constant 0 : i32
    return %c0_i32, %c0_i32_0, %c0_i32_1 : i32, i32, i32
  }
  func.func @transform_6(%arg0: i32) -> (i32, i32) {
    %c0_i32 = arith.constant 0 : i32
    %c0_i32_0 = arith.constant 0 : i32
    %c0_i32_1 = arith.constant 0 : i32
    return %c0_i32, %c0_i32_0 : i32, i32
  }
  func.func @transform_7(%arg0: i32) -> (i32, i32, i32) {
    %c0_i32 = arith.constant 0 : i32
    %c0_i32_0 = arith.constant 0 : i32
    %c0_i32_1 = arith.constant 0 : i32
    return %arg0, %c0_i32, %c0_i32_0 : i32, i32, i32
  }
}

</mosaic_0001>

<bundles_post_ra>
// kernel: cnn_forward.1
= control target key start
LH: loop header
LB: loop body
LE: loop exit
PB: predicated region body
PF: predicated region fallthrough
CT: control target
= control target key end

     0   :  { %12 = vsyncpa [#allocation7], 0  ;;  %s7542_s0 = inlined_call_operand.vmem [shape: f32[2,256,1], index: 0, kind: input, shape index: {}]   ;;  %s7543_s1 = inlined_call_operand.vmem [shape: f32[9,1,10], index: 1, kind: input, shape index: {}]   ;;  %s7544_s2 = inlined_call_operand.vmem [shape: f32[1,10], index: 2, kind: input, shape index: {}]   ;;  %s7545_s3 = inlined_call_operand.vmem [shape: f32[9,10,20], index: 3, kind: input, shape index: {}]   ;;  %s7546_s4 = inlined_call_operand.vmem [shape: f32[1,20], index: 4, kind: input, shape index: {}]   ;;  %s7547_s5 = inlined_call_operand.vmem [shape: f32[4,20,2], index: 5, kind: input, shape index: {}]   ;;  %s7548_s6 = inlined_call_operand.vmem [shape: f32[1,2], index: 6, kind: input, shape index: {}]   ;;  %s7549_s7 = inlined_call_operand.hbm [shape: f32[2,1,2], index: 7, kind: output, shape index: {}]  }
   0x1   :  { %14 = vsyncpa [#allocation7 + $0x1], 0  ;;  %s5579_s24 = smov 0   ;;  %s5581_s25 = smov 0  }
   0x2   :  { %s5583_s26 = smov 0   ;;  %s5585_s27 = smov 0  }
   0x3 LB: > { %s5600_s28 = sadd.s32 4294967295, %s5536_s27   ;;  %s5186_s29 = sadd.s32 4294967294, %s5536_s27   ;;  %s5536_s27 = sphi %s5585_s27, %s7555_s27   ;;  %s5532_s26 = sphi %s5583_s26, %s7554_s26   ;;  %s5528_s25 = sphi %s5581_s25, %s7553_s25   ;;  %s5524_s24 = sphi %s5579_s24, %s7552_s24  }
   0x4   : > { %s5604_s30 = sadd.s32 1, %s5536_s27   ;;  %s179_s8 = sadd.s32 1, %s5532_s26 }
   0x5   : > { %s176_s9 = ssub.s32 %s5536_s27, %s5604_s30  ;;  %p189_p0 = scmp.ne.s32.totalorder %s5532_s26, %s5528_s25 }
   0x6   : > { %p177_p1 = scmp.eq.s32.totalorder %s176_s9, 0  ;;  %p190_p2 = scmp.eq.s32.totalorder %s5600_s28, 1 }
   0x7   : > { %p195_p3 = scmp.ne.s32.totalorder %s5528_s25, %s5524_s24  ;;  %p196_p4 = scmp.eq.s32.totalorder %s5186_s29, 1 }
   0x8   : > { %s5615_s10 = scalar_select %p177_p1, %s5532_s26, %s179_s8  }
   0x9   : > { %p5617_p5 = por %p190_p2, %p189_p0  ;;  %p5621_p6 = por %p196_p4, %p195_p3 }
   0xa   : > { %p5189_p7 = scmp.ge.s32.totalorder %s5536_s27, 1  ;;  %p240_p8 = scmp.lt.s32.totalorder %s5536_s27, 3 }
   0xc   : > { %p241_p9 = pnand %p5189_p7, %p240_p8 }
   0xd   : > { %p271_p10 = scmp.lt.s32.totalorder (!%p241_p9), %s5600_s28, 1  ;;  %s269_s19 = sand.u32 (!%p241_p9), 1, %s5528_s25  }
   0xe   : > { %244 = sbr.rel (%p241_p9) target bundleno = 1328 (0x530), region = 48  ;;  %s5127_s22 = scalar_lea.hbm (!%p241_p9), %s7549_s7, %s5600_s28 }
   0xf   : > { %s270_s23 = scalar_lea.vmem (!%p241_p9), [#allocation6], %s269_s19  ;;  %s5131_s8 = sshll.u32 (!%p241_p9), %s5127_s22, 4  ;;  %s5132_s8 = int_to_ptr.hbm [resolvable:$true] %s5131_s8 }
  0x10   : > { %s5129_s29 = sshll.u32 (!%p241_p9), %s270_s23, 4  ;;  %s5119_s9 = scalar_lea.sflag (!%p241_p9), [#allocation7], %s269_s19  ;;  %s5130_s29 = int_to_ptr.vmem [resolvable:$true] %s5129_s29 }
  0x11   : > { %s5494_s16 = scalar_lea.hbm (!%p241_p9), %s7549_s7, 2 }
  0x13   : > { %v5538_v0 = vmov 0   ;;  %s272_s13 = scalar_select %p271_p10, %s5600_s28, 1  ;;  %v5763_v37 = vld [vmem:[%s7543_s1] ss:$0 sm:$0xff]  ;;  %vm476_vm0 = vcmask 80896   ;;  %vm504_vm1 = vcmask 78848  }
  0x14   : > { %5455 = vset.pattern.permute.xlu2 %v5538_v0  ;;  %5454 = vset.pattern.permute.xlu1 %v5538_v0  ;;  %vm3113_vm2 = vcmask 1041408   ;;  %vm3188_vm3 = vcmask 162816   ;;  %vm3037_vm4 = vcmask 77824   ;;  %vm3206_vm5 = vcmask 155648  }
  0x15   : > { %5453 = vset.pattern.permute.xlu0 %v5538_v0  ;;  %s5406_s14 = sshll.u32 %s272_s13, 8  ;;  %vm4994_vm6 = vcmask 1043456   ;;  %vm5116_vm7 = vcmask 8192   ;;  %s5488_s13 = sshra.s32 %s5132_s8, 4  ;;  %s5489_s13 = int_to_ptr.hbm [resolvable:$true] %s5488_s13 }
  0x16   : > { %s5632_s17 = scalar_lea.vmem %s7542_s0, %s5406_s14  ;;  %s5490_s14 = scalar_lea.hbm %s5489_s13, 1 }
  0x17   : > { %v5635_v1 = vld [vmem:[%s5632_s17 + $0x20] sm:$0xff]  ;;  %v5638_v2 = vld [vmem:[%s5632_s17 + $0x10] sm:$0xff]  ;;  %v5644_v4 = vld [vmem:[%s5632_s17 + $0x28] sm:$0xff]  ;;  %p5491_p11 = scmp.ne.s32.totalorder %s5489_s13, %s5490_s14  ;;  %p5495_p0 = scmp.lt.s32.totalorder %s5489_s13, %s7549_s7 }
  0x18   : > { %v276_v3 = vld [vmem:[%s5632_s17] sm:$0xff]  ;;  %327 = vperm.xlu2 %5455, %v5635_v1   ;;  %317 = vperm.xlu1 %5454, %v5638_v2   ;;  %v5647_v5 = vld [vmem:[%s5632_s17 + $0x18] sm:$0xff]  ;;  %v277_v6 = vld [vmem:[%s5632_s17 + $0x8] sm:$0xff]  ;;  %p5496_p1 = scmp.lt.s32.totalorder %s5494_s16, %s5490_s14 }
  0x19   : > { %307 = vperm.xlu0 %5453, %v276_v3   ;;  %v5653_v7 = vld [vmem:[%s5632_s17 + $0x40] sm:$0xff]  ;;  %v5656_v8 = vld [vmem:[%s5632_s17 + $0x38] sm:$0xff]  ;;  %v5659_v9 = vld [vmem:[%s5632_s17 + $0x30] sm:$0xff]  ;;  %p5492_p12 = pnand %p5491_p11, %p5617_p5 }
  0x1a   : > { %v5665_v10 = vld [vmem:[%s5632_s17 + $0x58] sm:$0xff]  ;;  %v5668_v11 = vld [vmem:[%s5632_s17 + $0x50] sm:$0xff]  ;;  %v5671_v12 = vld [vmem:[%s5632_s17 + $0x48] sm:$0xff]  ;;  %p5497_p2 = por %p5496_p1, %p5495_p0 }
  0x1b   : > { %v5677_v13 = vld [vmem:[%s5632_s17 + $0x70] sm:$0xff]  ;;  %v5680_v14 = vld [vmem:[%s5632_s17 + $0x68] sm:$0xff]  ;;  %v5683_v15 = vld [vmem:[%s5632_s17 + $0x60] sm:$0xff]  ;;  %p5493_p13 = pneg %p5492_p12 }
  0x1c   : > { %v5689_v16 = vld [vmem:[%s5632_s17 + $0x88] sm:$0xff]  ;;  %v5692_v17 = vld [vmem:[%s5632_s17 + $0x80] sm:$0xff]  ;;  %v5695_v18 = vld [vmem:[%s5632_s17 + $0x78] sm:$0xff] }
  0x1d   : > { %v5701_v19 = vld [vmem:[%s5632_s17 + $0xa0] sm:$0xff]  ;;  %v5704_v20 = vld [vmem:[%s5632_s17 + $0x98] sm:$0xff]  ;;  %v5707_v21 = vld [vmem:[%s5632_s17 + $0x90] sm:$0xff]  ;;  %p5498_p3 = pnand %p5497_p2, %p5493_p13 }
  0x1e   : > { %v5713_v22 = vld [vmem:[%s5632_s17 + $0xb8] sm:$0xff]  ;;  %v5716_v23 = vld [vmem:[%s5632_s17 + $0xb0] sm:$0xff]  ;;  %v5719_v24 = vld [vmem:[%s5632_s17 + $0xa8] sm:$0xff] }
  0x1f   : > { %v5725_v25 = vld [vmem:[%s5632_s17 + $0xd0] sm:$0xff]  ;;  %v5728_v26 = vld [vmem:[%s5632_s17 + $0xc8] sm:$0xff]  ;;  %v5731_v27 = vld [vmem:[%s5632_s17 + $0xc0] sm:$0xff] }
  0x20   : > { %332 = vperm.xlu2 %5455, %v5644_v4   ;;  %322 = vperm.xlu1 %5454, %v5647_v5   ;;  %v507_v28 = vld [vmem:[%s5632_s17 + $0x9] sm:$0xff]  ;;  %v506_v29 = vld [vmem:[%s5632_s17 + $0x1] sm:$0xff]  ;;  %v303_v30 = vld [vmem:[%s5632_s17 + $0xd8] sm:$0x3f] }
  0x21   : > { %312 = vperm.xlu0 %5453, %v277_v6   ;;  %v5740_v31 = vld [vmem:[%s5632_s17 + $0x21] sm:$0xff]  ;;  %v5743_v32 = vld [vmem:[%s5632_s17 + $0x19] sm:$0xff]  ;;  %v5746_v33 = vld [vmem:[%s5632_s17 + $0x11] sm:$0xff] }
  0x22   : > { %v513_v34 = vld [vmem:[%s5632_s17 + $0x39] sm:$0xff]  ;;  %v5753_v35 = vld [vmem:[%s5632_s17 + $0x31] sm:$0xff]  ;;  %v5756_v36 = vld [vmem:[%s5632_s17 + $0x29] sm:$0xff] }
  0x23   : > { %v516_v40 = vld [vmem:[%s5632_s17 + $0x51] sm:$0xff]  ;;  %v5769_v41 = vld [vmem:[%s5632_s17 + $0x49] sm:$0xff]  ;;  %v5772_v42 = vld [vmem:[%s5632_s17 + $0x41] sm:$0xff] }
  0x24   : > { %v519_v45 = vld [vmem:[%s5632_s17 + $0x69] sm:$0xff]  ;;  %v5780_v46 = vld [vmem:[%s5632_s17 + $0x61] sm:$0xff]  ;;  %v5783_v47 = vld [vmem:[%s5632_s17 + $0x59] sm:$0xff] }
  0x25   : > { %v522_v50 = vld [vmem:[%s5632_s17 + $0x81] sm:$0xff]  ;;  %v521_v51 = vld [vmem:[%s5632_s17 + $0x79] sm:$0xff]  ;;  %v520_v52 = vld [vmem:[%s5632_s17 + $0x71] sm:$0xff] }
  0x26   : > { %v525_v59 = vld [vmem:[%s5632_s17 + $0x99] sm:$0xff]  ;;  %v524_v60 = vld [vmem:[%s5632_s17 + $0x91] sm:$0xff]  ;;  %v523_v61 = vld [vmem:[%s5632_s17 + $0x89] sm:$0xff] }
  0x28   : > { %347 = vperm.xlu2 %5455, %v5653_v7   ;;  %342 = vperm.xlu1 %5454, %v5656_v8  }
  0x29   : > { %337 = vperm.xlu0 %5453, %v5659_v9  }
  0x30   : > { %362 = vperm.xlu2 %5455, %v5665_v10   ;;  %357 = vperm.xlu1 %5454, %v5668_v11  }
  0x31   : > { %352 = vperm.xlu0 %5453, %v5671_v12  }
  0x38   : > { %377 = vperm.xlu2 %5455, %v5677_v13   ;;  %372 = vperm.xlu1 %5454, %v5680_v14  }
  0x39   : > { %367 = vperm.xlu0 %5453, %v5683_v15  }
  0x40   : > { %392 = vperm.xlu2 %5455, %v5689_v16   ;;  %387 = vperm.xlu1 %5454, %v5692_v17  }
  0x41   : > { %382 = vperm.xlu0 %5453, %v5695_v18  }
  0x48   : > { %407 = vperm.xlu2 %5455, %v5701_v19   ;;  %402 = vperm.xlu1 %5454, %v5704_v20  }
  0x49   : > { %397 = vperm.xlu0 %5453, %v5707_v21  }
  0x50   : > { %422 = vperm.xlu2 %5455, %v5713_v22   ;;  %417 = vperm.xlu1 %5454, %v5716_v23  }
  0x51   : > { %412 = vperm.xlu0 %5453, %v5719_v24  }
  0x58   : > { %437 = vperm.xlu2 %5455, %v5725_v25   ;;  %432 = vperm.xlu1 %5454, %v5728_v26  }
  0x59   : > { %427 = vperm.xlu0 %5453, %v5731_v27  }
  0x60   : > { %543 = vperm.xlu2 %5455, %v507_v28   ;;  %538 = vperm.xlu1 %5454, %v506_v29   ;;  %v528_v29 = vld [vmem:[%s5632_s17 + $0xb1] sm:$0xff] }
  0x61   : > { %442 = vperm.xlu0 %5453, %v303_v30   ;;  %v527_v30 = vld [vmem:[%s5632_s17 + $0xa9] sm:$0xff] }
  0x68   : > { %558 = vperm.xlu2 %5455, %v5740_v31   ;;  %553 = vperm.xlu1 %5454, %v5743_v32  }
  0x69   : > { %548 = vperm.xlu0 %5453, %v5746_v33  }
  0x70   : > { %573 = vperm.xlu2 %5455, %v513_v34   ;;  %568 = vperm.xlu1 %5454, %v5753_v35   ;;  %v526_v34 = vld [vmem:[%s5632_s17 + $0xa1] sm:$0xff] }
  0x71   : > { %563 = vperm.xlu0 %5453, %v5756_v36  }
  0x72   : > { %v328_v38 = vpop.permute.xlu2 %327 }
  0x73   : > { %v452_v39 = vmul.f32 %v5763_v37, %v328_v38 }
  0x75   : > { %481 = vst.msk [vmem:[#allocation2 + $0x20] sm:$0xff] %vm476_vm0, %v452_v39 }
  0x78   : > { %588 = vperm.xlu2 %5455, %v516_v40   ;;  %583 = vperm.xlu1 %5454, %v5769_v41  }
  0x79   : > { %578 = vperm.xlu0 %5453, %v5772_v42  }
  0x7a   : > { %v333_v43 = vpop.permute.xlu2 %332 }
  0x7b   : > { %v453_v44 = vmul.f32 %v5763_v37, %v333_v43 }
  0x7d   : > { %482 = vst.msk [vmem:[#allocation2 + $0x28] sm:$0xff] %vm476_vm0, %v453_v44 }
  0x80   : > { %603 = vperm.xlu2 %5455, %v519_v45   ;;  %598 = vperm.xlu1 %5454, %v5780_v46  }
  0x81   : > { %593 = vperm.xlu0 %5453, %v5783_v47  }
  0x82   : > { %v348_v48 = vpop.permute.xlu2 %347 }
  0x83   : > { %v456_v49 = vmul.f32 %v5763_v37, %v348_v48  ;;  %v531_v48 = vld [vmem:[%s5632_s17 + $0xc9] sm:$0xff] }
  0x85   : > { %485 = vst.msk [vmem:[#allocation2 + $0x40] sm:$0xff] %vm476_vm0, %v456_v49  ;;  %v530_v49 = vld [vmem:[%s5632_s17 + $0xc1] sm:$0xff] }
  0x88   : > { %618 = vperm.xlu2 %5455, %v522_v50   ;;  %613 = vperm.xlu1 %5454, %v521_v51   ;;  %v529_v50 = vld [vmem:[%s5632_s17 + $0xb9] sm:$0xff] }
  0x89   : > { %608 = vperm.xlu0 %5453, %v520_v52  }
  0x8a   : > { %v363_v53 = vpop.permute.xlu2 %362  ;;  %v318_v54 = vpop.permute.xlu1 %317 }
  0x8b   : > { %v459_v55 = vmul.f32 %v5763_v37, %v363_v53  ;;  %v450_v56 = vmul.f32 %v5763_v37, %v318_v54  ;;  %v308_v57 = vpop.permute.xlu0 %307 }
  0x8c   : > { %v448_v58 = vmul.f32 %v5763_v37, %v308_v57  ;;  %v791_v57 = vld [vmem:[%s5632_s17 + $0x2] sm:$0xff] }
  0x8d   : > { %488 = vst.msk [vmem:[#allocation2 + $0x58] sm:$0xff] %vm476_vm0, %v459_v55 }
  0x8e   : > { %479 = vst.msk [vmem:[#allocation2 + $0x10] sm:$0xff] %vm476_vm0, %v450_v56 }
  0x8f   : > { %477 = vst.msk [vmem:[#allocation2] sm:$0xff] %vm476_vm0, %v448_v58  ;;  %v533_v58 = vld [vmem:[%s5632_s17 + $0xd9] sm:$0x3f] }
  0x90   : > { %633 = vperm.xlu2 %5455, %v525_v59   ;;  %628 = vperm.xlu1 %5454, %v524_v60   ;;  %v532_v59 = vld [vmem:[%s5632_s17 + $0xd1] sm:$0xff] }
  0x91   : > { %623 = vperm.xlu0 %5453, %v523_v61  }
  0x92   : > { %v378_v62 = vpop.permute.xlu2 %377  ;;  %v323_v63 = vpop.permute.xlu1 %322 }
  0x93   : > { %v462_v0 = vmul.f32 %v5763_v37, %v378_v62  ;;  %v451_v3 = vmul.f32 %v5763_v37, %v323_v63  ;;  %v313_v6 = vpop.permute.xlu0 %312 }
  0x94   : > { %v449_v28 = vmul.f32 %v5763_v37, %v313_v6  ;;  %v794_v6 = vld [vmem:[%s5632_s17 + $0x1a] sm:$0xff] }
  0x95   : > { %491 = vst.msk [vmem:[#allocation2 + $0x70] sm:$0xff] %vm476_vm0, %v462_v0 }
  0x96   : > { %480 = vst.msk [vmem:[#allocation2 + $0x18] sm:$0xff] %vm476_vm0, %v451_v3 }
  0x97   : > { %478 = vst.msk [vmem:[#allocation2 + $0x8] sm:$0xff] %vm476_vm0, %v449_v28  ;;  %v793_v28 = vld [vmem:[%s5632_s17 + $0x12] sm:$0xff] }
  0x98   : > { %648 = vperm.xlu2 %5455, %v528_v29   ;;  %643 = vperm.xlu1 %5454, %v527_v30   ;;  %v792_v29 = vld [vmem:[%s5632_s17 + $0xa] sm:$0xff] }
  0x99   : > { %638 = vperm.xlu0 %5453, %v526_v34  }
  0x9a   : > { %v393_v38 = vpop.permute.xlu2 %392  ;;  %v343_v39 = vpop.permute.xlu1 %342 }
  0x9b   : > { %v465_v40 = vmul.f32 %v5763_v37, %v393_v38  ;;  %v455_v43 = vmul.f32 %v5763_v37, %v343_v39  ;;  %v338_v44 = vpop.permute.xlu0 %337 }
  0x9c   : > { %v454_v45 = vmul.f32 %v5763_v37, %v338_v44  ;;  %v797_v44 = vld [vmem:[%s5632_s17 + $0x32] sm:$0xff] }
  0x9d   : > { %494 = vst.msk [vmem:[#allocation2 + $0x88] sm:$0xff] %vm476_vm0, %v465_v40 }
  0x9e   : > { %484 = vst.msk [vmem:[#allocation2 + $0x38] sm:$0xff] %vm476_vm0, %v455_v43 }
  0x9f   : > { %483 = vst.msk [vmem:[#allocation2 + $0x30] sm:$0xff] %vm476_vm0, %v454_v45  ;;  %v796_v45 = vld [vmem:[%s5632_s17 + $0x2a] sm:$0xff] }
  0xa0   : > { %663 = vperm.xlu2 %5455, %v531_v48   ;;  %658 = vperm.xlu1 %5454, %v530_v49   ;;  %v795_v48 = vld [vmem:[%s5632_s17 + $0x22] sm:$0xff]  ;;  %v5849_v49 = vld [vmem:[%s7543_s1 + $0x1] ss:$0 sm:$0xff] }
  0xa1   : > { %653 = vperm.xlu0 %5453, %v529_v50  }
  0xa2   : > { %v408_v51 = vpop.permute.xlu2 %407  ;;  %v358_v52 = vpop.permute.xlu1 %357 }
  0xa3   : > { %v468_v53 = vmul.f32 %v5763_v37, %v408_v51  ;;  %v458_v54 = vmul.f32 %v5763_v37, %v358_v52  ;;  %v353_v55 = vpop.permute.xlu0 %352 }
  0xa4   : > { %v457_v56 = vmul.f32 %v5763_v37, %v353_v55  ;;  %v708_v55 = vld [vmem:[#allocation2 + $0x8] sm:$0xff] }
  0xa5   : > { %497 = vst.msk [vmem:[#allocation2 + $0xa0] sm:$0xff] %vm476_vm0, %v468_v53 }
  0xa6   : > { %487 = vst.msk [vmem:[#allocation2 + $0x50] sm:$0xff] %vm476_vm0, %v458_v54 }
  0xa7   : > { %486 = vst.msk [vmem:[#allocation2 + $0x48] sm:$0xff] %vm476_vm0, %v457_v56 }
  0xa8   : > { %823 = vperm.xlu2 %5455, %v791_v57   ;;  %673 = vperm.xlu1 %5454, %v533_v58   ;;  %v800_v58 = vld [vmem:[%s5632_s17 + $0x4a] sm:$0xff] }
  0xa9   : > { %668 = vperm.xlu0 %5453, %v532_v59   ;;  %v799_v59 = vld [vmem:[%s5632_s17 + $0x42] sm:$0xff] }
  0xaa   : > { %v423_v60 = vpop.permute.xlu2 %422  ;;  %v373_v61 = vpop.permute.xlu1 %372 }
  0xab   : > { %v471_v62 = vmul.f32 %v5763_v37, %v423_v60  ;;  %v461_v63 = vmul.f32 %v5763_v37, %v373_v61  ;;  %v368_v0 = vpop.permute.xlu0 %367  ;;  %v798_v60 = vld [vmem:[%s5632_s17 + $0x3a] sm:$0xff] }
  0xac   : > { %v460_v3 = vmul.f32 %v5763_v37, %v368_v0 }
  0xad   : > { %500 = vst.msk [vmem:[#allocation2 + $0xb8] sm:$0xff] %vm476_vm0, %v471_v62 }
  0xae   : > { %490 = vst.msk [vmem:[#allocation2 + $0x68] sm:$0xff] %vm476_vm0, %v461_v63 }
  0xaf   : > { %489 = vst.msk [vmem:[#allocation2 + $0x60] sm:$0xff] %vm476_vm0, %v460_v3 }
  0xb0   : > { %838 = vperm.xlu2 %5455, %v794_v6   ;;  %833 = vperm.xlu1 %5454, %v793_v28   ;;  %v711_v6 = vld [vmem:[#allocation2 + $0x20] sm:$0xff] }
  0xb1   : > { %828 = vperm.xlu0 %5453, %v792_v29  }
  0xb2   : > { %v438_v30 = vpop.permute.xlu2 %437  ;;  %v388_v34 = vpop.permute.xlu1 %387 }
  0xb3   : > { %v474_v38 = vmul.f32 %v5763_v37, %v438_v30  ;;  %v464_v39 = vmul.f32 %v5763_v37, %v388_v34  ;;  %v383_v40 = vpop.permute.xlu0 %382  ;;  %v5865_v30 = vld [vmem:[%s5632_s17 + $0x62] sm:$0xff]  ;;  %v5868_v34 = vld [vmem:[%s5632_s17 + $0x5a] sm:$0xff] }
  0xb4   : > { %v463_v43 = vmul.f32 %v5763_v37, %v383_v40 }
  0xb5   : > { %503 = vst.msk [vmem:[#allocation2 + $0xd0] sm:$0xff] %vm476_vm0, %v474_v38  ;;  %v5872_v38 = vld [vmem:[%s5632_s17 + $0x52] sm:$0xff] }
  0xb6   : > { %493 = vst.msk [vmem:[#allocation2 + $0x80] sm:$0xff] %vm476_vm0, %v464_v39 }
  0xb7   : > { %492 = vst.msk [vmem:[#allocation2 + $0x78] sm:$0xff] %vm476_vm0, %v463_v43 }
  0xb8   : > { %853 = vperm.xlu2 %5455, %v797_v44   ;;  %848 = vperm.xlu1 %5454, %v796_v45  }
  0xb9   : > { %843 = vperm.xlu0 %5453, %v795_v48   ;;  %v714_v48 = vld [vmem:[#allocation2 + $0x38] sm:$0xff] }
  0xba   : > { %v544_v50 = vpop.permute.xlu2 %543  ;;  %v403_v51 = vpop.permute.xlu1 %402 }
  0xbb   : > { %v680_v52 = vmul.f32 %v5849_v49, %v544_v50  ;;  %v467_v53 = vmul.f32 %v5763_v37, %v403_v51  ;;  %v398_v54 = vpop.permute.xlu0 %397 }
  0xbc   : > { %v466_v56 = vmul.f32 %v5763_v37, %v398_v54  ;;  %v5890_v54 = vld [vmem:[%s5632_s17 + $0x6a] sm:$0xff] }
  0xbd   : > { %v736_v57 = vadd.f32 %v708_v55, %v680_v52  ;;  %496 = vst.msk [vmem:[#allocation2 + $0x98] sm:$0xff] %vm476_vm0, %v467_v53  ;;  %v5883_v52 = vld [vmem:[%s5632_s17 + $0x7a] sm:$0xff]  ;;  %v5886_v53 = vld [vmem:[%s5632_s17 + $0x72] sm:$0xff] }
  0xbe   : > { %495 = vst.msk [vmem:[#allocation2 + $0x90] sm:$0xff] %vm476_vm0, %v466_v56 }
  0xbf   : > { %764 = vst.msk [vmem:[#allocation2 + $0x8] sm:$0xff] %vm476_vm0, %v736_v57 }
  0xc0   : > { %868 = vperm.xlu2 %5455, %v800_v58   ;;  %863 = vperm.xlu1 %5454, %v799_v59  }
  0xc1   : > { %858 = vperm.xlu0 %5453, %v798_v60   ;;  %v717_v60 = vld [vmem:[#allocation2 + $0x50] sm:$0xff] }
  0xc2   : > { %v559_v61 = vpop.permute.xlu2 %558  ;;  %v418_v62 = vpop.permute.xlu1 %417 }
  0xc3   : > { %v683_v63 = vmul.f32 %v5849_v49, %v559_v61  ;;  %v470_v0 = vmul.f32 %v5763_v37, %v418_v62  ;;  %v413_v3 = vpop.permute.xlu0 %412  ;;  %v707_v61 = vld [vmem:[#allocation2] sm:$0xff] }
  0xc4   : > { %v469_v28 = vmul.f32 %v5763_v37, %v413_v3  ;;  %v5900_v3 = vld [vmem:[%s5632_s17 + $0x92] sm:$0xff] }
  0xc5   : > { %v739_v29 = vadd.f32 %v711_v6, %v683_v63  ;;  %499 = vst.msk [vmem:[#allocation2 + $0xb0] sm:$0xff] %vm476_vm0, %v470_v0  ;;  %v5903_v6 = vld [vmem:[%s5632_s17 + $0x8a] sm:$0xff] }
  0xc6   : > { %498 = vst.msk [vmem:[#allocation2 + $0xa8] sm:$0xff] %vm476_vm0, %v469_v28  ;;  %v5907_v28 = vld [vmem:[%s5632_s17 + $0x82] sm:$0xff] }
  0xc7   : > { %767 = vst.msk [vmem:[#allocation2 + $0x20] sm:$0xff] %vm476_vm0, %v739_v29 }
  0xc8   : > { %883 = vperm.xlu2 %5455, %v5865_v30   ;;  %878 = vperm.xlu1 %5454, %v5868_v34  }
  0xc9   : > { %873 = vperm.xlu0 %5453, %v5872_v38  }
  0xca   : > { %v574_v39 = vpop.permute.xlu2 %573  ;;  %v433_v40 = vpop.permute.xlu1 %432 }
  0xcb   : > { %v686_v43 = vmul.f32 %v5849_v49, %v574_v39  ;;  %v473_v44 = vmul.f32 %v5763_v37, %v433_v40  ;;  %v428_v45 = vpop.permute.xlu0 %427 }
  0xcc   : > { %v472_v50 = vmul.f32 %v5763_v37, %v428_v45  ;;  %v710_v45 = vld [vmem:[#allocation2 + $0x18] sm:$0xff] }
  0xcd   : > { %v742_v51 = vadd.f32 %v714_v48, %v686_v43  ;;  %502 = vst.msk [vmem:[#allocation2 + $0xc8] sm:$0xff] %vm476_vm0, %v473_v44  ;;  %v720_v44 = vld [vmem:[#allocation2 + $0x68] sm:$0xff] }
  0xce   : > { %501 = vst.msk [vmem:[#allocation2 + $0xc0] sm:$0xff] %vm476_vm0, %v472_v50 }
  0xcf   : > { %770 = vst.msk [vmem:[#allocation2 + $0x38] sm:$0xff] %vm476_vm0, %v742_v51 }
  0xd0   : > { %898 = vperm.xlu2 %5455, %v5883_v52   ;;  %893 = vperm.xlu1 %5454, %v5886_v53  }
  0xd1   : > { %888 = vperm.xlu0 %5453, %v5890_v54  }
  0xd2   : > { %v589_v55 = vpop.permute.xlu2 %588  ;;  %v539_v56 = vpop.permute.xlu1 %538 }
  0xd3   : > { %v689_v57 = vmul.f32 %v5849_v49, %v589_v55  ;;  %v679_v58 = vmul.f32 %v5849_v49, %v539_v56  ;;  %v443_v59 = vpop.permute.xlu0 %442  ;;  %v709_v55 = vld [vmem:[#allocation2 + $0x10] sm:$0xff] }
  0xd4   : > { %v475_v62 = vmul.f32 %v5763_v37, %v443_v59  ;;  %v812_v56 = vld [vmem:[%s5632_s17 + $0xaa] sm:$0xff]  ;;  %v810_v59 = vld [vmem:[%s5632_s17 + $0x9a] sm:$0xff] }
  0xd5   : > { %v745_v63 = vadd.f32 %v717_v60, %v689_v57  ;;  %v735_v0 = vadd.f32 %v707_v61, %v679_v58  ;;  %v811_v57 = vld [vmem:[%s5632_s17 + $0xa2] sm:$0xff] }
  0xd6   : > { %505 = vst.msk [vmem:[#allocation2 + $0xd8] sm:$0x3f] %vm504_vm1, %v475_v62 }
  0xd7   : > { %773 = vst.msk [vmem:[#allocation2 + $0x50] sm:$0xff] %vm476_vm0, %v745_v63 }
  0xd8   : > { %763 = vst.msk [vmem:[#allocation2] sm:$0xff] %vm476_vm0, %v735_v0  ;;  %913 = vperm.xlu2 %5455, %v5900_v3   ;;  %908 = vperm.xlu1 %5454, %v5903_v6  }
  0xd9   : > { %903 = vperm.xlu0 %5453, %v5907_v28  }
  0xda   : > { %v604_v37 = vpop.permute.xlu2 %603  ;;  %v554_v29 = vpop.permute.xlu1 %553 }
  0xdb   : > { %v692_v39 = vmul.f32 %v5849_v49, %v604_v37  ;;  %v682_v40 = vmul.f32 %v5849_v49, %v554_v29  ;;  %v549_v43 = vpop.permute.xlu0 %548  ;;  %v723_v37 = vld [vmem:[#allocation2 + $0x80] sm:$0xff]  ;;  %v713_v29 = vld [vmem:[#allocation2 + $0x30] sm:$0xff] }
  0xdc   : > { %v681_v48 = vmul.f32 %v5849_v49, %v549_v43 }
  0xdd   : > { %v748_v50 = vadd.f32 %v720_v44, %v692_v39  ;;  %v738_v51 = vadd.f32 %v710_v45, %v682_v40  ;;  %v712_v44 = vld [vmem:[#allocation2 + $0x28] sm:$0xff] }
  0xde   : > { %v737_v58 = vadd.f32 %v709_v55, %v681_v48  ;;  %v815_v45 = vld [vmem:[%s5632_s17 + $0xc2] sm:$0xff]  ;;  %v814_v48 = vld [vmem:[%s5632_s17 + $0xba] sm:$0xff] }
  0xdf   : > { %776 = vst.msk [vmem:[#allocation2 + $0x68] sm:$0xff] %vm476_vm0, %v748_v50 }
  0xe0   : > { %766 = vst.msk [vmem:[#allocation2 + $0x18] sm:$0xff] %vm476_vm0, %v738_v51  ;;  %928 = vperm.xlu2 %5455, %v812_v56   ;;  %923 = vperm.xlu1 %5454, %v811_v57   ;;  %v813_v51 = vld [vmem:[%s5632_s17 + $0xb2] sm:$0xff] }
  0xe1   : > { %765 = vst.msk [vmem:[#allocation2 + $0x10] sm:$0xff] %vm476_vm0, %v737_v58  ;;  %918 = vperm.xlu0 %5453, %v810_v59  }
  0xe2   : > { %v619_v60 = vpop.permute.xlu2 %618  ;;  %v569_v61 = vpop.permute.xlu1 %568 }
  0xe3   : > { %v695_v62 = vmul.f32 %v5849_v49, %v619_v60  ;;  %v685_v63 = vmul.f32 %v5849_v49, %v569_v61  ;;  %v564_v0 = vpop.permute.xlu0 %563  ;;  %v726_v60 = vld [vmem:[#allocation2 + $0x98] sm:$0xff]  ;;  %v716_v61 = vld [vmem:[#allocation2 + $0x48] sm:$0xff] }
  0xe4   : > { %v684_v39 = vmul.f32 %v5849_v49, %v564_v0 }
  0xe5   : > { %v751_v40 = vadd.f32 %v723_v37, %v695_v62  ;;  %v741_v43 = vadd.f32 %v713_v29, %v685_v63  ;;  %v715_v37 = vld [vmem:[#allocation2 + $0x40] sm:$0xff]  ;;  %v818_v29 = vld [vmem:[%s5632_s17 + $0xda] sm:$0x3f] }
  0xe6   : > { %v740_v50 = vadd.f32 %v712_v44, %v684_v39  ;;  %v817_v39 = vld [vmem:[%s5632_s17 + $0xd2] sm:$0xff] }
  0xe7   : > { %779 = vst.msk [vmem:[#allocation2 + $0x80] sm:$0xff] %vm476_vm0, %v751_v40 }
  0xe8   : > { %769 = vst.msk [vmem:[#allocation2 + $0x30] sm:$0xff] %vm476_vm0, %v741_v43  ;;  %943 = vperm.xlu2 %5455, %v815_v45   ;;  %938 = vperm.xlu1 %5454, %v814_v48   ;;  %v816_v43 = vld [vmem:[%s5632_s17 + $0xca] sm:$0xff] }
  0xe9   : > { %768 = vst.msk [vmem:[#allocation2 + $0x28] sm:$0xff] %vm476_vm0, %v740_v50  ;;  %933 = vperm.xlu0 %5453, %v813_v51  }
  0xea   : > { %v634_v55 = vpop.permute.xlu2 %633  ;;  %v584_v56 = vpop.permute.xlu1 %583 }
  0xeb   : > { %v698_v57 = vmul.f32 %v5849_v49, %v634_v55  ;;  %v688_v58 = vmul.f32 %v5849_v49, %v584_v56  ;;  %v579_v59 = vpop.permute.xlu0 %578  ;;  %v729_v55 = vld [vmem:[#allocation2 + $0xb0] sm:$0xff]  ;;  %v719_v56 = vld [vmem:[#allocation2 + $0x60] sm:$0xff] }
  0xec   : > { %v687_v62 = vmul.f32 %v5849_v49, %v579_v59 }
  0xed   : > { %v754_v63 = vadd.f32 %v726_v60, %v698_v57  ;;  %v744_v0 = vadd.f32 %v716_v61, %v688_v58  ;;  %v718_v60 = vld [vmem:[#allocation2 + $0x58] sm:$0xff] }
  0xee   : > { %v743_v40 = vadd.f32 %v715_v37, %v687_v62 }
  0xef   : > { %782 = vst.msk [vmem:[#allocation2 + $0x98] sm:$0xff] %vm476_vm0, %v754_v63 }
  0xf0   : > { %772 = vst.msk [vmem:[#allocation2 + $0x48] sm:$0xff] %vm476_vm0, %v744_v0  ;;  %958 = vperm.xlu2 %5455, %v818_v29   ;;  %953 = vperm.xlu1 %5454, %v817_v39   ;;  %v732_v39 = vld [vmem:[#allocation2 + $0xc8] sm:$0xff] }
  0xf1   : > { %771 = vst.msk [vmem:[#allocation2 + $0x40] sm:$0xff] %vm476_vm0, %v743_v40  ;;  %948 = vperm.xlu0 %5453, %v816_v43   ;;  %v722_v40 = vld [vmem:[#allocation2 + $0x78] sm:$0xff] }
  0xf2   : > { %v649_v44 = vpop.permute.xlu2 %648  ;;  %v599_v45 = vpop.permute.xlu1 %598 }
  0xf3   : > { %v701_v48 = vmul.f32 %v5849_v49, %v649_v44  ;;  %v691_v50 = vmul.f32 %v5849_v49, %v599_v45  ;;  %v594_v51 = vpop.permute.xlu0 %593 }
  0xf4   : > { %v690_v57 = vmul.f32 %v5849_v49, %v594_v51 }
  0xf5   : > { %v757_v58 = vadd.f32 %v729_v55, %v701_v48  ;;  %v747_v59 = vadd.f32 %v719_v56, %v691_v50 }
  0xf6   : > { %v746_v61 = vadd.f32 %v718_v60, %v690_v57  ;;  %v992_v57 = vld [vmem:[#allocation2] sm:$0xff] }
  0xf7   : > { %785 = vst.msk [vmem:[#allocation2 + $0xb0] sm:$0xff] %vm476_vm0, %v757_v58  ;;  %v725_v58 = vld [vmem:[#allocation2 + $0x90] sm:$0xff] }
  0xf8   : > { %775 = vst.msk [vmem:[#allocation2 + $0x60] sm:$0xff] %vm476_vm0, %v747_v59  ;;  %1118 = vperm.xlu2 %5455, %v5635_v1   ;;  %1113 = vperm.xlu1 %5454, %v5647_v5   ;;  %v721_v1 = vld [vmem:[#allocation2 + $0x70] sm:$0xff] }
  0xf9   : > { %774 = vst.msk [vmem:[#allocation2 + $0x58] sm:$0xff] %vm476_vm0, %v746_v61  ;;  %1108 = vperm.xlu0 %5453, %v5638_v2   ;;  %v5957_v2 = vld [vmem:[%s7543_s1 + $0x2] ss:$0 sm:$0xff] }
  0xfa   : > { %v664_v62 = vpop.permute.xlu2 %663  ;;  %v614_v63 = vpop.permute.xlu1 %613 }
  0xfb   : > { %v704_v0 = vmul.f32 %v5849_v49, %v664_v62  ;;  %v694_v37 = vmul.f32 %v5849_v49, %v614_v63  ;;  %v609_v29 = vpop.permute.xlu0 %608 }
  0xfc   : > { %v693_v43 = vmul.f32 %v5849_v49, %v609_v29  ;;  %v995_v29 = vld [vmem:[#allocation2 + $0x18] sm:$0xff] }
  0xfd   : > { %v760_v44 = vadd.f32 %v732_v39, %v704_v0  ;;  %v750_v45 = vadd.f32 %v722_v40, %v694_v37  ;;  %v728_v39 = vld [vmem:[#allocation2 + $0xa8] sm:$0xff] }
  0xfe   : > { %v749_v48 = vadd.f32 %v721_v1, %v693_v43 }
  0xff   : > { %788 = vst.msk [vmem:[#allocation2 + $0xc8] sm:$0xff] %vm476_vm0, %v760_v44 }
 0x100   : > { %778 = vst.msk [vmem:[#allocation2 + $0x78] sm:$0xff] %vm476_vm0, %v750_v45  ;;  %1133 = vperm.xlu2 %5455, %v5656_v8   ;;  %1128 = vperm.xlu1 %5454, %v5659_v9   ;;  %v724_v8 = vld [vmem:[#allocation2 + $0x88] sm:$0xff] }
 0x101   : > { %777 = vst.msk [vmem:[#allocation2 + $0x70] sm:$0xff] %vm476_vm0, %v749_v48  ;;  %1123 = vperm.xlu0 %5453, %v5644_v4  }
 0x102   : > { %v824_v5 = vpop.permute.xlu2 %823  ;;  %v629_v50 = vpop.permute.xlu1 %628 }
 0x103   : > { %v964_v51 = vmul.f32 %v5957_v2, %v824_v5  ;;  %v697_v55 = vmul.f32 %v5849_v49, %v629_v50  ;;  %v624_v56 = vpop.permute.xlu0 %623  ;;  %v998_v50 = vld [vmem:[#allocation2 + $0x30] sm:$0xff] }
 0x104   : > { %v696_v59 = vmul.f32 %v5849_v49, %v624_v56 }
 0x105   : > { %v1020_v60 = vadd.f32 %v992_v57, %v964_v51  ;;  %v753_v61 = vadd.f32 %v725_v58, %v697_v55  ;;  %v731_v51 = vld [vmem:[#allocation2 + $0xc0] sm:$0xff] }
 0x106   : > { %v752_v62 = vadd.f32 %v724_v8, %v696_v59  ;;  %v1001_v8 = vld [vmem:[#allocation2 + $0x48] sm:$0xff] }
 0x107   : > { %1048 = vst.msk [vmem:[#allocation2] sm:$0xff] %vm476_vm0, %v1020_v60 }
 0x108   : > { %781 = vst.msk [vmem:[#allocation2 + $0x90] sm:$0xff] %vm476_vm0, %v753_v61  ;;  %1148 = vperm.xlu2 %5455, %v5668_v11   ;;  %1143 = vperm.xlu1 %5454, %v5671_v12   ;;  %v727_v11 = vld [vmem:[#allocation2 + $0xa0] sm:$0xff] }
 0x109   : > { %780 = vst.msk [vmem:[#allocation2 + $0x88] sm:$0xff] %vm476_vm0, %v752_v62  ;;  %1138 = vperm.xlu0 %5453, %v5653_v7   ;;  %v734_v62 = vld [vmem:[#allocation2 + $0xd8] sm:$0x3f] }
 0x10a   : > { %v839_v4 = vpop.permute.xlu2 %838  ;;  %v644_v9 = vpop.permute.xlu1 %643 }
 0x10b   : > { %v967_v63 = vmul.f32 %v5957_v2, %v839_v4  ;;  %v700_v0 = vmul.f32 %v5849_v49, %v644_v9  ;;  %v639_v37 = vpop.permute.xlu0 %638 }
 0x10c   : > { %v699_v40 = vmul.f32 %v5849_v49, %v639_v37 }
 0x10d   : > { %v1023_v43 = vadd.f32 %v995_v29, %v967_v63  ;;  %v756_v44 = vadd.f32 %v728_v39, %v700_v0  ;;  %v1004_v39 = vld [vmem:[#allocation2 + $0x60] sm:$0xff] }
 0x10e   : > { %v755_v45 = vadd.f32 %v727_v11, %v699_v40  ;;  %v994_v40 = vld [vmem:[#allocation2 + $0x10] sm:$0xff] }
 0x10f   : > { %1051 = vst.msk [vmem:[#allocation2 + $0x18] sm:$0xff] %vm476_vm0, %v1023_v43 }
 0x110   : > { %784 = vst.msk [vmem:[#allocation2 + $0xa8] sm:$0xff] %vm476_vm0, %v756_v44  ;;  %1163 = vperm.xlu2 %5455, %v5680_v14   ;;  %1158 = vperm.xlu1 %5454, %v5683_v15   ;;  %v730_v14 = vld [vmem:[#allocation2 + $0xb8] sm:$0xff] }
 0x111   : > { %783 = vst.msk [vmem:[#allocation2 + $0xa0] sm:$0xff] %vm476_vm0, %v755_v45  ;;  %1153 = vperm.xlu0 %5453, %v5665_v10  }
 0x112   : > { %v854_v7 = vpop.permute.xlu2 %853  ;;  %v659_v12 = vpop.permute.xlu1 %658 }
 0x113   : > { %v970_v1 = vmul.f32 %v5957_v2, %v854_v7  ;;  %v703_v48 = vmul.f32 %v5849_v49, %v659_v12  ;;  %v654_v5 = vpop.permute.xlu0 %653 }
 0x114   : > { %v702_v55 = vmul.f32 %v5849_v49, %v654_v5  ;;  %v997_v5 = vld [vmem:[#allocation2 + $0x28] sm:$0xff] }
 0x115   : > { %v1026_v56 = vadd.f32 %v998_v50, %v970_v1  ;;  %v759_v57 = vadd.f32 %v731_v51, %v703_v48  ;;  %v1007_v48 = vld [vmem:[#allocation2 + $0x78] sm:$0xff] }
 0x116   : > { %v758_v58 = vadd.f32 %v730_v14, %v702_v55 }
 0x117   : > { %1054 = vst.msk [vmem:[#allocation2 + $0x30] sm:$0xff] %vm476_vm0, %v1026_v56 }
 0x118   : > { %787 = vst.msk [vmem:[#allocation2 + $0xc0] sm:$0xff] %vm476_vm0, %v759_v57  ;;  %1178 = vperm.xlu2 %5455, %v5692_v17   ;;  %1173 = vperm.xlu1 %5454, %v5695_v18   ;;  %v733_v17 = vld [vmem:[#allocation2 + $0xd0] sm:$0xff] }
 0x119   : > { %786 = vst.msk [vmem:[#allocation2 + $0xb8] sm:$0xff] %vm476_vm0, %v758_v58  ;;  %1168 = vperm.xlu0 %5453, %v5677_v13  }
 0x11a   : > { %v869_v10 = vpop.permute.xlu2 %868  ;;  %v674_v15 = vpop.permute.xlu1 %673 }
 0x11b   : > { %v973_v59 = vmul.f32 %v5957_v2, %v869_v10  ;;  %v706_v60 = vmul.f32 %v5849_v49, %v674_v15  ;;  %v669_v61 = vpop.permute.xlu0 %668  ;;  %v1010_v10 = vld [vmem:[#allocation2 + $0x90] sm:$0xff]  ;;  %v1000_v15 = vld [vmem:[#allocation2 + $0x40] sm:$0xff] }
 0x11c   : > { %v705_v4 = vmul.f32 %v5849_v49, %v669_v61  ;;  %v999_v61 = vld [vmem:[#allocation2 + $0x38] sm:$0xff] }
 0x11d   : > { %v1029_v9 = vadd.f32 %v1001_v8, %v973_v59  ;;  %v762_v63 = vadd.f32 %v734_v62, %v706_v60  ;;  %v1102_v8 = vld [vmem:[%s5632_s17 + $0xe0] sm:$0xff] }
 0x11e   : > { %v761_v0 = vadd.f32 %v733_v17, %v705_v4 }
 0x11f   : > { %1057 = vst.msk [vmem:[#allocation2 + $0x48] sm:$0xff] %vm476_vm0, %v1029_v9 }
 0x120   : > { %790 = vst.msk [vmem:[#allocation2 + $0xd8] sm:$0x3f] %vm504_vm1, %v762_v63  ;;  %1193 = vperm.xlu2 %5455, %v5704_v20   ;;  %1188 = vperm.xlu1 %5454, %v5707_v21   ;;  %v993_v20 = vld [vmem:[#allocation2 + $0x8] sm:$0xff] }
 0x121   : > { %789 = vst.msk [vmem:[#allocation2 + $0xd0] sm:$0xff] %vm476_vm0, %v761_v0  ;;  %1183 = vperm.xlu0 %5453, %v5689_v16   ;;  %v1013_v0 = vld [vmem:[#allocation2 + $0xa8] sm:$0xff] }
 0x122   : > { %v884_v13 = vpop.permute.xlu2 %883  ;;  %v834_v18 = vpop.permute.xlu1 %833 }
 0x123   : > { %v976_v49 = vmul.f32 %v5957_v2, %v884_v13  ;;  %v966_v37 = vmul.f32 %v5957_v2, %v834_v18  ;;  %v829_v29 = vpop.permute.xlu0 %828  ;;  %v1003_v13 = vld [vmem:[#allocation2 + $0x58] sm:$0xff] }
 0x124   : > { %v965_v43 = vmul.f32 %v5957_v2, %v829_v29  ;;  %v1002_v29 = vld [vmem:[#allocation2 + $0x50] sm:$0xff] }
 0x125   : > { %v1032_v44 = vadd.f32 %v1004_v39, %v976_v49  ;;  %v1022_v11 = vadd.f32 %v994_v40, %v966_v37  ;;  %v1103_v40 = vld [vmem:[%s5632_s17 + $0xe8] sm:$0x3f] }
 0x126   : > { %v1021_v45 = vadd.f32 %v993_v20, %v965_v43 }
 0x127   : > { %1060 = vst.msk [vmem:[#allocation2 + $0x60] sm:$0xff] %vm476_vm0, %v1032_v44 }
 0x128   : > { %1050 = vst.msk [vmem:[#allocation2 + $0x10] sm:$0xff] %vm476_vm0, %v1022_v11  ;;  %1208 = vperm.xlu2 %5455, %v5716_v23   ;;  %1203 = vperm.xlu1 %5454, %v5719_v24   ;;  %v996_v23 = vld [vmem:[#allocation2 + $0x20] sm:$0xff] }
 0x129   : > { %1049 = vst.msk [vmem:[#allocation2 + $0x8] sm:$0xff] %vm476_vm0, %v1021_v45  ;;  %1198 = vperm.xlu0 %5453, %v5701_v19   ;;  %v1016_v45 = vld [vmem:[#allocation2 + $0xc0] sm:$0xff] }
 0x12a   : > { %v899_v16 = vpop.permute.xlu2 %898  ;;  %v849_v21 = vpop.permute.xlu1 %848 }
 0x12b   : > { %v979_v7 = vmul.f32 %v5957_v2, %v899_v16  ;;  %v969_v12 = vmul.f32 %v5957_v2, %v849_v21  ;;  %v844_v1 = vpop.permute.xlu0 %843  ;;  %v1006_v16 = vld [vmem:[#allocation2 + $0x70] sm:$0xff] }
 0x12c   : > { %v968_v50 = vmul.f32 %v5957_v2, %v844_v1  ;;  %v1005_v1 = vld [vmem:[#allocation2 + $0x68] sm:$0xff] }
 0x12d   : > { %v1035_v51 = vadd.f32 %v1007_v48, %v979_v7  ;;  %v1025_v55 = vadd.f32 %v997_v5, %v969_v12 }
 0x12e   : > { %v1024_v56 = vadd.f32 %v996_v23, %v968_v50  ;;  %v1009_v23 = vld [vmem:[#allocation2 + $0x88] sm:$0xff] }
 0x12f   : > { %1063 = vst.msk [vmem:[#allocation2 + $0x78] sm:$0xff] %vm476_vm0, %v1035_v51 }
 0x130   : > { %1053 = vst.msk [vmem:[#allocation2 + $0x28] sm:$0xff] %vm476_vm0, %v1025_v55  ;;  %1223 = vperm.xlu2 %5455, %v5728_v26   ;;  %1218 = vperm.xlu1 %5454, %v5731_v27   ;;  %v1101_v27 = vld [vmem:[%s5632_s17 + $0xd8] sm:$0xff] }
 0x131   : > { %1052 = vst.msk [vmem:[#allocation2 + $0x20] sm:$0xff] %vm476_vm0, %v1024_v56  ;;  %1213 = vperm.xlu0 %5453, %v5713_v22   ;;  %v1019_v55 = vld [vmem:[#allocation2 + $0xd8] sm:$0x3f] }
 0x132   : > { %v914_v19 = vpop.permute.xlu2 %913  ;;  %v864_v24 = vpop.permute.xlu1 %863 }
 0x133   : > { %v982_v57 = vmul.f32 %v5957_v2, %v914_v19  ;;  %v972_v14 = vmul.f32 %v5957_v2, %v864_v24  ;;  %v859_v58 = vpop.permute.xlu0 %858  ;;  %v1008_v24 = vld [vmem:[#allocation2 + $0x80] sm:$0xff] }
 0x134   : > { %v971_v59 = vmul.f32 %v5957_v2, %v859_v58 }
 0x135   : > { %v1038_v60 = vadd.f32 %v1010_v10, %v982_v57  ;;  %v1028_v26 = vadd.f32 %v1000_v15, %v972_v14 }
 0x136   : > { %v1027_v62 = vadd.f32 %v999_v61, %v971_v59 }
 0x137   : > { %1066 = vst.msk [vmem:[#allocation2 + $0x90] sm:$0xff] %vm476_vm0, %v1038_v60  ;;  %v1279_v60 = vld [vmem:[#allocation2 + $0x10] sm:$0xff] }
 0x138   : > { %1056 = vst.msk [vmem:[#allocation2 + $0x40] sm:$0xff] %vm476_vm0, %v1028_v26  ;;  %1238 = vperm.xlu2 %5455, %v1102_v8   ;;  %1233 = vperm.xlu1 %5454, %v1101_v27   ;;  %v1012_v26 = vld [vmem:[#allocation2 + $0xa0] sm:$0xff]  ;;  %v1011_v27 = vld [vmem:[#allocation2 + $0x98] sm:$0xff] }
 0x139   : > { %1055 = vst.msk [vmem:[#allocation2 + $0x38] sm:$0xff] %vm476_vm0, %v1027_v62  ;;  %1228 = vperm.xlu0 %5453, %v5725_v25  }
 0x13a   : > { %v929_v22 = vpop.permute.xlu2 %928  ;;  %v879_v4 = vpop.permute.xlu1 %878 }
 0x13b   : > { %v985_v9 = vmul.f32 %v5957_v2, %v929_v22  ;;  %v975_v63 = vmul.f32 %v5957_v2, %v879_v4  ;;  %v874_v17 = vpop.permute.xlu0 %873 }
 0x13c   : > { %v974_v18 = vmul.f32 %v5957_v2, %v874_v17 }
 0x13d   : > { %v1041_v49 = vadd.f32 %v1013_v0, %v985_v9  ;;  %v1031_v37 = vadd.f32 %v1003_v13, %v975_v63  ;;  %v1282_v0 = vld [vmem:[#allocation2 + $0x28] sm:$0xff]  ;;  %v1015_v13 = vld [vmem:[#allocation2 + $0xb8] sm:$0xff] }
 0x13e   : > { %v1030_v39 = vadd.f32 %v1002_v29, %v974_v18  ;;  %v6081_v29 = vld [vmem:[%s5632_s17 + $0x71] sm:$0xff] }
 0x13f   : > { %1069 = vst.msk [vmem:[#allocation2 + $0xa8] sm:$0xff] %vm476_vm0, %v1041_v49 }
 0x140   : > { %1059 = vst.msk [vmem:[#allocation2 + $0x58] sm:$0xff] %vm476_vm0, %v1031_v37  ;;  %1398 = vperm.xlu2 %5455, %v5743_v32   ;;  %1393 = vperm.xlu1 %5454, %v5746_v33   ;;  %v1014_v37 = vld [vmem:[#allocation2 + $0xb0] sm:$0xff] }
 0x141   : > { %1058 = vst.msk [vmem:[#allocation2 + $0x50] sm:$0xff] %vm476_vm0, %v1030_v39  ;;  %1243 = vperm.xlu0 %5453, %v1103_v40   ;;  %v6084_v40 = vld [vmem:[%s5632_s17 + $0x69] sm:$0xff] }
 0x142   : > { %v944_v25 = vpop.permute.xlu2 %943  ;;  %v894_v43 = vpop.permute.xlu1 %893 }
 0x143   : > { %v988_v44 = vmul.f32 %v5957_v2, %v944_v25  ;;  %v978_v11 = vmul.f32 %v5957_v2, %v894_v43  ;;  %v889_v20 = vpop.permute.xlu0 %888 }
 0x144   : > { %v977_v21 = vmul.f32 %v5957_v2, %v889_v20 }
 0x145   : > { %v1044_v7 = vadd.f32 %v1016_v45, %v988_v44  ;;  %v1034_v12 = vadd.f32 %v1006_v16, %v978_v11  ;;  %v1285_v45 = vld [vmem:[#allocation2 + $0x40] sm:$0xff]  ;;  %v1018_v16 = vld [vmem:[#allocation2 + $0xd0] sm:$0xff] }
 0x146   : > { %v1033_v32 = vadd.f32 %v1005_v1, %v977_v21  ;;  %v1017_v1 = vld [vmem:[#allocation2 + $0xc8] sm:$0xff] }
 0x147   : > { %1072 = vst.msk [vmem:[#allocation2 + $0xc0] sm:$0xff] %vm476_vm0, %v1044_v7 }
 0x148   : > { %1062 = vst.msk [vmem:[#allocation2 + $0x70] sm:$0xff] %vm476_vm0, %v1034_v12  ;;  %1413 = vperm.xlu2 %5455, %v5753_v35   ;;  %1408 = vperm.xlu1 %5454, %v5756_v36   ;;  %v6049_v36 = vld [vmem:[%s5632_s17 + $0x39] sm:$0xff] }
 0x149   : > { %1061 = vst.msk [vmem:[#allocation2 + $0x68] sm:$0xff] %vm476_vm0, %v1033_v32  ;;  %1403 = vperm.xlu0 %5453, %v5740_v31   ;;  %v6055_v31 = vld [vmem:[%s7543_s1 + $0x3] ss:$0 sm:$0xff]  ;;  %v6096_v32 = vld [vmem:[%s5632_s17 + $0x91] sm:$0xff] }
 0x14a   : > { %v959_v33 = vpop.permute.xlu2 %958  ;;  %v909_v48 = vpop.permute.xlu1 %908 }
 0x14b   : > { %v991_v5 = vmul.f32 %v5957_v2, %v959_v33  ;;  %v981_v50 = vmul.f32 %v5957_v2, %v909_v48  ;;  %v904_v51 = vpop.permute.xlu0 %903  ;;  %v6099_v33 = vld [vmem:[%s5632_s17 + $0x89] sm:$0xff] }
 0x14c   : > { %v980_v56 = vmul.f32 %v5957_v2, %v904_v51 }
 0x14d   : > { %v1047_v19 = vadd.f32 %v1019_v55, %v991_v5  ;;  %v1037_v35 = vadd.f32 %v1009_v23, %v981_v50  ;;  %v6102_v5 = vld [vmem:[%s5632_s17 + $0x81] sm:$0xff] }
 0x14e   : > { %v1036_v57 = vadd.f32 %v1008_v24, %v980_v56  ;;  %v1288_v56 = vld [vmem:[#allocation2 + $0x58] sm:$0xff] }
 0x14f   : > { %1075 = vst.msk [vmem:[#allocation2 + $0xd8] sm:$0x3f] %vm504_vm1, %v1047_v19  ;;  %v1278_v19 = vld [vmem:[#allocation2 + $0x8] sm:$0xff] }
 0x150   : > { %1065 = vst.msk [vmem:[#allocation2 + $0x88] sm:$0xff] %vm476_vm0, %v1037_v35  ;;  %1428 = vperm.xlu2 %5455, %v5769_v41   ;;  %1423 = vperm.xlu1 %5454, %v5772_v42   ;;  %v6066_v42 = vld [vmem:[%s5632_s17 + $0x51] sm:$0xff] }
 0x151   : > { %1064 = vst.msk [vmem:[#allocation2 + $0x80] sm:$0xff] %vm476_vm0, %v1036_v57  ;;  %1418 = vperm.xlu0 %5453, %v6049_v36  }
 0x152   : > { %v1119_v14 = vpop.permute.xlu2 %1118  ;;  %v924_v58 = vpop.permute.xlu1 %923 }
 0x153   : > { %v1251_v10 = vmul.f32 %v6055_v31, %v1119_v14  ;;  %v984_v15 = vmul.f32 %v5957_v2, %v924_v58  ;;  %v919_v59 = vpop.permute.xlu0 %918  ;;  %v1277_v14 = vld [vmem:[#allocation2] sm:$0xff]  ;;  %v6114_v58 = vld [vmem:[%s5632_s17 + $0xa9] sm:$0xff] }
 0x154   : > { %v983_v61 = vmul.f32 %v5957_v2, %v919_v59  ;;  %v6120_v59 = vld [vmem:[%s5632_s17 + $0x99] sm:$0xff] }
 0x155   : > { %v1307_v8 = vadd.f32 %v1279_v60, %v1251_v10  ;;  %v1040_v41 = vadd.f32 %v1012_v26, %v984_v15  ;;  %v6117_v10 = vld [vmem:[%s5632_s17 + $0xa1] sm:$0xff] }
 0x156   : > { %v1039_v62 = vadd.f32 %v1011_v27, %v983_v61  ;;  %v1291_v27 = vld [vmem:[#allocation2 + $0x70] sm:$0xff] }
 0x157   : > { %1335 = vst.msk [vmem:[#allocation2 + $0x10] sm:$0xff] %vm476_vm0, %v1307_v8 }
 0x158   : > { %1068 = vst.msk [vmem:[#allocation2 + $0xa0] sm:$0xff] %vm476_vm0, %v1040_v41  ;;  %1443 = vperm.xlu2 %5455, %v5780_v46   ;;  %1438 = vperm.xlu1 %5454, %v5783_v47   ;;  %v6078_v47 = vld [vmem:[%s5632_s17 + $0x79] sm:$0xff] }
 0x159   : > { %1067 = vst.msk [vmem:[#allocation2 + $0x98] sm:$0xff] %vm476_vm0, %v1039_v62  ;;  %1433 = vperm.xlu0 %5453, %v6066_v42   ;;  %v1281_v62 = vld [vmem:[#allocation2 + $0x20] sm:$0xff] }
 0x15a   : > { %v1134_v22 = vpop.permute.xlu2 %1133  ;;  %v939_v4 = vpop.permute.xlu1 %938 }
 0x15b   : > { %v1254_v9 = vmul.f32 %v6055_v31, %v1134_v22  ;;  %v987_v63 = vmul.f32 %v5957_v2, %v939_v4  ;;  %v934_v17 = vpop.permute.xlu0 %933 }
 0x15c   : > { %v986_v18 = vmul.f32 %v5957_v2, %v934_v17 }
 0x15d   : > { %v1310_v46 = vadd.f32 %v1282_v0, %v1254_v9  ;;  %v1043_v49 = vadd.f32 %v1015_v13, %v987_v63  ;;  %v1280_v63 = vld [vmem:[#allocation2 + $0x18] sm:$0xff] }
 0x15e   : > { %v1042_v39 = vadd.f32 %v1014_v37, %v986_v18  ;;  %v6132_v0 = vld [vmem:[%s5632_s17 + $0xb1] sm:$0xff] }
 0x15f   : > { %1338 = vst.msk [vmem:[#allocation2 + $0x28] sm:$0xff] %vm476_vm0, %v1310_v46 }
 0x160   : > { %1071 = vst.msk [vmem:[#allocation2 + $0xb8] sm:$0xff] %vm476_vm0, %v1043_v49  ;;  %1458 = vperm.xlu2 %5455, %v6078_v47   ;;  %1453 = vperm.xlu1 %5454, %v6081_v29  }
 0x161   : > { %1070 = vst.msk [vmem:[#allocation2 + $0xb0] sm:$0xff] %vm476_vm0, %v1042_v39  ;;  %1448 = vperm.xlu0 %5453, %v6084_v40   ;;  %v1294_v39 = vld [vmem:[#allocation2 + $0x88] sm:$0xff] }
 0x162   : > { %v1149_v25 = vpop.permute.xlu2 %1148  ;;  %v954_v43 = vpop.permute.xlu1 %953 }
 0x163   : > { %v1257_v44 = vmul.f32 %v6055_v31, %v1149_v25  ;;  %v990_v11 = vmul.f32 %v5957_v2, %v954_v43  ;;  %v949_v20 = vpop.permute.xlu0 %948  ;;  %v1284_v25 = vld [vmem:[#allocation2 + $0x38] sm:$0xff] }
 0x164   : > { %v989_v21 = vmul.f32 %v5957_v2, %v949_v20 }
 0x165   : > { %v1313_v7 = vadd.f32 %v1285_v45, %v1257_v44  ;;  %v1046_v12 = vadd.f32 %v1018_v16, %v990_v11 }
 0x166   : > { %v1045_v48 = vadd.f32 %v1017_v1, %v989_v21  ;;  %v1287_v1 = vld [vmem:[#allocation2 + $0x50] sm:$0xff] }
 0x167   : > { %1341 = vst.msk [vmem:[#allocation2 + $0x40] sm:$0xff] %vm476_vm0, %v1313_v7 }
 0x168   : > { %1074 = vst.msk [vmem:[#allocation2 + $0xd0] sm:$0xff] %vm476_vm0, %v1046_v12  ;;  %1473 = vperm.xlu2 %5455, %v6096_v32   ;;  %1468 = vperm.xlu1 %5454, %v6099_v33   ;;  %v1297_v12 = vld [vmem:[#allocation2 + $0xa0] sm:$0xff] }
 0x169   : > { %1073 = vst.msk [vmem:[#allocation2 + $0xc8] sm:$0xff] %vm476_vm0, %v1045_v48  ;;  %1463 = vperm.xlu0 %5453, %v6102_v5  }
 0x16a   : > { %v1164_v2 = vpop.permute.xlu2 %1163  ;;  %v1114_v50 = vpop.permute.xlu1 %1113 }
 0x16b   : > { %v1260_v51 = vmul.f32 %v6055_v31, %v1164_v2  ;;  %v1250_v55 = vmul.f32 %v6055_v31, %v1114_v50  ;;  %v1109_v23 = vpop.permute.xlu0 %1108 }
 0x16c   : > { %v1249_v35 = vmul.f32 %v6055_v31, %v1109_v23 }
 0x16d   : > { %v1316_v24 = vadd.f32 %v1288_v56, %v1260_v51  ;;  %v1306_v57 = vadd.f32 %v1278_v19, %v1250_v55  ;;  %v1300_v19 = vld [vmem:[#allocation2 + $0xb8] sm:$0xff] }
 0x16e   : > { %v1305_v15 = vadd.f32 %v1277_v14, %v1249_v35  ;;  %v1290_v35 = vld [vmem:[#allocation2 + $0x68] sm:$0xff]  ;;  %v1289_v14 = vld [vmem:[#allocation2 + $0x60] sm:$0xff] }
 0x16f   : > { %1344 = vst.msk [vmem:[#allocation2 + $0x58] sm:$0xff] %vm476_vm0, %v1316_v24 }
 0x170   : > { %1334 = vst.msk [vmem:[#allocation2 + $0x8] sm:$0xff] %vm476_vm0, %v1306_v57  ;;  %1488 = vperm.xlu2 %5455, %v6114_v58   ;;  %1483 = vperm.xlu1 %5454, %v6117_v10  }
 0x171   : > { %1333 = vst.msk [vmem:[#allocation2] sm:$0xff] %vm476_vm0, %v1305_v15  ;;  %1478 = vperm.xlu0 %5453, %v6120_v59   ;;  %v1940_v15 = vld [vmem:[%s5632_s17 + $0x68] sm:$0xff] }
 0x172   : > { %v1179_v60 = vpop.permute.xlu2 %1178  ;;  %v1129_v26 = vpop.permute.xlu1 %1128 }
 0x173   : > { %v1263_v61 = vmul.f32 %v6055_v31, %v1179_v60  ;;  %v1253_v8 = vmul.f32 %v6055_v31, %v1129_v26  ;;  %v1124_v41 = vpop.permute.xlu0 %1123 }
 0x174   : > { %v1252_v22 = vmul.f32 %v6055_v31, %v1124_v41 }
 0x175   : > { %v1319_v4 = vadd.f32 %v1291_v27, %v1263_v61  ;;  %v1309_v9 = vadd.f32 %v1281_v62, %v1253_v8  ;;  %v1303_v27 = vld [vmem:[#allocation2 + $0xd0] sm:$0xff]  ;;  %v1293_v62 = vld [vmem:[#allocation2 + $0x80] sm:$0xff] }
 0x176   : > { %v1308_v17 = vadd.f32 %v1280_v63, %v1252_v22  ;;  %v1292_v63 = vld [vmem:[#allocation2 + $0x78] sm:$0xff] }
 0x177   : > { %1347 = vst.msk [vmem:[#allocation2 + $0x70] sm:$0xff] %vm476_vm0, %v1319_v4 }
 0x178   : > { %1337 = vst.msk [vmem:[#allocation2 + $0x20] sm:$0xff] %vm476_vm0, %v1309_v9  ;;  %1723 = vperm.xlu2 %5455, %v5868_v34   ;;  %1718 = vperm.xlu1 %5454, %v5872_v38   ;;  %v1283_v34 = vld [vmem:[#allocation2 + $0x30] sm:$0xff] }
 0x179   : > { %1336 = vst.msk [vmem:[#allocation2 + $0x18] sm:$0xff] %vm476_vm0, %v1308_v17  ;;  %1493 = vperm.xlu0 %5453, %v6132_v0   ;;  %v1646_v17 = vld [vmem:[%s5632_s17 + $0x12] sm:$0xff] }
 0x17a   : > { %v1194_v13 = vpop.permute.xlu2 %1193  ;;  %v1144_v18 = vpop.permute.xlu1 %1143 }
 0x17b   : > { %v1266_v46 = vmul.f32 %v6055_v31, %v1194_v13  ;;  %v1256_v49 = vmul.f32 %v6055_v31, %v1144_v18  ;;  %v1139_v37 = vpop.permute.xlu0 %1138  ;;  %v1942_v13 = vld [vmem:[%s5632_s17 + $0x78] sm:$0xff] }
 0x17c   : > { %v1255_v43 = vmul.f32 %v6055_v31, %v1139_v37 }
 0x17d   : > { %v1322_v44 = vadd.f32 %v1294_v39, %v1266_v46  ;;  %v1312_v11 = vadd.f32 %v1284_v25, %v1256_v49  ;;  %v1941_v46 = vld [vmem:[%s5632_s17 + $0x70] sm:$0xff] }
 0x17e   : > { %v1311_v20 = vadd.f32 %v1283_v34, %v1255_v43 }
 0x17f   : > { %1350 = vst.msk [vmem:[#allocation2 + $0x88] sm:$0xff] %vm476_vm0, %v1322_v44  ;;  %v1563_v44 = vld [vmem:[#allocation2 + $0x8] sm:$0xff] }
 0x180   : > { %1340 = vst.msk [vmem:[#allocation2 + $0x38] sm:$0xff] %vm476_vm0, %v1312_v11  ;;  %1738 = vperm.xlu2 %5455, %v5886_v53   ;;  %1733 = vperm.xlu1 %5454, %v5890_v54   ;;  %v1286_v53 = vld [vmem:[#allocation2 + $0x48] sm:$0xff]  ;;  %v1296_v11 = vld [vmem:[#allocation2 + $0x98] sm:$0xff] }
 0x181   : > { %1339 = vst.msk [vmem:[#allocation2 + $0x30] sm:$0xff] %vm476_vm0, %v1311_v20  ;;  %1728 = vperm.xlu0 %5453, %v5865_v30  }
 0x182   : > { %v1209_v38 = vpop.permute.xlu2 %1208  ;;  %v1159_v45 = vpop.permute.xlu1 %1158 }
 0x183   : > { %v1269_v16 = vmul.f32 %v6055_v31, %v1209_v38  ;;  %v1259_v21 = vmul.f32 %v6055_v31, %v1159_v45  ;;  %v1154_v7 = vpop.permute.xlu0 %1153  ;;  %v1295_v45 = vld [vmem:[#allocation2 + $0x90] sm:$0xff] }
 0x184   : > { %v1258_v48 = vmul.f32 %v6055_v31, %v1154_v7 }
 0x185   : > { %v1325_v2 = vadd.f32 %v1297_v12, %v1269_v16  ;;  %v1315_v50 = vadd.f32 %v1287_v1, %v1259_v21  ;;  %v6185_v16 = vld [vmem:[%s5632_s17 + $0x2a] sm:$0xff]  ;;  %v6188_v21 = vld [vmem:[%s5632_s17 + $0x22] sm:$0xff]  ;;  %v1647_v12 = vld [vmem:[%s5632_s17 + $0x1a] sm:$0xff] }
 0x186   : > { %v1314_v51 = vadd.f32 %v1286_v53, %v1258_v48 }
 0x187   : > { %1353 = vst.msk [vmem:[#allocation2 + $0xa0] sm:$0xff] %vm476_vm0, %v1325_v2 }
 0x188   : > { %1343 = vst.msk [vmem:[#allocation2 + $0x50] sm:$0xff] %vm476_vm0, %v1315_v50  ;;  %1753 = vperm.xlu2 %5455, %v5903_v6   ;;  %1748 = vperm.xlu1 %5454, %v5907_v28   ;;  %v1939_v28 = vld [vmem:[%s5632_s17 + $0x60] sm:$0xff] }
 0x189   : > { %1342 = vst.msk [vmem:[#allocation2 + $0x48] sm:$0xff] %vm476_vm0, %v1314_v51  ;;  %1743 = vperm.xlu0 %5453, %v5883_v52   ;;  %v1566_v51 = vld [vmem:[#allocation2 + $0x20] sm:$0xff] }
 0x18a   : > { %v1224_v30 = vpop.permute.xlu2 %1223  ;;  %v1174_v54 = vpop.permute.xlu1 %1173 }
 0x18b   : > { %v1272_v55 = vmul.f32 %v6055_v31, %v1224_v30  ;;  %v1262_v23 = vmul.f32 %v6055_v31, %v1174_v54  ;;  %v1169_v56 = vpop.permute.xlu0 %1168  ;;  %v1299_v30 = vld [vmem:[#allocation2 + $0xb0] sm:$0xff] }
 0x18c   : > { %v1261_v24 = vmul.f32 %v6055_v31, %v1169_v56  ;;  %v1298_v56 = vld [vmem:[#allocation2 + $0xa8] sm:$0xff] }
 0x18d   : > { %v1328_v57 = vadd.f32 %v1300_v19, %v1272_v55  ;;  %v1318_v6 = vadd.f32 %v1290_v35, %v1262_v23  ;;  %v6200_v19 = vld [vmem:[%s5632_s17 + $0x42] sm:$0xff] }
 0x18e   : > { %v1317_v60 = vadd.f32 %v1289_v14, %v1261_v24  ;;  %v1943_v35 = vld [vmem:[%s5632_s17 + $0x80] sm:$0xff] }
 0x18f   : > { %1356 = vst.msk [vmem:[#allocation2 + $0xb8] sm:$0xff] %vm476_vm0, %v1328_v57  ;;  %v6204_v57 = vld [vmem:[%s5632_s17 + $0x9a] sm:$0xff] }
 0x190   : > { %1346 = vst.msk [vmem:[#allocation2 + $0x68] sm:$0xff] %vm476_vm0, %v1318_v6  ;;  %2008 = vperm.xlu2 %5455, %v1940_v15   ;;  %2003 = vperm.xlu1 %5454, %v1939_v28  }
 0x191   : > { %1345 = vst.msk [vmem:[#allocation2 + $0x60] sm:$0xff] %vm476_vm0, %v1317_v60  ;;  %1758 = vperm.xlu0 %5453, %v5900_v3   ;;  %v6177_v3 = vld [vmem:[%s7543_s1 + $0x4] ss:$0 sm:$0xff] }
 0x192   : > { %v1239_v52 = vpop.permute.xlu2 %1238  ;;  %v1189_v26 = vpop.permute.xlu1 %1188 }
 0x193   : > { %v1275_v61 = vmul.f32 %v6055_v31, %v1239_v52  ;;  %v1265_v8 = vmul.f32 %v6055_v31, %v1189_v26  ;;  %v1184_v41 = vpop.permute.xlu0 %1183  ;;  %v1569_v52 = vld [vmem:[#allocation2 + $0x38] sm:$0xff]  ;;  %v1302_v26 = vld [vmem:[#allocation2 + $0xc8] sm:$0xff] }
 0x194   : > { %v1264_v22 = vmul.f32 %v6055_v31, %v1184_v41 }
 0x195   : > { %v1331_v4 = vadd.f32 %v1303_v27, %v1275_v61  ;;  %v1321_v9 = vadd.f32 %v1293_v62, %v1265_v8  ;;  %v1301_v27 = vld [vmem:[#allocation2 + $0xc0] sm:$0xff]  ;;  %v1945_v62 = vld [vmem:[%s5632_s17 + $0x90] sm:$0xff] }
 0x196   : > { %v1320_v18 = vadd.f32 %v1292_v63, %v1264_v22  ;;  %v1944_v22 = vld [vmem:[%s5632_s17 + $0x88] sm:$0xff] }
 0x197   : > { %1359 = vst.msk [vmem:[#allocation2 + $0xd0] sm:$0xff] %vm476_vm0, %v1331_v4 }
 0x198   : > { %1349 = vst.msk [vmem:[#allocation2 + $0x80] sm:$0xff] %vm476_vm0, %v1321_v9  ;;  %1678 = vperm.xlu2 %5455, %v1646_v17   ;;  %2018 = vperm.xlu1 %5454, %v1942_v13   ;;  %v6217_v9 = vld [vmem:[%s5632_s17 + $0x4a] sm:$0xff] }
 0x199   : > { %1348 = vst.msk [vmem:[#allocation2 + $0x78] sm:$0xff] %vm476_vm0, %v1320_v18  ;;  %2013 = vperm.xlu0 %5453, %v1941_v46  }
 0x19a   : > { %v1399_v49 = vpop.permute.xlu2 %1398  ;;  %v1204_v37 = vpop.permute.xlu1 %1203 }
 0x19b   : > { %v1535_v39 = vmul.f32 %v6177_v3, %v1399_v49  ;;  %v1268_v25 = vmul.f32 %v6055_v31, %v1204_v37  ;;  %v1199_v43 = vpop.permute.xlu0 %1198  ;;  %v1572_v49 = vld [vmem:[#allocation2 + $0x50] sm:$0xff]  ;;  %v1562_v37 = vld [vmem:[#allocation2] sm:$0xff] }
 0x19c   : > { %v1267_v34 = vmul.f32 %v6055_v31, %v1199_v43 }
 0x19d   : > { %v1591_v20 = vadd.f32 %v1563_v44, %v1535_v39  ;;  %v1324_v38 = vadd.f32 %v1296_v11, %v1268_v25  ;;  %v1304_v44 = vld [vmem:[#allocation2 + $0xd8] sm:$0x3f]  ;;  %v2224_v11 = vld [vmem:[%s5632_s17 + $0x61] sm:$0xff] }
 0x19e   : > { %v1323_v7 = vadd.f32 %v1295_v45, %v1267_v34  ;;  %v1947_v34 = vld [vmem:[%s5632_s17 + $0xa0] sm:$0xff] }
 0x19f   : > { %1619 = vst.msk [vmem:[#allocation2 + $0x8] sm:$0xff] %vm476_vm0, %v1591_v20 }
 0x1a0   : > { %1352 = vst.msk [vmem:[#allocation2 + $0x98] sm:$0xff] %vm476_vm0, %v1324_v38  ;;  %1693 = vperm.xlu2 %5455, %v6185_v16   ;;  %1688 = vperm.xlu1 %5454, %v6188_v21   ;;  %v1946_v38 = vld [vmem:[%s5632_s17 + $0x98] sm:$0xff] }
 0x1a1   : > { %1351 = vst.msk [vmem:[#allocation2 + $0x90] sm:$0xff] %vm476_vm0, %v1323_v7  ;;  %1683 = vperm.xlu0 %5453, %v1647_v12  }
 0x1a2   : > { %v1414_v1 = vpop.permute.xlu2 %1413  ;;  %v1219_v48 = vpop.permute.xlu1 %1218 }
 0x1a3   : > { %v1538_v2 = vmul.f32 %v6177_v3, %v1414_v1  ;;  %v1271_v50 = vmul.f32 %v6055_v31, %v1219_v48  ;;  %v1214_v53 = vpop.permute.xlu0 %1213  ;;  %v1575_v48 = vld [vmem:[#allocation2 + $0x68] sm:$0xff] }
 0x1a4   : > { %v1270_v54 = vmul.f32 %v6055_v31, %v1214_v53 }
 0x1a5   : > { %v1594_v55 = vadd.f32 %v1566_v51, %v1538_v2  ;;  %v1327_v23 = vadd.f32 %v1299_v30, %v1271_v50  ;;  %v1565_v2 = vld [vmem:[#allocation2 + $0x18] sm:$0xff]  ;;  %v1564_v30 = vld [vmem:[#allocation2 + $0x10] sm:$0xff] }
 0x1a6   : > { %v1326_v24 = vadd.f32 %v1298_v56, %v1270_v54 }
 0x1a7   : > { %1622 = vst.msk [vmem:[#allocation2 + $0x20] sm:$0xff] %vm476_vm0, %v1594_v55 }
 0x1a8   : > { %1355 = vst.msk [vmem:[#allocation2 + $0xb0] sm:$0xff] %vm476_vm0, %v1327_v23  ;;  %1708 = vperm.xlu2 %5455, %v6200_v19   ;;  %2023 = vperm.xlu1 %5454, %v1943_v35  }
 0x1a9   : > { %1354 = vst.msk [vmem:[#allocation2 + $0xa8] sm:$0xff] %vm476_vm0, %v1326_v24  ;;  %1763 = vperm.xlu0 %5453, %v6204_v57  }
 0x1aa   : > { %v1429_v6 = vpop.permute.xlu2 %1428  ;;  %v1234_v14 = vpop.permute.xlu1 %1233 }
 0x1ab   : > { %v1541_v15 = vmul.f32 %v6177_v3, %v1429_v6  ;;  %v1274_v28 = vmul.f32 %v6055_v31, %v1234_v14  ;;  %v1229_v60 = vpop.permute.xlu0 %1228  ;;  %v1578_v6 = vld [vmem:[#allocation2 + $0x80] sm:$0xff]  ;;  %v1568_v14 = vld [vmem:[#allocation2 + $0x30] sm:$0xff] }
 0x1ac   : > { %v1273_v61 = vmul.f32 %v6055_v31, %v1229_v60  ;;  %v1567_v60 = vld [vmem:[#allocation2 + $0x28] sm:$0xff] }
 0x1ad   : > { %v1597_v8 = vadd.f32 %v1569_v52, %v1541_v15  ;;  %v1330_v41 = vadd.f32 %v1302_v26, %v1274_v28  ;;  %v6246_v52 = vld [vmem:[%s5632_s17 + $0xa2] sm:$0xff] }
 0x1ae   : > { %v1329_v4 = vadd.f32 %v1301_v27, %v1273_v61  ;;  %v6249_v61 = vld [vmem:[%s5632_s17 + $0x32] sm:$0xff] }
 0x1af   : > { %1625 = vst.msk [vmem:[#allocation2 + $0x38] sm:$0xff] %vm476_vm0, %v1597_v8 }
 0x1b0   : > { %1358 = vst.msk [vmem:[#allocation2 + $0xc8] sm:$0xff] %vm476_vm0, %v1330_v41  ;;  %2033 = vperm.xlu2 %5455, %v1945_v62   ;;  %2028 = vperm.xlu1 %5454, %v1944_v22   ;;  %v1581_v22 = vld [vmem:[#allocation2 + $0x98] sm:$0xff] }
 0x1b1   : > { %1357 = vst.msk [vmem:[#allocation2 + $0xc0] sm:$0xff] %vm476_vm0, %v1329_v4  ;;  %1713 = vperm.xlu0 %5453, %v6217_v9   ;;  %v1571_v4 = vld [vmem:[#allocation2 + $0x48] sm:$0xff] }
 0x1b2   : > { %v1444_v63 = vpop.permute.xlu2 %1443  ;;  %v1394_v17 = vpop.permute.xlu1 %1393 }
 0x1b3   : > { %v1544_v13 = vmul.f32 %v6177_v3, %v1444_v63  ;;  %v1534_v18 = vmul.f32 %v6177_v3, %v1394_v17  ;;  %v1244_v46 = vpop.permute.xlu0 %1243 }
 0x1b4   : > { %v1276_v39 = vmul.f32 %v6055_v31, %v1244_v46  ;;  %v1934_v46 = vld [vmem:[%s5632_s17 + $0x38] sm:$0xff] }
 0x1b5   : > { %v1600_v25 = vadd.f32 %v1572_v49, %v1544_v13  ;;  %v1590_v43 = vadd.f32 %v1562_v37, %v1534_v18  ;;  %v1570_v18 = vld [vmem:[#allocation2 + $0x40] sm:$0xff]  ;;  %v1933_v49 = vld [vmem:[%s5632_s17 + $0x30] sm:$0xff] }
 0x1b6   : > { %v1332_v20 = vadd.f32 %v1304_v44, %v1276_v39  ;;  %v1932_v39 = vld [vmem:[%s5632_s17 + $0x28] sm:$0xff] }
 0x1b7   : > { %1628 = vst.msk [vmem:[#allocation2 + $0x50] sm:$0xff] %vm476_vm0, %v1600_v25  ;;  %v6268_v25 = vld [vmem:[%s7543_s1 + $0x5] ss:$0 sm:$0xff] }
 0x1b8   : > { %1618 = vst.msk [vmem:[#allocation2] sm:$0xff] %vm476_vm0, %v1590_v43  ;;  %2288 = vperm.xlu2 %5455, %v2224_v11   ;;  %2043 = vperm.xlu1 %5454, %v1947_v34  }
 0x1b9   : > { %1360 = vst.msk [vmem:[#allocation2 + $0xd8] sm:$0x3f] %vm504_vm1, %v1332_v20  ;;  %2038 = vperm.xlu0 %5453, %v1946_v38   ;;  %v1574_v20 = vld [vmem:[#allocation2 + $0x60] sm:$0xff] }
 0x1ba   : > { %v1459_v45 = vpop.permute.xlu2 %1458  ;;  %v1409_v7 = vpop.permute.xlu1 %1408 }
 0x1bb   : > { %v1547_v31 = vmul.f32 %v6177_v3, %v1459_v45  ;;  %v1537_v12 = vmul.f32 %v6177_v3, %v1409_v7  ;;  %v1404_v1 = vpop.permute.xlu0 %1403  ;;  %v1573_v7 = vld [vmem:[#allocation2 + $0x58] sm:$0xff] }
 0x1bc   : > { %v1536_v50 = vmul.f32 %v6177_v3, %v1404_v1 }
 0x1bd   : > { %v1603_v53 = vadd.f32 %v1575_v48, %v1547_v31  ;;  %v1593_v51 = vadd.f32 %v1565_v2, %v1537_v12  ;;  %v1937_v31 = vld [vmem:[%s5632_s17 + $0x50] sm:$0xff]  ;;  %v1948_v48 = vld [vmem:[%s5632_s17 + $0xa8] sm:$0xff] }
 0x1be   : > { %v1592_v54 = vadd.f32 %v1564_v30, %v1536_v50 }
 0x1bf   : > { %1631 = vst.msk [vmem:[#allocation2 + $0x68] sm:$0xff] %vm476_vm0, %v1603_v53 }
 0x1c0   : > { %1621 = vst.msk [vmem:[#allocation2 + $0x18] sm:$0xff] %vm476_vm0, %v1593_v51  ;;  %2303 = vperm.xlu2 %5455, %v6078_v47   ;;  %2298 = vperm.xlu1 %5454, %v6081_v29   ;;  %v1931_v29 = vld [vmem:[%s5632_s17 + $0x20] sm:$0xff] }
 0x1c1   : > { %1620 = vst.msk [vmem:[#allocation2 + $0x10] sm:$0xff] %vm476_vm0, %v1592_v54  ;;  %2293 = vperm.xlu0 %5453, %v6084_v40  }
 0x1c2   : > { %v1474_v55 = vpop.permute.xlu2 %1473  ;;  %v1424_v23 = vpop.permute.xlu1 %1423 }
 0x1c3   : > { %v1550_v56 = vmul.f32 %v6177_v3, %v1474_v55  ;;  %v1540_v35 = vmul.f32 %v6177_v3, %v1424_v23  ;;  %v1419_v24 = vpop.permute.xlu0 %1418  ;;  %v1577_v55 = vld [vmem:[#allocation2 + $0x78] sm:$0xff] }
 0x1c4   : > { %v1539_v15 = vmul.f32 %v6177_v3, %v1419_v24  ;;  %v1576_v24 = vld [vmem:[#allocation2 + $0x70] sm:$0xff] }
 0x1c5   : > { %v1606_v47 = vadd.f32 %v1578_v6, %v1550_v56  ;;  %v1596_v28 = vadd.f32 %v1568_v14, %v1540_v35 }
 0x1c6   : > { %v1595_v26 = vadd.f32 %v1567_v60, %v1539_v15  ;;  %v1938_v15 = vld [vmem:[%s5632_s17 + $0x58] sm:$0xff] }
 0x1c7   : > { %1634 = vst.msk [vmem:[#allocation2 + $0x80] sm:$0xff] %vm476_vm0, %v1606_v47 }
 0x1c8   : > { %1624 = vst.msk [vmem:[#allocation2 + $0x30] sm:$0xff] %vm476_vm0, %v1596_v28  ;;  %1963 = vperm.xlu2 %5455, %v1931_v29   ;;  %1768 = vperm.xlu1 %5454, %v6246_v52  }
 0x1c9   : > { %1623 = vst.msk [vmem:[#allocation2 + $0x28] sm:$0xff] %vm476_vm0, %v1595_v26  ;;  %1698 = vperm.xlu0 %5453, %v6249_v61   ;;  %v1580_v26 = vld [vmem:[#allocation2 + $0x90] sm:$0xff] }
 0x1ca   : > { %v1489_v40 = vpop.permute.xlu2 %1488  ;;  %v1439_v8 = vpop.permute.xlu1 %1438 }
 0x1cb   : > { %v1553_v41 = vmul.f32 %v6177_v3, %v1489_v40  ;;  %v1543_v27 = vmul.f32 %v6177_v3, %v1439_v8  ;;  %v1434_v62 = vpop.permute.xlu0 %1433 }
 0x1cc   : > { %v1542_v63 = vmul.f32 %v6177_v3, %v1434_v62  ;;  %v2509_v62 = vld [vmem:[%s5632_s17 + $0x62] sm:$0xff] }
 0x1cd   : > { %v1609_v17 = vadd.f32 %v1581_v22, %v1553_v41  ;;  %v1599_v13 = vadd.f32 %v1571_v4, %v1543_v27  ;;  %v1579_v27 = vld [vmem:[#allocation2 + $0x88] sm:$0xff] }
 0x1ce   : > { %v1598_v37 = vadd.f32 %v1570_v18, %v1542_v63 }
 0x1cf   : > { %1637 = vst.msk [vmem:[#allocation2 + $0x98] sm:$0xff] %vm476_vm0, %v1609_v17 }
 0x1d0   : > { %1627 = vst.msk [vmem:[#allocation2 + $0x48] sm:$0xff] %vm476_vm0, %v1599_v13  ;;  %1978 = vperm.xlu2 %5455, %v1934_v46   ;;  %1973 = vperm.xlu1 %5454, %v1933_v49  }
 0x1d1   : > { %1626 = vst.msk [vmem:[#allocation2 + $0x40] sm:$0xff] %vm476_vm0, %v1598_v37  ;;  %1968 = vperm.xlu0 %5453, %v1932_v39  }
 0x1d2   : > { %v1724_v43 = vpop.permute.xlu2 %1723  ;;  %v1454_v44 = vpop.permute.xlu1 %1453 }
 0x1d3   : > { %v1546_v11 = vmul.f32 %v6177_v3, %v1454_v44  ;;  %v1449_v34 = vpop.permute.xlu0 %1448  ;;  %v1828_v12 = vmul.f32 %v6268_v25, %v1724_v43 }
 0x1d4   : > { %v1545_v38 = vmul.f32 %v6177_v3, %v1449_v34  ;;  %v2511_v34 = vld [vmem:[%s5632_s17 + $0x72] sm:$0xff] }
 0x1d5   : > { %v1602_v45 = vadd.f32 %v1574_v20, %v1546_v11  ;;  %v1582_v11 = vld [vmem:[#allocation2 + $0xa0] sm:$0xff] }
 0x1d6   : > { %v1601_v1 = vadd.f32 %v1573_v7, %v1545_v38  ;;  %v2510_v38 = vld [vmem:[%s5632_s17 + $0x6a] sm:$0xff] }
 0x1d7   : > { %v1856_v2 = vld [vmem:[#allocation2 + $0x48] sm:$0xff]  ;;  %1630 = vst.msk [vmem:[#allocation2 + $0x60] sm:$0xff] %vm476_vm0, %v1602_v45 }
 0x1d8   : > { %v1884_v50 = vadd.f32 %v1856_v2, %v1828_v12  ;;  %1629 = vst.msk [vmem:[#allocation2 + $0x58] sm:$0xff] %vm476_vm0, %v1601_v1  ;;  %1993 = vperm.xlu2 %5455, %v1937_v31   ;;  %2308 = vperm.xlu1 %5454, %v6102_v5   ;;  %v1855_v37 = vld [vmem:[#allocation2 + $0x40] sm:$0xff] }
 0x1d9   : > { %2048 = vperm.xlu0 %5453, %v1948_v48   ;;  %v1847_v12 = vld [vmem:[#allocation2] sm:$0xff] }
 0x1da   : > { %1912 = vst.msk [vmem:[#allocation2 + $0x48] sm:$0xff] %vm476_vm0, %v1884_v50  ;;  %v1739_v53 = vpop.permute.xlu2 %1738  ;;  %v1469_v51 = vpop.permute.xlu1 %1468 }
 0x1db   : > { %v1549_v30 = vmul.f32 %v6177_v3, %v1469_v51  ;;  %v1464_v54 = vpop.permute.xlu0 %1463  ;;  %v1831_v56 = vmul.f32 %v6268_v25, %v1739_v53  ;;  %v1857_v53 = vld [vmem:[#allocation2 + $0x50] sm:$0xff]  ;;  %v1935_v51 = vld [vmem:[%s5632_s17 + $0x40] sm:$0xff] }
 0x1dc   : > { %v1548_v23 = vmul.f32 %v6177_v3, %v1464_v54 }
 0x1dd   : > { %v1605_v35 = vadd.f32 %v1577_v55, %v1549_v30  ;;  %v6316_v30 = vld [vmem:[%s5632_s17 + $0xaa] sm:$0xff]  ;;  %v6319_v55 = vld [vmem:[%s5632_s17 + $0x3a] sm:$0xff] }
 0x1de   : > { %v1859_v6 = vld [vmem:[#allocation2 + $0x60] sm:$0xff]  ;;  %v1604_v14 = vadd.f32 %v1576_v24, %v1548_v23 }
 0x1df   : > { %v1887_v47 = vadd.f32 %v1859_v6, %v1831_v56  ;;  %1633 = vst.msk [vmem:[#allocation2 + $0x78] sm:$0xff] %vm476_vm0, %v1605_v35  ;;  %v1858_v1 = vld [vmem:[#allocation2 + $0x58] sm:$0xff] }
 0x1e0   : > { %1632 = vst.msk [vmem:[#allocation2 + $0x70] sm:$0xff] %vm476_vm0, %v1604_v14  ;;  %2318 = vperm.xlu2 %5455, %v6096_v32   ;;  %2313 = vperm.xlu1 %5454, %v6099_v33   ;;  %v6296_v33 = vld [vmem:[%s7543_s1 + $0x6] ss:$0 sm:$0xff]  ;;  %v1850_v14 = vld [vmem:[#allocation2 + $0x18] sm:$0xff] }
 0x1e1   : > { %1915 = vst.msk [vmem:[#allocation2 + $0x60] sm:$0xff] %vm476_vm0, %v1887_v47  ;;  %1998 = vperm.xlu0 %5453, %v1938_v15   ;;  %v2141_v49 = vld [vmem:[#allocation2 + $0x48] sm:$0xff] }
 0x1e2   : > { %v1754_v5 = vpop.permute.xlu2 %1753  ;;  %v1484_v28 = vpop.permute.xlu1 %1483 }
 0x1e3   : > { %v1552_v60 = vmul.f32 %v6177_v3, %v1484_v28  ;;  %v1479_v29 = vpop.permute.xlu0 %1478  ;;  %v1834_v8 = vmul.f32 %v6268_v25, %v1754_v5 }
 0x1e4   : > { %v1551_v40 = vmul.f32 %v6177_v3, %v1479_v29  ;;  %v2217_v29 = vld [vmem:[%s5632_s17 + $0x29] sm:$0xff] }
 0x1e5   : > { %v1608_v41 = vadd.f32 %v1580_v26, %v1552_v60  ;;  %v1860_v60 = vld [vmem:[#allocation2 + $0x68] sm:$0xff] }
 0x1e6   : > { %v1862_v22 = vld [vmem:[#allocation2 + $0x78] sm:$0xff]  ;;  %v1607_v32 = vadd.f32 %v1579_v27, %v1551_v40  ;;  %v2216_v26 = vld [vmem:[%s5632_s17 + $0x21] sm:$0xff] }
 0x1e7   : > { %v1890_v4 = vadd.f32 %v1862_v22, %v1834_v8  ;;  %1636 = vst.msk [vmem:[#allocation2 + $0x90] sm:$0xff] %vm476_vm0, %v1608_v41  ;;  %v1861_v15 = vld [vmem:[#allocation2 + $0x70] sm:$0xff] }
 0x1e8   : > { %1635 = vst.msk [vmem:[#allocation2 + $0x88] sm:$0xff] %vm476_vm0, %v1607_v32  ;;  %2573 = vperm.xlu2 %5455, %v2509_v62   ;;  %2328 = vperm.xlu1 %5454, %v6117_v10   ;;  %v2512_v10 = vld [vmem:[%s5632_s17 + $0x7a] sm:$0xff]  ;;  %v1949_v8 = vld [vmem:[%s5632_s17 + $0xb0] sm:$0xff] }
 0x1e9   : > { %1918 = vst.msk [vmem:[#allocation2 + $0x78] sm:$0xff] %vm476_vm0, %v1890_v4  ;;  %2323 = vperm.xlu0 %5453, %v6120_v59   ;;  %v1853_v4 = vld [vmem:[#allocation2 + $0x30] sm:$0xff] }
 0x1ea   : > { %v2009_v63 = vpop.permute.xlu2 %2008  ;;  %v1719_v17 = vpop.permute.xlu1 %1718 }
 0x1eb   : > { %v2113_v13 = vmul.f32 %v6296_v33, %v2009_v63  ;;  %v1827_v18 = vmul.f32 %v6268_v25, %v1719_v17  ;;  %v1494_v46 = vpop.permute.xlu0 %1493 }
 0x1ec   : > { %v1554_v39 = vmul.f32 %v6177_v3, %v1494_v46  ;;  %v1863_v46 = vld [vmem:[#allocation2 + $0x80] sm:$0xff] }
 0x1ed   : > { %v2169_v43 = vadd.f32 %v2141_v49, %v2113_v13  ;;  %v1883_v44 = vadd.f32 %v1855_v37, %v1827_v18  ;;  %v2218_v37 = vld [vmem:[%s5632_s17 + $0x31] sm:$0xff] }
 0x1ee   : > { %v1610_v20 = vadd.f32 %v1582_v11, %v1554_v39 }
 0x1ef   : > { %2197 = vst.msk [vmem:[#allocation2 + $0x48] sm:$0xff] %vm476_vm0, %v2169_v43 }
 0x1f0   : > { %1911 = vst.msk [vmem:[#allocation2 + $0x40] sm:$0xff] %vm476_vm0, %v1883_v44  ;;  %2588 = vperm.xlu2 %5455, %v2512_v10   ;;  %2583 = vperm.xlu1 %5454, %v2511_v34  }
 0x1f1   : > { %1638 = vst.msk [vmem:[#allocation2 + $0xa0] sm:$0xff] %vm476_vm0, %v1610_v20  ;;  %2578 = vperm.xlu0 %5453, %v2510_v38  }
 0x1f2   : > { %v1679_v59 = vpop.permute.xlu2 %1678  ;;  %v1734_v3 = vpop.permute.xlu1 %1733 }
 0x1f3   : > { %v1819_v45 = vmul.f32 %v6268_v25, %v1679_v59  ;;  %v1830_v7 = vmul.f32 %v6268_v25, %v1734_v3  ;;  %v1729_v31 = vpop.permute.xlu0 %1728 }
 0x1f4   : > { %v1829_v48 = vmul.f32 %v6268_v25, %v1729_v31  ;;  %v6353_v31 = vld [vmem:[%s7543_s1 + $0x7] ss:$0 sm:$0xff] }
 0x1f5   : > { %v1875_v2 = vadd.f32 %v1847_v12, %v1819_v45  ;;  %v1886_v50 = vadd.f32 %v1858_v1, %v1830_v7  ;;  %v2223_v45 = vld [vmem:[%s5632_s17 + $0x59] sm:$0xff]  ;;  %v2513_v7 = vld [vmem:[%s5632_s17 + $0x82] sm:$0xff] }
 0x1f6   : > { %v1885_v54 = vadd.f32 %v1857_v53, %v1829_v48 }
 0x1f7   : > { %1903 = vst.msk [vmem:[#allocation2] sm:$0xff] %vm476_vm0, %v1875_v2  ;;  %v2140_v63 = vld [vmem:[#allocation2 + $0x40] sm:$0xff] }
 0x1f8   : > { %1914 = vst.msk [vmem:[#allocation2 + $0x58] sm:$0xff] %vm476_vm0, %v1886_v50  ;;  %1983 = vperm.xlu2 %5455, %v1935_v51   ;;  %1773 = vperm.xlu1 %5454, %v6316_v30   ;;  %v1849_v51 = vld [vmem:[#allocation2 + $0x10] sm:$0xff] }
 0x1f9   : > { %1913 = vst.msk [vmem:[#allocation2 + $0x50] sm:$0xff] %vm476_vm0, %v1885_v54  ;;  %1703 = vperm.xlu0 %5453, %v6319_v55  }
 0x1fa   : > { %v1694_v23 = vpop.permute.xlu2 %1693  ;;  %v1749_v56 = vpop.permute.xlu1 %1748 }
 0x1fb   : > { %v1822_v35 = vmul.f32 %v6268_v25, %v1694_v23  ;;  %v1833_v24 = vmul.f32 %v6268_v25, %v1749_v56  ;;  %v1744_v6 = vpop.permute.xlu0 %1743 }
 0x1fc   : > { %v1832_v47 = vmul.f32 %v6268_v25, %v1744_v6  ;;  %v2514_v6 = vld [vmem:[%s5632_s17 + $0x8a] sm:$0xff] }
 0x1fd   : > { %v1878_v5 = vadd.f32 %v1850_v14, %v1822_v35  ;;  %v1889_v28 = vadd.f32 %v1861_v15, %v1833_v24  ;;  %v1848_v35 = vld [vmem:[#allocation2 + $0x8] sm:$0xff]  ;;  %v2515_v24 = vld [vmem:[%s5632_s17 + $0x92] sm:$0xff] }
 0x1fe   : > { %v1888_v40 = vadd.f32 %v1860_v60, %v1832_v47 }
 0x1ff   : > { %1906 = vst.msk [vmem:[#allocation2 + $0x18] sm:$0xff] %vm476_vm0, %v1878_v5  ;;  %v2143_v20 = vld [vmem:[#allocation2 + $0x58] sm:$0xff] }
 0x200   : > { %1917 = vst.msk [vmem:[#allocation2 + $0x70] sm:$0xff] %vm476_vm0, %v1889_v28  ;;  %2253 = vperm.xlu2 %5455, %v2217_v29   ;;  %2248 = vperm.xlu1 %5454, %v2216_v26   ;;  %v2144_v29 = vld [vmem:[#allocation2 + $0x60] sm:$0xff] }
 0x201   : > { %1916 = vst.msk [vmem:[#allocation2 + $0x68] sm:$0xff] %vm476_vm0, %v1888_v40  ;;  %2053 = vperm.xlu0 %5453, %v1949_v8  }
 0x202   : > { %v1709_v41 = vpop.permute.xlu2 %1708  ;;  %v2004_v27 = vpop.permute.xlu1 %2003 }
 0x203   : > { %v1825_v62 = vmul.f32 %v6268_v25, %v1709_v41  ;;  %v2112_v22 = vmul.f32 %v6296_v33, %v2004_v27  ;;  %v1759_v32 = vpop.permute.xlu0 %1758  ;;  %v1864_v41 = vld [vmem:[#allocation2 + $0x88] sm:$0xff]  ;;  %v6372_v27 = vld [vmem:[%s5632_s17 + $0xb2] sm:$0xff] }
 0x204   : > { %v1835_v17 = vmul.f32 %v6268_v25, %v1759_v32 }
 0x205   : > { %v1881_v13 = vadd.f32 %v1853_v4, %v1825_v62  ;;  %v2168_v18 = vadd.f32 %v2140_v63, %v2112_v22 }
 0x206   : > { %v1891_v49 = vadd.f32 %v1863_v46, %v1835_v17 }
 0x207   : > { %1909 = vst.msk [vmem:[#allocation2 + $0x30] sm:$0xff] %vm476_vm0, %v1881_v13  ;;  %v2146_v34 = vld [vmem:[#allocation2 + $0x70] sm:$0xff]  ;;  %v2132_v13 = vld [vmem:[#allocation2] sm:$0xff] }
 0x208   : > { %2196 = vst.msk [vmem:[#allocation2 + $0x40] sm:$0xff] %vm476_vm0, %v2168_v18  ;;  %2333 = vperm.xlu2 %5455, %v6114_v58   ;;  %2263 = vperm.xlu1 %5454, %v6049_v36   ;;  %v2142_v58 = vld [vmem:[#allocation2 + $0x50] sm:$0xff]  ;;  %v2145_v18 = vld [vmem:[#allocation2 + $0x68] sm:$0xff] }
 0x209   : > { %1919 = vst.msk [vmem:[#allocation2 + $0x80] sm:$0xff] %vm476_vm0, %v1891_v49  ;;  %2258 = vperm.xlu0 %5453, %v2218_v37  }
 0x20a   : > { %v2034_v39 = vpop.permute.xlu2 %2033  ;;  %v2019_v43 = vpop.permute.xlu1 %2018 }
 0x20b   : > { %v2118_v44 = vmul.f32 %v6296_v33, %v2034_v39  ;;  %v2115_v11 = vmul.f32 %v6296_v33, %v2019_v43  ;;  %v2014_v10 = vpop.permute.xlu0 %2013  ;;  %v1854_v39 = vld [vmem:[#allocation2 + $0x38] sm:$0xff]  ;;  %v2220_v43 = vld [vmem:[%s5632_s17 + $0x41] sm:$0xff] }
 0x20c   : > { %v2114_v38 = vmul.f32 %v6296_v33, %v2014_v10 }
 0x20d   : > { %v2174_v59 = vadd.f32 %v2146_v34, %v2118_v44  ;;  %v2171_v3 = vadd.f32 %v2143_v20, %v2115_v11  ;;  %v1950_v11 = vld [vmem:[%s5632_s17 + $0xb8] sm:$0xff] }
 0x20e   : > { %v2170_v36 = vadd.f32 %v2142_v58, %v2114_v38 }
 0x20f   : > { %2202 = vst.msk [vmem:[#allocation2 + $0x70] sm:$0xff] %vm476_vm0, %v2174_v59  ;;  %v2425_v53 = vld [vmem:[#allocation2 + $0x40] sm:$0xff]  ;;  %v2135_v59 = vld [vmem:[#allocation2 + $0x18] sm:$0xff] }
 0x210   : > { %2199 = vst.msk [vmem:[#allocation2 + $0x58] sm:$0xff] %vm476_vm0, %v2171_v3  ;;  %2283 = vperm.xlu2 %5455, %v2223_v45   ;;  %2278 = vperm.xlu1 %5454, %v6066_v42   ;;  %v2148_v3 = vld [vmem:[#allocation2 + $0x80] sm:$0xff] }
 0x211   : > { %2198 = vst.msk [vmem:[#allocation2 + $0x50] sm:$0xff] %vm476_vm0, %v2170_v36  ;;  %2593 = vperm.xlu0 %5453, %v2513_v7   ;;  %v2147_v7 = vld [vmem:[#allocation2 + $0x78] sm:$0xff] }
 0x212   : > { %v2289_v12 = vpop.permute.xlu2 %2288  ;;  %v1689_v1 = vpop.permute.xlu1 %1688 }
 0x213   : > { %v2397_v48 = vmul.f32 %v6353_v31, %v2289_v12  ;;  %v1821_v2 = vmul.f32 %v6268_v25, %v1689_v1  ;;  %v1684_v50 = vpop.permute.xlu0 %1683 }
 0x214   : > { %v1820_v54 = vmul.f32 %v6268_v25, %v1684_v50 }
 0x215   : > { %v2453_v23 = vadd.f32 %v2425_v53, %v2397_v48  ;;  %v1877_v56 = vadd.f32 %v1849_v51, %v1821_v2  ;;  %v2138_v53 = vld [vmem:[#allocation2 + $0x30] sm:$0xff] }
 0x216   : > { %v1876_v42 = vadd.f32 %v1848_v35, %v1820_v54  ;;  %v2507_v35 = vld [vmem:[%s5632_s17 + $0x52] sm:$0xff] }
 0x217   : > { %2481 = vst.msk [vmem:[#allocation2 + $0x40] sm:$0xff] %vm476_vm0, %v2453_v23  ;;  %v2428_v60 = vld [vmem:[#allocation2 + $0x58] sm:$0xff] }
 0x218   : > { %1905 = vst.msk [vmem:[#allocation2 + $0x10] sm:$0xff] %vm476_vm0, %v1877_v56  ;;  %2608 = vperm.xlu2 %5455, %v6204_v57   ;;  %2603 = vperm.xlu1 %5454, %v2515_v24   ;;  %v1936_v57 = vld [vmem:[%s5632_s17 + $0x48] sm:$0xff]  ;;  %v2427_v51 = vld [vmem:[#allocation2 + $0x50] sm:$0xff] }
 0x219   : > { %1904 = vst.msk [vmem:[#allocation2 + $0x8] sm:$0xff] %vm476_vm0, %v1876_v42  ;;  %2598 = vperm.xlu0 %5453, %v2514_v6  }
 0x21a   : > { %v2304_v14 = vpop.permute.xlu2 %2303  ;;  %v2024_v15 = vpop.permute.xlu1 %2023 }
 0x21b   : > { %v2400_v47 = vmul.f32 %v6353_v31, %v2304_v14  ;;  %v2116_v5 = vmul.f32 %v6296_v33, %v2024_v15  ;;  %v1764_v28 = vpop.permute.xlu0 %1763  ;;  %v2431_v15 = vld [vmem:[#allocation2 + $0x70] sm:$0xff] }
 0x21c   : > { %v1836_v26 = vmul.f32 %v6268_v25, %v1764_v28 }
 0x21d   : > { %v2456_v40 = vadd.f32 %v2428_v60, %v2400_v47  ;;  %v2172_v8 = vadd.f32 %v2144_v29, %v2116_v5  ;;  %v1865_v47 = vld [vmem:[#allocation2 + $0x90] sm:$0xff]  ;;  %v1851_v29 = vld [vmem:[#allocation2 + $0x20] sm:$0xff] }
 0x21e   : > { %v1892_v62 = vadd.f32 %v1864_v41, %v1836_v26  ;;  %v1951_v26 = vld [vmem:[%s5632_s17 + $0xc0] sm:$0xff] }
 0x21f   : > { %2484 = vst.msk [vmem:[#allocation2 + $0x58] sm:$0xff] %vm476_vm0, %v2456_v40 }
 0x220   : > { %2200 = vst.msk [vmem:[#allocation2 + $0x60] sm:$0xff] %vm476_vm0, %v2172_v8  ;;  %1988 = vperm.xlu2 %5455, %v1936_v57   ;;  %1778 = vperm.xlu1 %5454, %v6372_v27   ;;  %v2508_v8 = vld [vmem:[%s5632_s17 + $0x5a] sm:$0xff] }
 0x221   : > { %1920 = vst.msk [vmem:[#allocation2 + $0x88] sm:$0xff] %vm476_vm0, %v1892_v62  ;;  %2613 = vperm.xlu0 %5453, %v6246_v52  }
 0x222   : > { %v1964_v22 = vpop.permute.xlu2 %1963  ;;  %v2029_v32 = vpop.permute.xlu1 %2028 }
 0x223   : > { %v2104_v4 = vmul.f32 %v6296_v33, %v1964_v22  ;;  %v2117_v63 = vmul.f32 %v6296_v33, %v2029_v32  ;;  %v1714_v17 = vpop.permute.xlu0 %1713 }
 0x224   : > { %v1826_v46 = vmul.f32 %v6268_v25, %v1714_v17 }
 0x225   : > { %v2160_v49 = vadd.f32 %v2132_v13, %v2104_v4  ;;  %v2173_v37 = vadd.f32 %v2145_v18, %v2117_v63  ;;  %v2710_v4 = vld [vmem:[#allocation2 + $0x40] sm:$0xff]  ;;  %v2134_v63 = vld [vmem:[#allocation2 + $0x10] sm:$0xff] }
 0x226   : > { %v1882_v44 = vadd.f32 %v1854_v39, %v1826_v46  ;;  %v2133_v46 = vld [vmem:[#allocation2 + $0x8] sm:$0xff] }
 0x227   : > { %2188 = vst.msk [vmem:[#allocation2] sm:$0xff] %vm476_vm0, %v2160_v49 }
 0x228   : > { %2201 = vst.msk [vmem:[#allocation2 + $0x68] sm:$0xff] %vm476_vm0, %v2173_v37  ;;  %2338 = vperm.xlu2 %5455, %v6132_v0   ;;  %2268 = vperm.xlu1 %5454, %v2220_v43   ;;  %v2235_v37 = vld [vmem:[%s5632_s17 + $0xb9] sm:$0xff] }
 0x229   : > { %1910 = vst.msk [vmem:[#allocation2 + $0x38] sm:$0xff] %vm476_vm0, %v1882_v44  ;;  %2058 = vperm.xlu0 %5453, %v1950_v11   ;;  %v6432_v44 = vld [vmem:[%s7544_s2] ss:$0 sm:$0xff] }
 0x22a   : > { %v1979_v52 = vpop.permute.xlu2 %1978  ;;  %v2044_v10 = vpop.permute.xlu1 %2043 }
 0x22b   : > { %v2107_v34 = vmul.f32 %v6296_v33, %v1979_v52  ;;  %v2120_v20 = vmul.f32 %v6296_v33, %v2044_v10  ;;  %v2039_v38 = vpop.permute.xlu0 %2038 }
 0x22c   : > { %v2119_v58 = vmul.f32 %v6296_v33, %v2039_v38 }
 0x22d   : > { %v2163_v45 = vadd.f32 %v2135_v59, %v2107_v34  ;;  %v2176_v36 = vadd.f32 %v2148_v3, %v2120_v20  ;;  %v2429_v34 = vld [vmem:[#allocation2 + $0x60] sm:$0xff]  ;;  %v2149_v59 = vld [vmem:[#allocation2 + $0x88] sm:$0xff] }
 0x22e   : > { %v2175_v12 = vadd.f32 %v2147_v7, %v2119_v58  ;;  %v2520_v3 = vld [vmem:[%s5632_s17 + $0xba] sm:$0xff] }
 0x22f   : > { %2191 = vst.msk [vmem:[#allocation2 + $0x18] sm:$0xff] %vm476_vm0, %v2163_v45 }
 0x230   : > { %2204 = vst.msk [vmem:[#allocation2 + $0x80] sm:$0xff] %vm476_vm0, %v2176_v36  ;;  %2543 = vperm.xlu2 %5455, %v6249_v61   ;;  %2538 = vperm.xlu1 %5454, %v6185_v16   ;;  %v2426_v61 = vld [vmem:[#allocation2 + $0x48] sm:$0xff] }
 0x231   : > { %2203 = vst.msk [vmem:[#allocation2 + $0x78] sm:$0xff] %vm476_vm0, %v2175_v12  ;;  %2533 = vperm.xlu0 %5453, %v6188_v21   ;;  %v2236_v36 = vld [vmem:[%s5632_s17 + $0xc1] sm:$0xff] }
 0x232   : > { %v1994_v0 = vpop.permute.xlu2 %1993  ;;  %v2299_v1 = vpop.permute.xlu1 %2298 }
 0x233   : > { %v2110_v48 = vmul.f32 %v6296_v33, %v1994_v0  ;;  %v2399_v2 = vmul.f32 %v6353_v31, %v2299_v1  ;;  %v2294_v50 = vpop.permute.xlu0 %2293 }
 0x234   : > { %v2398_v54 = vmul.f32 %v6353_v31, %v2294_v50 }
 0x235   : > { %v2166_v23 = vadd.f32 %v2138_v53, %v2110_v48  ;;  %v2455_v56 = vadd.f32 %v2427_v51, %v2399_v2  ;;  %v2430_v51 = vld [vmem:[#allocation2 + $0x68] sm:$0xff] }
 0x236   : > { %v2454_v16 = vadd.f32 %v2426_v61, %v2398_v54 }
 0x237   : > { %2194 = vst.msk [vmem:[#allocation2 + $0x30] sm:$0xff] %vm476_vm0, %v2166_v23 }
 0x238   : > { %2483 = vst.msk [vmem:[#allocation2 + $0x50] sm:$0xff] %vm476_vm0, %v2455_v56  ;;  %2563 = vperm.xlu2 %5455, %v2507_v35   ;;  %2618 = vperm.xlu1 %5454, %v6316_v30   ;;  %v2221_v30 = vld [vmem:[%s5632_s17 + $0x49] sm:$0xff]  ;;  %v2139_v56 = vld [vmem:[#allocation2 + $0x38] sm:$0xff] }
 0x239   : > { %2482 = vst.msk [vmem:[#allocation2 + $0x48] sm:$0xff] %vm476_vm0, %v2454_v16  ;;  %2548 = vperm.xlu0 %5453, %v6319_v55   ;;  %v6416_v55 = vld [vmem:[%s7543_s1 + $0x8] ss:$0 sm:$0xff] }
 0x23a   : > { %v2319_v21 = vpop.permute.xlu2 %2318  ;;  %v1769_v24 = vpop.permute.xlu1 %1768  ;;  %v2521_v16 = vld [vmem:[%s5632_s17 + $0xc2] sm:$0xff] }
 0x23b   : > { %v2403_v42 = vmul.f32 %v6353_v31, %v2319_v21  ;;  %v1837_v6 = vmul.f32 %v6268_v25, %v1769_v24  ;;  %v1699_v14 = vpop.permute.xlu0 %1698 }
 0x23c   : > { %v1823_v5 = vmul.f32 %v6268_v25, %v1699_v14 }
 0x23d   : > { %v2459_v28 = vadd.f32 %v2431_v15, %v2403_v42  ;;  %v1893_v60 = vadd.f32 %v1865_v47, %v1837_v6 }
 0x23e   : > { %v1879_v40 = vadd.f32 %v1851_v29, %v1823_v5 }
 0x23f   : > { %2487 = vst.msk [vmem:[#allocation2 + $0x70] sm:$0xff] %vm476_vm0, %v2459_v28  ;;  %v2433_v28 = vld [vmem:[#allocation2 + $0x80] sm:$0xff] }
 0x240   : > { %1921 = vst.msk [vmem:[#allocation2 + $0x90] sm:$0xff] %vm476_vm0, %v1893_v60  ;;  %2273 = vperm.xlu2 %5455, %v2221_v30   ;;  %2063 = vperm.xlu1 %5454, %v1951_v26   ;;  %v2432_v26 = vld [vmem:[#allocation2 + $0x78] sm:$0xff] }
 0x241   : > { %1907 = vst.msk [vmem:[#allocation2 + $0x20] sm:$0xff] %vm476_vm0, %v1879_v40  ;;  %2568 = vperm.xlu0 %5453, %v2508_v8   ;;  %v1384_v40 = vld [vmem:[%s5632_s17 + $0xc9] sm:$0xff] }
 0x242   : > { %v2574_v41 = vpop.permute.xlu2 %2573  ;;  %v1974_v57 = vpop.permute.xlu1 %1973 }
 0x243   : > { %v2682_v62 = vmul.f32 %v6416_v55, %v2574_v41  ;;  %v2106_v22 = vmul.f32 %v6296_v33, %v1974_v57  ;;  %v1969_v32 = vpop.permute.xlu0 %1968 }
 0x244   : > { %v2105_v17 = vmul.f32 %v6296_v33, %v1969_v32 }
 0x245   : > { %v2738_v13 = vadd.f32 %v2710_v4, %v2682_v62  ;;  %v2162_v18 = vadd.f32 %v2134_v63, %v2106_v22  ;;  %v2712_v63 = vld [vmem:[#allocation2 + $0x50] sm:$0xff] }
 0x246   : > { %v2161_v49 = vadd.f32 %v2133_v46, %v2105_v17  ;;  %v2711_v17 = vld [vmem:[#allocation2 + $0x48] sm:$0xff] }
 0x247   : > { %2766 = vst.msk [vmem:[#allocation2 + $0x40] sm:$0xff] %vm476_vm0, %v2738_v13 }
 0x248   : > { %2190 = vst.msk [vmem:[#allocation2 + $0x10] sm:$0xff] %vm476_vm0, %v2162_v18  ;;  %2623 = vperm.xlu2 %5455, %v6372_v27   ;;  %2553 = vperm.xlu1 %5454, %v6200_v19   ;;  %v2713_v27 = vld [vmem:[#allocation2 + $0x58] sm:$0xff]  ;;  %v2136_v53 = vld [vmem:[#allocation2 + $0x20] sm:$0xff] }
 0x249   : > { %2189 = vst.msk [vmem:[#allocation2 + $0x8] sm:$0xff] %vm476_vm0, %v2161_v49  ;;  %2343 = vperm.xlu0 %5453, %v2235_v37   ;;  %v6465_v49 = vld [vmem:[%s5632_s17 + $0xca] sm:$0xff] }
 0x24a   : > { %v2589_v39 = vpop.permute.xlu2 %2588  ;;  %v2309_v43 = vpop.permute.xlu1 %2308 }
 0x24b   : > { %v2685_v11 = vmul.f32 %v6416_v55, %v2589_v39  ;;  %v2401_v52 = vmul.f32 %v6353_v31, %v2309_v43  ;;  %v2049_v10 = vpop.permute.xlu0 %2048  ;;  %v3058_v39 = vld [vmem:[%s7545_s3 + $0x8] sm:$0x3] }
 0x24c   : > { %v2121_v19 = vmul.f32 %v6296_v33, %v2049_v10  ;;  %5408 = vmatpush.msk.msra.mxu2 %vm3113_vm2, %v3058_v39  ;;  %5409 = vmatpush.msk.msra.mxu3 %vm3113_vm2, %v3058_v39 }
 0x24d   : > { %v2741_v20 = vadd.f32 %v2713_v27, %v2685_v11  ;;  %v2457_v38 = vadd.f32 %v2429_v34, %v2401_v52  ;;  %v1952_v11 = vld [vmem:[%s5632_s17 + $0xc8] sm:$0xff]  ;;  %v3057_v52 = vld [vmem:[%s7545_s3] sm:$0xff]  ;;  %5200 = vmatpush.msk.msra.mxu0 %vm3113_vm2, %v3058_v39  ;;  %5407 = vmatpush.msk.msra.mxu1 %vm3113_vm2, %v3058_v39 }
 0x24e   : > { %v2794_v58 = vld [vmem:[#allocation2 + $0x40] sm:$0xff]  ;;  %v2177_v45 = vadd.f32 %v2149_v59, %v2121_v19  ;;  %5411 = vmatpush.msra.mxu2 %v3057_v52  ;;  %5412 = vmatpush.msra.mxu3 %v3057_v52  ;;  %v1866_v59 = vld [vmem:[#allocation2 + $0x98] sm:$0xff] }
 0x24f   : > { %v2826_v7 = vadd.f32 %v6432_v44, %v2794_v58  ;;  %2769 = vst.msk [vmem:[#allocation2 + $0x58] sm:$0xff] %vm476_vm0, %v2741_v20  ;;  %3132 = vmatpush.msra.mxu0 %v3057_v52  ;;  %5410 = vmatpush.msra.mxu1 %v3057_v52 }
 0x250   : > { %2485 = vst.msk [vmem:[#allocation2 + $0x60] sm:$0xff] %vm476_vm0, %v2457_v38  ;;  %2628 = vperm.xlu2 %5455, %v2520_v3   ;;  %2558 = vperm.xlu1 %5454, %v6217_v9   ;;  %v2418_v5 = vld [vmem:[#allocation2 + $0x8] sm:$0xff] }
 0x251   : > { %v2854_v12 = vmax.f32 %v2826_v7, 0.0  ;;  %2205 = vst.msk [vmem:[#allocation2 + $0x88] sm:$0xff] %vm476_vm0, %v2177_v45  ;;  %2348 = vperm.xlu0 %5453, %v2236_v36   ;;  %v1670_v7 = vld [vmem:[%s5632_s17 + $0xd2] sm:$0xff] }
 0x252   : > { %v1984_v0 = vpop.permute.xlu2 %1983  ;;  %v2314_v1 = vpop.permute.xlu1 %2313 }
 0x253   : > { %2882 = vst.msk [vmem:[#allocation2 + $0x40] sm:$0xff] %vm476_vm0, %v2854_v12  ;;  %v2108_v48 = vmul.f32 %v6296_v33, %v1984_v0  ;;  %v2402_v2 = vmul.f32 %v6353_v31, %v2314_v1  ;;  %v1999_v50 = vpop.permute.xlu0 %1998  ;;  %v1953_v0 = vld [vmem:[%s5632_s17 + $0xd0] sm:$0xff] }
 0x254   : > { %v2111_v54 = vmul.f32 %v6296_v33, %v1999_v50 }
 0x255   : > { %v2164_v23 = vadd.f32 %v2136_v53, %v2108_v48  ;;  %v2458_v9 = vadd.f32 %v2430_v51, %v2402_v2 }
 0x256   : > { %v2797_v61 = vld [vmem:[#allocation2 + $0x58] sm:$0xff]  ;;  %v2167_v35 = vadd.f32 %v2139_v56, %v2111_v54 }
 0x257   : > { %v2829_v21 = vadd.f32 %v6432_v44, %v2797_v61  ;;  %2192 = vst.msk [vmem:[#allocation2 + $0x20] sm:$0xff] %vm476_vm0, %v2164_v23 }
 0x258   : > { %2486 = vst.msk [vmem:[#allocation2 + $0x68] sm:$0xff] %vm476_vm0, %v2458_v9  ;;  %1503 = vperm.xlu2 %5455, %v2236_v36   ;;  %1498 = vperm.xlu1 %5454, %v2235_v37   ;;  %v2434_v4 = vld [vmem:[#allocation2 + $0x88] sm:$0xff]  ;;  %v6468_v37 = vld [vmem:[%s5632_s17 + $0xd1] sm:$0xff] }
 0x259   : > { %v2857_v24 = vmax.f32 %v2829_v21, 0.0  ;;  %2195 = vst.msk [vmem:[#allocation2 + $0x38] sm:$0xff] %vm476_vm0, %v2167_v35  ;;  %2633 = vperm.xlu0 %5453, %v2521_v16   ;;  %v1852_v36 = vld [vmem:[#allocation2 + $0x28] sm:$0xff]  ;;  %v2417_v35 = vld [vmem:[#allocation2] sm:$0xff] }
 0x25a   : > { %v2254_v42 = vpop.permute.xlu2 %2253  ;;  %v2329_v6 = vpop.permute.xlu1 %2328 }
 0x25b   : > { %2885 = vst.msk [vmem:[#allocation2 + $0x58] sm:$0xff] %vm476_vm0, %v2857_v24  ;;  %v2390_v14 = vmul.f32 %v6353_v31, %v2254_v42  ;;  %v2405_v15 = vmul.f32 %v6353_v31, %v2329_v6  ;;  %v2324_v47 = vpop.permute.xlu0 %2323  ;;  %v2150_v42 = vld [vmem:[#allocation2 + $0x90] sm:$0xff] }
 0x25c   : > { %v2404_v60 = vmul.f32 %v6353_v31, %v2324_v47 }
 0x25d   : > { %v2446_v29 = vadd.f32 %v2418_v5, %v2390_v14  ;;  %v2461_v30 = vadd.f32 %v2433_v28, %v2405_v15  ;;  %v1954_v14 = vld [vmem:[%s5632_s17 + $0xd8] sm:$0xff] }
 0x25e   : > { %v2460_v8 = vadd.f32 %v2432_v26, %v2404_v60  ;;  %v2420_v60 = vld [vmem:[#allocation2 + $0x18] sm:$0xff] }
 0x25f   : > { %2474 = vst.msk [vmem:[#allocation2 + $0x8] sm:$0xff] %vm476_vm0, %v2446_v29 }
 0x260   : > { %2489 = vst.msk [vmem:[#allocation2 + $0x80] sm:$0xff] %vm476_vm0, %v2461_v30  ;;  %1788 = vperm.xlu2 %5455, %v2521_v16   ;;  %1508 = vperm.xlu1 %5454, %v1384_v40   ;;  %v2424_v38 = vld [vmem:[#allocation2 + $0x38] sm:$0xff] }
 0x261   : > { %2488 = vst.msk [vmem:[#allocation2 + $0x78] sm:$0xff] %vm476_vm0, %v2460_v8  ;;  %1783 = vperm.xlu0 %5453, %v2520_v3  }
 0x262   : > { %v2334_v41 = vpop.permute.xlu2 %2333  ;;  %v2584_v57 = vpop.permute.xlu1 %2583 }
 0x263   : > { %v2406_v62 = vmul.f32 %v6353_v31, %v2334_v41  ;;  %v2684_v22 = vmul.f32 %v6416_v55, %v2584_v57  ;;  %v2579_v32 = vpop.permute.xlu0 %2578  ;;  %v2910_v41 = vld [vmem:[#allocation2 + $0x40] sm:$0xff] }
 0x264   : > { %v2683_v13 = vmul.f32 %v6416_v55, %v2579_v32 }
 0x265   : > { %v2462_v18 = vadd.f32 %v2434_v4, %v2406_v62  ;;  %v2740_v46 = vadd.f32 %v2712_v63, %v2684_v22  ;;  %v2419_v4 = vld [vmem:[#allocation2 + $0x10] sm:$0xff]  ;;  %v2239_v63 = vld [vmem:[%s5632_s17 + $0xd9] sm:$0xff] }
 0x266   : > { %v2739_v43 = vadd.f32 %v2711_v17, %v2683_v13 }
 0x267   : > { %2490 = vst.msk [vmem:[#allocation2 + $0x88] sm:$0xff] %vm476_vm0, %v2462_v18 }
 0x268   : > { %2768 = vst.msk [vmem:[#allocation2 + $0x50] sm:$0xff] %vm476_vm0, %v2740_v46  ;;  %1793 = vperm.xlu2 %5455, %v6465_v49   ;;  %1513 = vperm.xlu1 %5454, %v6468_v37   ;;  %v2717_v61 = vld [vmem:[#allocation2 + $0x78] sm:$0xff]  ;;  %v1955_v46 = vld [vmem:[%s5632_s17 + $0xe0] sm:$0xff] }
 0x269   : > { %2767 = vst.msk [vmem:[#allocation2 + $0x48] sm:$0xff] %vm476_vm0, %v2739_v43  ;;  %2068 = vperm.xlu0 %5453, %v1952_v11  }
 0x26a   : > { %v2284_v10 = vpop.permute.xlu2 %2283  ;;  %v1774_v27 = vpop.permute.xlu1 %1773 }
 0x26b   : > { %v2396_v34 = vmul.f32 %v6353_v31, %v2284_v10  ;;  %v1838_v19 = vmul.f32 %v6268_v25, %v1774_v27  ;;  %v1704_v20 = vpop.permute.xlu0 %1703 }
 0x26c   : > { %v1824_v3 = vmul.f32 %v6268_v25, %v1704_v20 }
 0x26d   : > { %v2452_v58 = vadd.f32 %v2424_v38, %v2396_v34  ;;  %v1894_v45 = vadd.f32 %v1866_v59, %v1838_v19  ;;  %v2423_v19 = vld [vmem:[#allocation2 + $0x30] sm:$0xff] }
 0x26e   : > { %v1880_v12 = vadd.f32 %v1852_v36, %v1824_v3  ;;  %v2714_v3 = vld [vmem:[#allocation2 + $0x60] sm:$0xff] }
 0x26f   : > { %v2796_v1 = vld [vmem:[#allocation2 + $0x50] sm:$0xff]  ;;  %2480 = vst.msk [vmem:[#allocation2 + $0x38] sm:$0xff] %vm476_vm0, %v2452_v58  ;;  %v6528_v58 = vld [vmem:[%s5632_s17 + $0xe2] sm:$0xff] }
 0x270   : > { %v2828_v48 = vadd.f32 %v6432_v44, %v2796_v1  ;;  %v2795_v2 = vld [vmem:[#allocation2 + $0x48] sm:$0xff]  ;;  %1922 = vst.msk [vmem:[#allocation2 + $0x98] sm:$0xff] %vm476_vm0, %v1894_v45  ;;  %1798 = vperm.xlu2 %5455, %v1670_v7   ;;  %2353 = vperm.xlu1 %5454, %v1384_v40   ;;  %v2524_v45 = vld [vmem:[%s5632_s17 + $0xda] sm:$0xff] }
 0x271   : > { %v2827_v50 = vadd.f32 %v6432_v44, %v2795_v2  ;;  %1908 = vst.msk [vmem:[#allocation2 + $0x28] sm:$0xff] %vm476_vm0, %v1880_v12  ;;  %2073 = vperm.xlu0 %5453, %v1953_v0  }
 0x272   : > { %v2856_v25 = vmax.f32 %v2828_v48, 0.0  ;;  %v2609_v53 = vpop.permute.xlu2 %2608  ;;  %v2249_v51 = vpop.permute.xlu1 %2248 }
 0x273   : > { %v2855_v54 = vmax.f32 %v2827_v50, 0.0  ;;  %v2689_v23 = vmul.f32 %v6416_v55, %v2609_v53  ;;  %v2389_v9 = vmul.f32 %v6353_v31, %v2249_v51  ;;  %v2054_v56 = vpop.permute.xlu0 %2053  ;;  %v2716_v53 = vld [vmem:[#allocation2 + $0x70] sm:$0xff] }
 0x274   : > { %2884 = vst.msk [vmem:[#allocation2 + $0x50] sm:$0xff] %vm476_vm0, %v2856_v25  ;;  %v2122_v16 = vmul.f32 %v6296_v33, %v2054_v56  ;;  %v1956_v56 = vld [vmem:[%s5632_s17 + $0xe8] sm:$0xff] }
 0x275   : > { %2883 = vst.msk [vmem:[#allocation2 + $0x48] sm:$0xff] %vm476_vm0, %v2855_v54  ;;  %v2745_v21 = vadd.f32 %v2717_v61, %v2689_v23  ;;  %v2445_v24 = vadd.f32 %v2417_v35, %v2389_v9  ;;  %v2715_v9 = vld [vmem:[#allocation2 + $0x68] sm:$0xff] }
 0x276   : > { %v2178_v6 = vadd.f32 %v2150_v42, %v2122_v16 }
 0x277   : > { %2773 = vst.msk [vmem:[#allocation2 + $0x78] sm:$0xff] %vm476_vm0, %v2745_v21 }
 0x278   : > { %2473 = vst.msk [vmem:[#allocation2] sm:$0xff] %vm476_vm0, %v2445_v24  ;;  %2638 = vperm.xlu2 %5455, %v6465_v49   ;;  %2358 = vperm.xlu1 %5454, %v6468_v37   ;;  %v2137_v40 = vld [vmem:[#allocation2 + $0x28] sm:$0xff] }
 0x279   : > { %2206 = vst.msk [vmem:[#allocation2 + $0x90] sm:$0xff] %vm476_vm0, %v2178_v6  ;;  %2078 = vperm.xlu0 %5453, %v1954_v14   ;;  %v6549_v14 = vld [vmem:[%s7543_s1 + $0x5] ss:$0 sm:$0xff] }
 0x27a   : > { %v1989_v15 = vpop.permute.xlu2 %1988  ;;  %v2264_v47 = vpop.permute.xlu1 %2263 }
 0x27b   : > { %v2109_v5 = vmul.f32 %v6296_v33, %v1989_v15  ;;  %v2392_v28 = vmul.f32 %v6353_v31, %v2264_v47  ;;  %v2259_v29 = vpop.permute.xlu0 %2258  ;;  %v2912_v30 = vld [vmem:[#allocation2 + $0x50] sm:$0xff] }
 0x27c   : > { %v2940_v26 = vld [vmem:[#allocation2 + $0x51] sm:$0xff]  ;;  %v2391_v8 = vmul.f32 %v6353_v31, %v2259_v29  ;;  %v2938_v57 = vld [vmem:[#allocation2 + $0x41] sm:$0xff] }
 0x27d   : > { %v6510_v62 = vmax.f32 %v2912_v30, %v2940_v26  ;;  %v2165_v22 = vadd.f32 %v2137_v40, %v2109_v5  ;;  %v2448_v32 = vadd.f32 %v2420_v60, %v2392_v28  ;;  %v6513_v17 = vmax.f32 %v2910_v41, %v2938_v57  ;;  %v1867_v28 = vld [vmem:[#allocation2 + $0xa0] sm:$0xff]  ;;  %v2526_v40 = vld [vmem:[%s5632_s17 + $0xea] sm:$0xff] }
 0x27e   : > { %v2801_v13 = vld [vmem:[#allocation2 + $0x78] sm:$0xff]  ;;  %v2447_v18 = vadd.f32 %v2419_v4, %v2391_v8  ;;  %v2718_v26 = vld [vmem:[#allocation2 + $0x80] sm:$0xff]  ;;  %v2241_v57 = vld [vmem:[%s5632_s17 + $0xe9] sm:$0xff] }
 0x27f   : > { %v2833_v49 = vadd.f32 %v6432_v44, %v2801_v13  ;;  %2193 = vst.msk [vmem:[#allocation2 + $0x28] sm:$0xff] %vm476_vm0, %v2165_v22  ;;  %v2994_v37 = vmax.f32 %v6513_v17, %v6510_v62 }
 0x280   : > { %2476 = vst.msk [vmem:[#allocation2 + $0x18] sm:$0xff] %vm476_vm0, %v2448_v32  ;;  %2643 = vperm.xlu2 %5455, %v1670_v7   ;;  %2363 = vperm.xlu1 %5454, %v2239_v63   ;;  %v2435_v34 = vld [vmem:[#allocation2 + $0x90] sm:$0xff]  ;;  %v2240_v7 = vld [vmem:[%s5632_s17 + $0xe1] sm:$0xff] }
 0x281   : > { %v2861_v39 = vmax.f32 %v2833_v49, 0.0  ;;  %2475 = vst.msk [vmem:[#allocation2 + $0x10] sm:$0xff] %vm476_vm0, %v2447_v18  ;;  %2083 = vperm.xlu0 %5453, %v1955_v46  }
 0x282   : > { %v2339_v43 = vpop.permute.xlu2 %2338  ;;  %v2279_v11 = vpop.permute.xlu1 %2278  ;;  %3020 = vst.msk [vmem:[#allocation3 + $0x40] sm:$0xff] %vm476_vm0, %v2994_v37 }
 0x283   : > { %2889 = vst.msk [vmem:[#allocation2 + $0x78] sm:$0xff] %vm476_vm0, %v2861_v39  ;;  %v2407_v52 = vmul.f32 %v6353_v31, %v2339_v43  ;;  %v2395_v10 = vmul.f32 %v6353_v31, %v2279_v11  ;;  %v2594_v27 = vpop.permute.xlu0 %2593  ;;  %v2911_v39 = vld [vmem:[#allocation2 + $0x48] sm:$0xff] }
 0x284   : > { %v2686_v20 = vmul.f32 %v6416_v55, %v2594_v27  ;;  %v2939_v43 = vld [vmem:[#allocation2 + $0x49] sm:$0xff]  ;;  %v2421_v27 = vld [vmem:[#allocation2 + $0x20] sm:$0xff] }
 0x285   : > { %v2463_v38 = vadd.f32 %v2435_v34, %v2407_v52  ;;  %v2451_v59 = vadd.f32 %v2423_v19, %v2395_v10 }
 0x286   : > { %v2742_v36 = vadd.f32 %v2714_v3, %v2686_v20  ;;  %v2422_v19 = vld [vmem:[#allocation2 + $0x28] sm:$0xff] }
 0x287   : > { %2491 = vst.msk [vmem:[#allocation2 + $0x90] sm:$0xff] %vm476_vm0, %v2463_v38  ;;  %v2913_v38 = vld [vmem:[#allocation2 + $0x58] sm:$0xff] }
 0x288   : > { %2479 = vst.msk [vmem:[#allocation2 + $0x30] sm:$0xff] %vm476_vm0, %v2451_v59  ;;  %2653 = vperm.xlu2 %5455, %v6528_v58   ;;  %2648 = vperm.xlu1 %5454, %v2524_v45   ;;  %v2704_v25 = vld [vmem:[#allocation2 + $0x10] sm:$0xff] }
 0x289   : > { %2770 = vst.msk [vmem:[#allocation2 + $0x60] sm:$0xff] %vm476_vm0, %v2742_v36  ;;  %v3047_v12 = vld [vmem:[#allocation3 + $0x40] sm:$0xff]  ;;  %2368 = vperm.xlu0 %5453, %v2240_v7   ;;  %v2151_v36 = vld [vmem:[#allocation2 + $0x98] sm:$0xff] }
 0x28a   : > { %5209 = vmatmul.msk.f32.vlgmr.msra.gmra.mxu2 %vm476_vm0, %v3047_v12  ;;  %v2544_v0 = vpop.permute.xlu2 %2543  ;;  %v2604_v1 = vpop.permute.xlu1 %2603  ;;  %v6569_v12 = vmax.f32 %v2911_v39, %v2939_v43  ;;  %v2917_v39 = vld [vmem:[#allocation2 + $0x78] sm:$0xff] }
 0x28b   : > { %v2676_v48 = vmul.f32 %v6416_v55, %v2544_v0  ;;  %v2688_v2 = vmul.f32 %v6416_v55, %v2604_v1  ;;  %v2599_v50 = vpop.permute.xlu0 %2598 }
 0x28c   : > { %v2687_v51 = vmul.f32 %v6416_v55, %v2599_v50 }
 0x28d   : > { %v2732_v54 = vadd.f32 %v2704_v25, %v2676_v48  ;;  %v2744_v23 = vadd.f32 %v2716_v53, %v2688_v2  ;;  %v1388_v48 = vld [vmem:[%s5632_s17 + $0xe9] sm:$0x3f] }
 0x28e   : > { %v2743_v61 = vadd.f32 %v2715_v9, %v2687_v51  ;;  %v2703_v9 = vld [vmem:[#allocation2 + $0x8] sm:$0xff] }
 0x28f   : > { %2760 = vst.msk [vmem:[#allocation2 + $0x10] sm:$0xff] %vm476_vm0, %v2732_v54  ;;  %v2708_v5 = vld [vmem:[#allocation2 + $0x30] sm:$0xff] }
 0x290   : > { %v2798_v35 = vld [vmem:[#allocation2 + $0x60] sm:$0xff]  ;;  %2772 = vst.msk [vmem:[#allocation2 + $0x70] sm:$0xff] %vm476_vm0, %v2744_v23  ;;  %2088 = vperm.xlu2 %5455, %v1956_v56   ;;  %1803 = vperm.xlu1 %5454, %v2524_v45   ;;  %v2720_v54 = vld [vmem:[#allocation2 + $0x90] sm:$0xff] }
 0x291   : > { %v2830_v16 = vadd.f32 %v6432_v44, %v2798_v35  ;;  %2771 = vst.msk [vmem:[#allocation2 + $0x68] sm:$0xff] %vm476_vm0, %v2743_v61  ;;  %1518 = vperm.xlu0 %5453, %v2239_v63  }
 0x292   : > { %v2564_v21 = vpop.permute.xlu2 %2563  ;;  %v1779_v24 = vpop.permute.xlu1 %1778 }
 0x293   : > { %v2858_v42 = vmax.f32 %v2830_v16, 0.0  ;;  %v2680_v6 = vmul.f32 %v6416_v55, %v2564_v21  ;;  %v1839_v15 = vmul.f32 %v6549_v14, %v1779_v24  ;;  %v2614_v47 = vpop.permute.xlu0 %2613 }
 0x294   : > { %v2690_v60 = vmul.f32 %v6416_v55, %v2614_v47 }
 0x295   : > { %2886 = vst.msk [vmem:[#allocation2 + $0x60] sm:$0xff] %vm476_vm0, %v2858_v42  ;;  %v2736_v29 = vadd.f32 %v2708_v5, %v2680_v6  ;;  %v1895_v30 = vadd.f32 %v1867_v28, %v1839_v15 }
 0x296   : > { %v2788_v8 = vld [vmem:[#allocation2 + $0x10] sm:$0xff]  ;;  %v2746_v41 = vadd.f32 %v2718_v26, %v2690_v60  ;;  %v1958_v26 = vld [vmem:[%s5632_s17 + $0xf8] sm:$0x3f] }
 0x297   : > { %v2820_v22 = vadd.f32 %v6432_v44, %v2788_v8  ;;  %v2800_v32 = vld [vmem:[#allocation2 + $0x70] sm:$0xff]  ;;  %2764 = vst.msk [vmem:[#allocation2 + $0x30] sm:$0xff] %vm476_vm0, %v2736_v29  ;;  %v2702_v29 = vld [vmem:[#allocation2] sm:$0xff] }
 0x298   : > { %v2832_v4 = vadd.f32 %v6432_v44, %v2800_v32  ;;  %v2799_v63 = vld [vmem:[#allocation2 + $0x68] sm:$0xff]  ;;  %1923 = vst.msk [vmem:[#allocation2 + $0xa0] sm:$0xff] %vm476_vm0, %v1895_v30  ;;  %1523 = vperm.xlu2 %5455, %v2240_v7   ;;  %2658 = vperm.xlu1 %5454, %v2526_v40   ;;  %v2242_v30 = vld [vmem:[%s5632_s17 + $0xf1] sm:$0xff] }
 0x299   : > { %v2848_v13 = vmax.f32 %v2820_v22, 0.0  ;;  %v2831_v18 = vadd.f32 %v6432_v44, %v2799_v63  ;;  %2774 = vst.msk [vmem:[#allocation2 + $0x80] sm:$0xff] %vm476_vm0, %v2746_v41  ;;  %2373 = vperm.xlu0 %5453, %v2241_v57   ;;  %v1673_v7 = vld [vmem:[%s5632_s17 + $0xea] sm:$0x3f]  ;;  %v1957_v57 = vld [vmem:[%s5632_s17 + $0xf0] sm:$0xff] }
 0x29a   : > { %v2860_v46 = vmax.f32 %v2832_v4, 0.0  ;;  %v2274_v49 = vpop.permute.xlu2 %2273  ;;  %v2269_v37 = vpop.permute.xlu1 %2268 }
 0x29b   : > { %2876 = vst.msk [vmem:[#allocation2 + $0x10] sm:$0xff] %vm476_vm0, %v2848_v13  ;;  %v2859_v11 = vmax.f32 %v2831_v18, 0.0  ;;  %v2394_v52 = vmul.f32 %v6353_v31, %v2274_v49  ;;  %v2393_v10 = vmul.f32 %v6353_v31, %v2269_v37  ;;  %v2059_v34 = vpop.permute.xlu0 %2058  ;;  %v2719_v49 = vld [vmem:[#allocation2 + $0x88] sm:$0xff] }
 0x29c   : > { %2888 = vst.msk [vmem:[#allocation2 + $0x70] sm:$0xff] %vm476_vm0, %v2860_v46  ;;  %v2123_v20 = vmul.f32 %v6296_v33, %v2059_v34  ;;  %v2941_v59 = vld [vmem:[#allocation2 + $0x59] sm:$0xff] }
 0x29d   : > { %2887 = vst.msk [vmem:[#allocation2 + $0x68] sm:$0xff] %vm476_vm0, %v2859_v11  ;;  %v2450_v3 = vadd.f32 %v2422_v19, %v2394_v52  ;;  %v2449_v45 = vadd.f32 %v2421_v27, %v2393_v10  ;;  %v2969_v0 = vmax.f32 %v2913_v38, %v2941_v59  ;;  %v2914_v16 = vld [vmem:[#allocation2 + $0x60] sm:$0xff]  ;;  %v2705_v52 = vld [vmem:[#allocation2 + $0x18] sm:$0xff] }
 0x29e   : > { %v2792_v31 = vld [vmem:[#allocation2 + $0x30] sm:$0xff]  ;;  %v2179_v1 = vadd.f32 %v2151_v36, %v2123_v20  ;;  %v2528_v10 = vld [vmem:[%s5632_s17 + $0xfa] sm:$0x3f] }
 0x29f   : > { %v2824_v2 = vadd.f32 %v6432_v44, %v2792_v31  ;;  %2478 = vst.msk [vmem:[#allocation2 + $0x28] sm:$0xff] %vm476_vm0, %v2450_v3  ;;  %v2995_v33 = vmax.f32 %v6569_v12, %v2969_v0  ;;  %v2527_v27 = vld [vmem:[%s5632_s17 + $0xf2] sm:$0xff] }
 0x2a0   : > { %v2802_v50 = vld [vmem:[#allocation2 + $0x80] sm:$0xff]  ;;  %2477 = vst.msk [vmem:[#allocation2 + $0x20] sm:$0xff] %vm476_vm0, %v2449_v45  ;;  %1813 = vperm.xlu2 %5455, %v1673_v7   ;;  %1808 = vperm.xlu1 %5454, %v6528_v58   ;;  %v2243_v38 = vld [vmem:[%s5632_s17 + $0xf9] sm:$0x3f] }
 0x2a1   : > { %v2852_v25 = vmax.f32 %v2824_v2, 0.0  ;;  %v2834_v53 = vadd.f32 %v6432_v44, %v2802_v50  ;;  %2207 = vst.msk [vmem:[#allocation2 + $0x98] sm:$0xff] %vm476_vm0, %v2179_v1  ;;  %1528 = vperm.xlu0 %5453, %v1388_v48  }
 0x2a2   : > { %v2624_v51 = vpop.permute.xlu2 %2623  ;;  %v2539_v23 = vpop.permute.xlu1 %2538  ;;  %3021 = vst.msk [vmem:[#allocation3 + $0x48] sm:$0xff] %vm476_vm0, %v2995_v33 }
 0x2a3   : > { %2880 = vst.msk [vmem:[#allocation2 + $0x30] sm:$0xff] %vm476_vm0, %v2852_v25  ;;  %v2862_v56 = vmax.f32 %v2834_v53, 0.0  ;;  %v2692_v61 = vmul.f32 %v6416_v55, %v2624_v51  ;;  %v2675_v58 = vmul.f32 %v6416_v55, %v2539_v23  ;;  %v2534_v35 = vpop.permute.xlu0 %2533  ;;  %v2916_v21 = vld [vmem:[#allocation2 + $0x70] sm:$0xff]  ;;  %v6626_v25 = vld [vmem:[%s7543_s1 + $0x4] ss:$0 sm:$0xff] }
 0x2a4   : > { %v2944_v24 = vld [vmem:[#allocation2 + $0x71] sm:$0xff]  ;;  %v2674_v42 = vmul.f32 %v6416_v55, %v2534_v35  ;;  %v2942_v6 = vld [vmem:[#allocation2 + $0x61] sm:$0xff]  ;;  %v2943_v47 = vld [vmem:[#allocation2 + $0x69] sm:$0xff] }
 0x2a5   : > { %v2915_v15 = vld [vmem:[#allocation2 + $0x68] sm:$0xff]  ;;  %v6584_v5 = vmax.f32 %v2916_v21, %v2944_v24  ;;  %2890 = vst.msk [vmem:[#allocation2 + $0x80] sm:$0xff] %vm476_vm0, %v2862_v56  ;;  %v2748_v28 = vadd.f32 %v2720_v54, %v2692_v61  ;;  %v2731_v60 = vadd.f32 %v2703_v9, %v2675_v58  ;;  %v2970_v40 = vmax.f32 %v2914_v16, %v2942_v6  ;;  %v6632_v51 = vld [vmem:[%s7543_s1 + $0x6] ss:$0 sm:$0xff]  ;;  %v1584_v9 = vld [vmem:[#allocation2 + $0xb0] sm:$0xff] }
 0x2a6   : > { %v2971_v8 = vmax.f32 %v2915_v15, %v2943_v47  ;;  %v2730_v41 = vadd.f32 %v2702_v29, %v2674_v42  ;;  %v2152_v56 = vld [vmem:[#allocation2 + $0xa0] sm:$0xff]  ;;  %v2709_v16 = vld [vmem:[#allocation2 + $0x38] sm:$0xff]  ;;  %v5241_v42 = vld [vmem:[%s7545_s3 + $0x28] sm:$0x3] }
 0x2a7   : > { %2776 = vst.msk [vmem:[#allocation2 + $0x90] sm:$0xff] %vm476_vm0, %v2748_v28  ;;  %v2996_v22 = vmax.f32 %v6510_v62, %v2970_v40  ;;  %v2998_v4 = vmax.f32 %v2970_v40, %v6584_v5  ;;  %5242 = vmatpush.msk.msrb.mxu2 %vm3113_vm2, %v5241_v42 }
 0x2a8   : > { %v2997_v32 = vmax.f32 %v2969_v0, %v2971_v8  ;;  %2759 = vst.msk [vmem:[#allocation2 + $0x8] sm:$0xff] %vm476_vm0, %v2731_v60  ;;  %2378 = vperm.xlu2 %5455, %v2242_v30   ;;  %2098 = vperm.xlu1 %5454, %v1958_v26  }
 0x2a9   : > { %2758 = vst.msk [vmem:[#allocation2] sm:$0xff] %vm476_vm0, %v2730_v41  ;;  %v6595_v63 = vld [vmem:[#allocation3 + $0x48] sm:$0xff]  ;;  %2093 = vperm.xlu0 %5453, %v1957_v57   ;;  %v2706_v57 = vld [vmem:[#allocation2 + $0x20] sm:$0xff] }
 0x2aa   : > { %5210 = vmatmul.msk.f32.gmra.mxu2 %vm476_vm0, %v6595_v63  ;;  %v6599_v13 = vpop.permute.xlu2 %2628  ;;  %v2619_v62 = vpop.permute.xlu1 %2618  ;;  %3022 = vst.msk [vmem:[#allocation3 + $0x50] sm:$0xff] %vm476_vm0, %v2996_v22  ;;  %v6661_v22 = vld [vmem:[%s7543_s1 + $0x7] ss:$0 sm:$0xff] }
 0x2ab   : > { %v2691_v18 = vmul.f32 %v6416_v55, %v2619_v62  ;;  %v2549_v46 = vpop.permute.xlu0 %2548  ;;  %3023 = vst.msk [vmem:[#allocation3 + $0x58] sm:$0xff] %vm476_vm0, %v2997_v32 }
 0x2ac   : > { %v2677_v37 = vmul.f32 %v6416_v55, %v2549_v46  ;;  %v2945_v43 = vld [vmem:[#allocation2 + $0x79] sm:$0xff]  ;;  %3024 = vst.msk [vmem:[#allocation3 + $0x60] sm:$0xff] %vm476_vm0, %v2998_v4 }
 0x2ad   : > { %v2747_v11 = vadd.f32 %v2719_v49, %v2691_v18  ;;  %v6608_v34 = vmax.f32 %v2917_v39, %v2945_v43  ;;  %v2436_v18 = vld [vmem:[#allocation2 + $0x98] sm:$0xff]  ;;  %v5283_v39 = vld [vmem:[%s7545_s3 + $0x48] sm:$0x3] }
 0x2ae   : > { %v2804_v19 = vld [vmem:[#allocation2 + $0x90] sm:$0xff]  ;;  %v2733_v20 = vadd.f32 %v2705_v52, %v2677_v37  ;;  %v5262_v37 = vld [vmem:[%s7545_s3 + $0x38] sm:$0x3]  ;;  %5284 = vmatpush.msk.msrb.mxu0 %vm3113_vm2, %v5283_v39 }
 0x2af   : > { %v2836_v59 = vadd.f32 %v6432_v44, %v2804_v19  ;;  %v2787_v3 = vld [vmem:[#allocation2 + $0x8] sm:$0xff]  ;;  %2775 = vst.msk [vmem:[#allocation2 + $0x88] sm:$0xff] %vm476_vm0, %v2747_v11  ;;  %v2999_v45 = vmax.f32 %v2971_v8, %v6608_v34  ;;  %5263 = vmatpush.msk.msrb.mxu3 %vm3113_vm2, %v5262_v37 }
 0x2b0   : > { %v2819_v36 = vadd.f32 %v6432_v44, %v2787_v3  ;;  %v2786_v7 = vld [vmem:[#allocation2] sm:$0xff]  ;;  %2761 = vst.msk [vmem:[#allocation2 + $0x18] sm:$0xff] %vm476_vm0, %v2733_v20  ;;  %2668 = vperm.xlu2 %5455, %v2528_v10   ;;  %2663 = vperm.xlu1 %5454, %v2527_v27   ;;  %v2904_v20 = vld [vmem:[#allocation2 + $0x10] sm:$0xff] }
 0x2b1   : > { %v2864_v0 = vmax.f32 %v2836_v59, 0.0  ;;  %v2818_v31 = vadd.f32 %v6432_v44, %v2786_v7  ;;  %v6617_v1 = vld [vmem:[#allocation3 + $0x50] sm:$0xff]  ;;  %2383 = vperm.xlu0 %5453, %v2243_v38   ;;  %3025 = vst.msk [vmem:[#allocation3 + $0x68] sm:$0xff] %vm476_vm0, %v2999_v45  ;;  %v2918_v38 = vld [vmem:[#allocation2 + $0x80] sm:$0xff] }
 0x2b2   : > { %v2847_v48 = vmax.f32 %v2819_v36, 0.0  ;;  %5211 = vmatmul.msk.f32.gmra.mxu2 %vm476_vm0, %v6617_v1  ;;  %v1504_v2 = vpop.permute.xlu2 %1503  ;;  %v2064_v33 = vpop.permute.xlu1 %2063  ;;  %v6649_v29 = vld [vmem:[#allocation3 + $0x58] sm:$0xff] }
 0x2b3   : > { %2892 = vst.msk [vmem:[#allocation2 + $0x90] sm:$0xff] %vm476_vm0, %v2864_v0  ;;  %v2846_v50 = vmax.f32 %v2818_v31, 0.0  ;;  %v1556_v53 = vmul.f32 %v6626_v25, %v1504_v2  ;;  %v2124_v54 = vmul.f32 %v6632_v51, %v2064_v33  ;;  %v2569_v23 = vpop.permute.xlu0 %2568  ;;  %v6677_v19 = vld [vmem:[#allocation3 + $0x60] sm:$0xff] }
 0x2b4   : > { %2875 = vst.msk [vmem:[#allocation2 + $0x8] sm:$0xff] %vm476_vm0, %v2847_v48  ;;  %v2681_v61 = vmul.f32 %v6416_v55, %v2569_v23 }
 0x2b5   : > { %2874 = vst.msk [vmem:[#allocation2] sm:$0xff] %vm476_vm0, %v2846_v50  ;;  %v1612_v58 = vadd.f32 %v1584_v9, %v1556_v53  ;;  %v2180_v35 = vadd.f32 %v2152_v56, %v2124_v54  ;;  %v5220_v50 = vld [vmem:[%s7545_s3 + $0x18] sm:$0x3]  ;;  %v5240_v53 = vld [vmem:[%s7545_s3 + $0x20] sm:$0xff]  ;;  %v2707_v54 = vld [vmem:[#allocation2 + $0x28] sm:$0xff] }
 0x2b6   : > { %v2803_v21 = vld [vmem:[#allocation2 + $0x88] sm:$0xff]  ;;  %v2737_v24 = vadd.f32 %v2709_v16, %v2681_v61  ;;  %5221 = vmatpush.msk.msrb.mxu1 %vm3113_vm2, %v5220_v50  ;;  %3504 = vmatpush.msrb.mxu2 %v5240_v53  ;;  %v2693_v16 = vmul.f32 %v6416_v55, %v6599_v13 }
 0x2b7   : > { %v2835_v6 = vadd.f32 %v6432_v44, %v2803_v21  ;;  %v2789_v15 = vld [vmem:[#allocation2 + $0x18] sm:$0xff]  ;;  %1640 = vst.msk [vmem:[#allocation2 + $0xb0] sm:$0xff] %vm476_vm0, %v1612_v58 }
 0x2b8   : > { %v2821_v47 = vadd.f32 %v6432_v44, %v2789_v15  ;;  %2208 = vst.msk [vmem:[#allocation2 + $0xa0] sm:$0xff] %vm476_vm0, %v2180_v35  ;;  %v6646_v28 = vld [vmem:[#allocation3 + $0x68] sm:$0xff] }
 0x2b9   : > { %v2863_v60 = vmax.f32 %v2835_v6, 0.0  ;;  %2765 = vst.msk [vmem:[#allocation2 + $0x38] sm:$0xff] %vm476_vm0, %v2737_v24  ;;  %5214 = vmatmul.msk.f32.vlgmr.msra.gmra.mxu3 %vm476_vm0, %v6646_v28 }
 0x2ba   : > { %v2849_v30 = vmax.f32 %v2821_v47, 0.0  ;;  %5212 = vmatmul.msk.f32.gmra.mxu2 %vm476_vm0, %v6649_v29  ;;  %v1789_v26 = vpop.permute.xlu2 %1788  ;;  %v2554_v40 = vpop.permute.xlu1 %2553 }
 0x2bb   : > { %2891 = vst.msk [vmem:[#allocation2 + $0x88] sm:$0xff] %vm476_vm0, %v2863_v60  ;;  %v2678_v8 = vmul.f32 %v6416_v55, %v2554_v40  ;;  %v2344_v41 = vpop.permute.xlu0 %2343  ;;  %v1841_v4 = vmul.f32 %v6549_v14, %v1789_v26 }
 0x2bc   : > { %2877 = vst.msk [vmem:[#allocation2 + $0x18] sm:$0xff] %vm476_vm0, %v2849_v30  ;;  %v2408_v32 = vmul.f32 %v6661_v22, %v2344_v41  ;;  %v2902_v52 = vld [vmem:[#allocation2] sm:$0xff]  ;;  %v1583_v41 = vld [vmem:[#allocation2 + $0xa8] sm:$0xff] }
 0x2bd   : > { %v2734_v62 = vadd.f32 %v2706_v57, %v2678_v8  ;;  %v2930_v10 = vld [vmem:[#allocation2 + $0x1] sm:$0xff] }
 0x2be   : > { %v1869_v46 = vld [vmem:[#allocation2 + $0xb0] sm:$0xff]  ;;  %v2464_v49 = vadd.f32 %v2436_v18, %v2408_v32  ;;  %v2958_v33 = vmax.f32 %v2902_v52, %v2930_v10 }
 0x2bf   : > { %v1897_v43 = vadd.f32 %v1869_v46, %v1841_v4  ;;  %2762 = vst.msk [vmem:[#allocation2 + $0x20] sm:$0xff] %vm476_vm0, %v2734_v62  ;;  %v2437_v58 = vld [vmem:[#allocation2 + $0xa0] sm:$0xff]  ;;  %v2908_v32 = vld [vmem:[#allocation2 + $0x30] sm:$0xff] }
 0x2c0   : > { %v2793_v11 = vld [vmem:[#allocation2 + $0x38] sm:$0xff]  ;;  %2492 = vst.msk [vmem:[#allocation2 + $0x98] sm:$0xff] %vm476_vm0, %v2464_v49 }
 0x2c1   : > { %v2825_v27 = vadd.f32 %v6432_v44, %v2793_v11  ;;  %1925 = vst.msk [vmem:[#allocation2 + $0xb0] sm:$0xff] %vm476_vm0, %v1897_v43 }
 0x2c2   : > { %5213 = vmatmul.msk.f32.gmra.mxu2 %vm476_vm0, %v6677_v19  ;;  %v6681_v59 = vpop.permute.xlu2 %1793  ;;  %v2559_v3 = vpop.permute.xlu1 %2558  ;;  %v2946_v45 = vld [vmem:[#allocation2 + $0x81] sm:$0xff]  ;;  %v2947_v7 = vld [vmem:[#allocation2 + $0x89] sm:$0xff] }
 0x2c3   : > { %v2919_v36 = vld [vmem:[#allocation2 + $0x88] sm:$0xff]  ;;  %v2853_v0 = vmax.f32 %v2825_v27, 0.0  ;;  %v2679_v31 = vmul.f32 %v6416_v55, %v2559_v3  ;;  %v2349_v48 = vpop.permute.xlu0 %2348  ;;  %v2932_v2 = vld [vmem:[#allocation2 + $0x11] sm:$0xff]  ;;  %v6693_v56 = vmax.f32 %v2918_v38, %v2946_v45 }
 0x2c4   : > { %v2409_v23 = vmul.f32 %v6661_v22, %v2349_v48  ;;  %v6691_v9 = vmax.f32 %v2904_v20, %v2932_v2  ;;  %v6697_v35 = vmax.f32 %v2919_v36, %v2947_v7  ;;  %v2903_v20 = vld [vmem:[#allocation2 + $0x8] sm:$0xff] }
 0x2c5   : > { %2881 = vst.msk [vmem:[#allocation2 + $0x38] sm:$0xff] %vm476_vm0, %v2853_v0  ;;  %v2735_v61 = vadd.f32 %v2707_v54, %v2679_v31  ;;  %v3000_v60 = vmax.f32 %v6584_v5, %v6693_v56  ;;  %v5219_v5 = vld [vmem:[%s7545_s3 + $0x10] sm:$0xff]  ;;  %v2905_v0 = vld [vmem:[#allocation2 + $0x18] sm:$0xff] }
 0x2c6   : > { %v2790_v21 = vld [vmem:[#allocation2 + $0x20] sm:$0xff]  ;;  %v2465_v24 = vadd.f32 %v2437_v58, %v2409_v23  ;;  %v2986_v42 = vmax.f32 %v2958_v33, %v6691_v9  ;;  %v3001_v13 = vmax.f32 %v6608_v34, %v6697_v35  ;;  %3301 = vmatpush.msrb.mxu1 %v5219_v5  ;;  %v2931_v38 = vld [vmem:[#allocation2 + $0x9] sm:$0xff] }
 0x2c7   : > { %v2822_v6 = vadd.f32 %v6432_v44, %v2790_v21  ;;  %v2721_v15 = vld [vmem:[#allocation2 + $0x98] sm:$0xff]  ;;  %2763 = vst.msk [vmem:[#allocation2 + $0x28] sm:$0xff] %vm476_vm0, %v2735_v61  ;;  %v2959_v33 = vmax.f32 %v2903_v20, %v2931_v38 }
 0x2c8   : > { %v2749_v47 = vadd.f32 %v2721_v15, %v2693_v16  ;;  %2493 = vst.msk [vmem:[#allocation2 + $0xa0] sm:$0xff] %vm476_vm0, %v2465_v24 }
 0x2c9   : > { %v2850_v30 = vmax.f32 %v2822_v6, 0.0  ;;  %3012 = vst.msk [vmem:[#allocation3] sm:$0xff] %vm476_vm0, %v2986_v42  ;;  %v6759_v6 = vld [vmem:[%s7544_s2] ss:$0 sm:$0xff] }
 0x2ca   : > { %2777 = vst.msk [vmem:[#allocation2 + $0x98] sm:$0xff] %vm476_vm0, %v2749_v47  ;;  %v6711_v26 = vpop.permute.xlu2 %1798  ;;  %v1499_v40 = vpop.permute.xlu1 %1498 }
 0x2cb   : > { %2878 = vst.msk [vmem:[#allocation2 + $0x20] sm:$0xff] %vm476_vm0, %v2850_v30  ;;  %v1555_v8 = vmul.f32 %v6626_v25, %v1499_v40  ;;  %v2634_v57 = vpop.permute.xlu0 %2633 }
 0x2cc   : > { %3026 = vst.msk [vmem:[#allocation3 + $0x70] sm:$0xff] %vm476_vm0, %v3000_v60  ;;  %v2936_v4 = vld [vmem:[#allocation2 + $0x31] sm:$0xff]  ;;  %v2937_v62 = vld [vmem:[#allocation2 + $0x39] sm:$0xff]  ;;  %v2694_v39 = vmul.f32 %v6416_v55, %v2634_v57 }
 0x2cd   : > { %v2909_v34 = vld [vmem:[#allocation2 + $0x38] sm:$0xff]  ;;  %v1611_v18 = vadd.f32 %v1583_v41, %v1555_v8  ;;  %v6719_v46 = vmax.f32 %v2908_v32, %v2936_v4  ;;  %3027 = vst.msk [vmem:[#allocation3 + $0x78] sm:$0xff] %vm476_vm0, %v3001_v13  ;;  %v1586_v4 = vld [vmem:[#allocation2 + $0xc0] sm:$0xff] }
 0x2ce   : > { %v6722_v49 = vmax.f32 %v2909_v34, %v2937_v62  ;;  %v2791_v37 = vld [vmem:[#allocation2 + $0x28] sm:$0xff]  ;;  %v1842_v62 = vmul.f32 %v6549_v14, %v6681_v59 }
 0x2cf   : > { %v2823_v43 = vadd.f32 %v6432_v44, %v2791_v37  ;;  %1639 = vst.msk [vmem:[#allocation2 + $0xa8] sm:$0xff] %vm476_vm0, %v1611_v18  ;;  %v2722_v11 = vld [vmem:[#allocation2 + $0xa0] sm:$0xff]  ;;  %v2992_v52 = vmax.f32 %v6719_v46, %v6513_v17  ;;  %v5261_v37 = vld [vmem:[%s7545_s3 + $0x30] sm:$0xff] }
 0x2d0   : > { %v2750_v10 = vadd.f32 %v2722_v11, %v2694_v39  ;;  %v3039_v27 = vld [vmem:[#allocation3] sm:$0xff]  ;;  %v2993_v3 = vmax.f32 %v6722_v49, %v6569_v12  ;;  %3707 = vmatpush.msrb.mxu3 %v5261_v37 }
 0x2d1   : > { %v2805_v45 = vld [vmem:[#allocation2 + $0x98] sm:$0xff]  ;;  %v2851_v36 = vmax.f32 %v2823_v43, 0.0  ;;  %5201 = vmatmul.msk.f32.vlgmr.msra.gmra.mxu0 %vm476_vm0, %v3039_v27  ;;  %3018 = vst.msk [vmem:[#allocation3 + $0x30] sm:$0xff] %vm476_vm0, %v2992_v52  ;;  %v2920_v43 = vld [vmem:[#allocation2 + $0x90] sm:$0xff] }
 0x2d2   : > { %v2837_v55 = vadd.f32 %v6432_v44, %v2805_v45  ;;  %2778 = vst.msk [vmem:[#allocation2 + $0xa0] sm:$0xff] %vm476_vm0, %v2750_v10  ;;  %v6735_v7 = vpop.permute.xlu2 %2638  ;;  %v1509_v17 = vpop.permute.xlu1 %1508  ;;  %v2933_v31 = vld [vmem:[#allocation2 + $0x19] sm:$0xff] }
 0x2d3   : > { %2879 = vst.msk [vmem:[#allocation2 + $0x28] sm:$0xff] %vm476_vm0, %v2851_v36  ;;  %v6738_v48 = vld [vmem:[#allocation3 + $0x70] sm:$0xff]  ;;  %v1557_v12 = vmul.f32 %v6626_v25, %v1509_v17  ;;  %v1784_v2 = vpop.permute.xlu0 %1783  ;;  %v6741_v50 = vmax.f32 %v2905_v0, %v2933_v31  ;;  %v1585_v44 = vld [vmem:[#allocation2 + $0xb8] sm:$0xff]  ;;  %v2906_v42 = vld [vmem:[#allocation2 + $0x20] sm:$0xff] }
 0x2d4   : > { %v2865_v53 = vmax.f32 %v2837_v55, 0.0  ;;  %5215 = vmatmul.msk.f32.gmra.mxu3 %vm476_vm0, %v6738_v48  ;;  %3019 = vst.msk [vmem:[#allocation3 + $0x38] sm:$0xff] %vm476_vm0, %v2993_v3  ;;  %v1840_v23 = vmul.f32 %v6549_v14, %v1784_v2  ;;  %v6764_v8 = vld [vmem:[#allocation3 + $0x78] sm:$0xff] }
 0x2d5   : > { %v1613_v54 = vadd.f32 %v1585_v44, %v1557_v12  ;;  %v2987_v61 = vmax.f32 %v2959_v33, %v6741_v50  ;;  %v1843_v33 = vmul.f32 %v6549_v14, %v6711_v26  ;;  %v5304_v26 = vld [vmem:[%s7545_s3 + $0x58] sm:$0x3] }
 0x2d6   : > { %2893 = vst.msk [vmem:[#allocation2 + $0x98] sm:$0xff] %vm476_vm0, %v2865_v53  ;;  %v1868_v58 = vld [vmem:[#allocation2 + $0xa8] sm:$0xff] }
 0x2d7   : > { %1641 = vst.msk [vmem:[#allocation2 + $0xb8] sm:$0xff] %vm476_vm0, %v1613_v54  ;;  %v1896_v16 = vadd.f32 %v1868_v58, %v1840_v23 }
 0x2d8   : > { %v6750_v21 = vld [vmem:[#allocation3 + $0x30] sm:$0xff]  ;;  %3013 = vst.msk [vmem:[#allocation3 + $0x8] sm:$0xff] %vm476_vm0, %v2987_v61 }
 0x2d9   : > { %v2806_v24 = vld [vmem:[#allocation2 + $0xa0] sm:$0xff]  ;;  %1924 = vst.msk [vmem:[#allocation2 + $0xa8] sm:$0xff] %vm476_vm0, %v1896_v16  ;;  %5207 = vmatmul.msk.f32.vlgmr.msra.gmra.mxu1 %vm476_vm0, %v6750_v21 }
 0x2da   : > { %v2838_v15 = vadd.f32 %v6759_v6, %v2806_v24  ;;  %v6762_v47 = vpop.permute.xlu2 %2643  ;;  %v1514_v60 = vpop.permute.xlu1 %1513  ;;  %v2934_v30 = vld [vmem:[#allocation2 + $0x21] sm:$0xff]  ;;  %v2935_v40 = vld [vmem:[#allocation2 + $0x29] sm:$0xff]  ;;  %5305 = vmatpush.msk.msra.mxu1 %vm3113_vm2, %v5304_v26 }
 0x2db   : > { %v2907_v13 = vld [vmem:[#allocation2 + $0x28] sm:$0xff]  ;;  %v1558_v41 = vmul.f32 %v6626_v25, %v1514_v60  ;;  %v2069_v57 = vpop.permute.xlu0 %2068  ;;  %v2962_v32 = vmax.f32 %v2906_v42, %v2934_v30  ;;  %v6781_v45 = vld [vmem:[#allocation3 + $0x38] sm:$0xff]  ;;  %v5282_v30 = vld [vmem:[%s7545_s3 + $0x40] sm:$0xff] }
 0x2dc   : > { %v2866_v5 = vmax.f32 %v2838_v15, 0.0  ;;  %5216 = vmatmul.msk.f32.gmra.mxu3 %vm476_vm0, %v6764_v8  ;;  %v2963_v34 = vmax.f32 %v2907_v13, %v2935_v40  ;;  %v2125_v27 = vmul.f32 %v6632_v51, %v2069_v57  ;;  %v5325_v24 = vld [vmem:[%s7545_s3 + $0x68] sm:$0x3]  ;;  %v5346_v13 = vld [vmem:[%s7545_s3 + $0x78] sm:$0x3]  ;;  %3910 = vmatpush.msrb.mxu0 %v5282_v30 }
 0x2dd   : > { %v1614_v18 = vadd.f32 %v1586_v4, %v1558_v41  ;;  %v2988_v39 = vmax.f32 %v6691_v9, %v2962_v32  ;;  %v2948_v11 = vld [vmem:[#allocation2 + $0x91] sm:$0xff]  ;;  %v2990_v17 = vmax.f32 %v2962_v32, %v6719_v46  ;;  %5326 = vmatpush.msk.msra.mxu2 %vm3113_vm2, %v5325_v24  ;;  %5347 = vmatpush.msk.msra.mxu3 %vm3113_vm2, %v5346_v13 }
 0x2de   : > { %2894 = vst.msk [vmem:[#allocation2 + $0xa0] sm:$0xff] %vm476_vm0, %v2866_v5  ;;  %v6776_v52 = vmax.f32 %v2920_v43, %v2948_v11  ;;  %v1870_v10 = vld [vmem:[#allocation2 + $0xb8] sm:$0xff]  ;;  %v2989_v36 = vmax.f32 %v6741_v50, %v2963_v34  ;;  %v2991_v12 = vmax.f32 %v2963_v34, %v6722_v49  ;;  %v2154_v50 = vld [vmem:[#allocation2 + $0xb0] sm:$0xff] }
 0x2df   : > { %1642 = vst.msk [vmem:[#allocation2 + $0xc0] sm:$0xff] %vm476_vm0, %v1614_v18  ;;  %v3040_v59 = vld [vmem:[#allocation3 + $0x8] sm:$0xff]  ;;  %v1898_v38 = vadd.f32 %v1870_v10, %v1842_v62  ;;  %v2921_v53 = vld [vmem:[#allocation2 + $0x98] sm:$0xff] }
 0x2e0   : > { %v3411_v20 = vld [vmem:[#allocation3 + $0x4] sm:$0xff]  ;;  %5202 = vmatmul.msk.f32.gmra.mxu0 %vm476_vm0, %v3040_v59  ;;  %3014 = vst.msk [vmem:[#allocation3 + $0x10] sm:$0xff] %vm476_vm0, %v2988_v39  ;;  %v3002_v9 = vmax.f32 %v6693_v56, %v6776_v52 }
 0x2e1   : > { %v2153_v3 = vld [vmem:[#allocation2 + $0xa8] sm:$0xff]  ;;  %5243 = vmatmul.msk.f32.vlgmr.msrb.gmra.mxu2 %vm476_vm0, %v3411_v20  ;;  %5208 = vmatmul.msk.f32.gmra.mxu1 %vm476_vm0, %v6781_v45  ;;  %1926 = vst.msk [vmem:[#allocation2 + $0xb8] sm:$0xff] %vm476_vm0, %v1898_v38 }
 0x2e2   : > { %v2181_v55 = vadd.f32 %v2153_v3, %v2125_v27  ;;  %v6792_v0 = vpop.permute.xlu2 %2653  ;;  %v2354_v31 = vpop.permute.xlu1 %2353  ;;  %3028 = vst.msk [vmem:[#allocation3 + $0x80] sm:$0xff] %vm476_vm0, %v3002_v9  ;;  %v3208_v16 = vld [vmem:[#allocation3 + $0x2] sm:$0xff] }
 0x2e3   : > { %v2074_v56 = vpop.permute.xlu0 %2073  ;;  %3015 = vst.msk [vmem:[#allocation3 + $0x18] sm:$0xff] %vm476_vm0, %v2989_v36  ;;  %v2410_v15 = vmul.f32 %v6661_v22, %v2354_v31  ;;  %v6847_v20 = vld [vmem:[%s7543_s1 + $0x8] ss:$0 sm:$0xff] }
 0x2e4   : > { %2209 = vst.msk [vmem:[#allocation2 + $0xa8] sm:$0xff] %vm476_vm0, %v2181_v55  ;;  %v2126_v2 = vmul.f32 %v6632_v51, %v2074_v56  ;;  %v2695_v38 = vmul.f32 %v6847_v20, %v6735_v7  ;;  %v1588_v55 = vld [vmem:[#allocation2 + $0xd0] sm:$0xff]  ;;  %v2696_v7 = vmul.f32 %v6847_v20, %v6762_v47 }
 0x2e5   : > { %v2949_v46 = vld [vmem:[#allocation2 + $0x99] sm:$0xff]  ;;  %3016 = vst.msk [vmem:[#allocation3 + $0x20] sm:$0xff] %vm476_vm0, %v2990_v17 }
 0x2e6   : > { %v2182_v44 = vadd.f32 %v2154_v50, %v2126_v2  ;;  %v6802_v54 = vmax.f32 %v2921_v53, %v2949_v46  ;;  %v1871_v23 = vld [vmem:[#allocation2 + $0xc0] sm:$0xff]  ;;  %3017 = vst.msk [vmem:[#allocation3 + $0x28] sm:$0xff] %vm476_vm0, %v2991_v12 }
 0x2e7   : > { %v3041_v49 = vld [vmem:[#allocation3 + $0x10] sm:$0xff]  ;;  %v1899_v58 = vadd.f32 %v1871_v23, %v1843_v33 }
 0x2e8   : > { %v3412_v61 = vld [vmem:[#allocation3 + $0xc] sm:$0xff]  ;;  %2210 = vst.msk [vmem:[#allocation2 + $0xb0] sm:$0xff] %vm476_vm0, %v2182_v44  ;;  %5203 = vmatmul.msk.f32.gmra.mxu0 %vm476_vm0, %v3041_v49  ;;  %v3003_v42 = vmax.f32 %v6697_v35, %v6802_v54  ;;  %v2155_v4 = vld [vmem:[#allocation2 + $0xb8] sm:$0xff] }
 0x2e9   : > { %5244 = vmatmul.msk.f32.gmra.mxu2 %vm476_vm0, %v3412_v61  ;;  %5222 = vmatmul.msk.f32.vlgmr.msrb.gmra.mxu1 %vm476_vm0, %v3208_v16  ;;  %v6818_v60 = vld [vmem:[#allocation3 + $0x80] sm:$0xff]  ;;  %1927 = vst.msk [vmem:[#allocation2 + $0xc0] sm:$0xff] %vm476_vm0, %v1899_v58  ;;  %v3209_v11 = vld [vmem:[#allocation3 + $0xa] sm:$0xff]  ;;  %v5367_v16 = vld [vmem:[%s7545_s3 + $0x88] sm:$0x3] }
 0x2ea   : > { %5217 = vmatmul.msk.f32.gmra.mxu3 %vm476_vm0, %v6818_v60  ;;  %v6830_v35 = vpop.permute.xlu2 %2088  ;;  %v2359_v41 = vpop.permute.xlu1 %2358  ;;  %3029 = vst.msk [vmem:[#allocation3 + $0x88] sm:$0xff] %vm476_vm0, %v3003_v42  ;;  %v3042_v37 = vld [vmem:[#allocation3 + $0x18] sm:$0xff]  ;;  %5368 = vmatpush.msk.msra.mxu0 %vm3113_vm2, %v5367_v16 }
 0x2eb   : > { %v2438_v40 = vld [vmem:[#allocation2 + $0xa8] sm:$0xff]  ;;  %v2079_v32 = vpop.permute.xlu0 %2078  ;;  %v2411_v34 = vmul.f32 %v6661_v22, %v2359_v41  ;;  %v3413_v39 = vld [vmem:[#allocation3 + $0x14] sm:$0xff] }
 0x2ec   : > { %v2466_v57 = vadd.f32 %v2438_v40, %v2410_v15  ;;  %v2127_v5 = vmul.f32 %v6632_v51, %v2079_v32  ;;  %v3043_v53 = vld [vmem:[#allocation3 + $0x20] sm:$0xff]  ;;  %v3210_v23 = vld [vmem:[#allocation3 + $0x12] sm:$0xff] }
 0x2ed   : > { %v3414_v46 = vld [vmem:[#allocation3 + $0x1c] sm:$0xff]  ;;  %v3044_v15 = vld [vmem:[#allocation3 + $0x28] sm:$0xff] }
 0x2ee   : > { %2494 = vst.msk [vmem:[#allocation2 + $0xa8] sm:$0xff] %vm476_vm0, %v2466_v57  ;;  %v2183_v62 = vadd.f32 %v2155_v4, %v2127_v5  ;;  %v6871_v30 = vld [vmem:[#allocation3 + $0x24] sm:$0xff]  ;;  %v3211_v41 = vld [vmem:[#allocation3 + $0x1a] sm:$0xff] }
 0x2ef   : > { %v2439_v18 = vld [vmem:[#allocation2 + $0xb0] sm:$0xff] }
 0x2f0   : > { %v2467_v43 = vadd.f32 %v2439_v18, %v2411_v34  ;;  %2211 = vst.msk [vmem:[#allocation2 + $0xb8] sm:$0xff] %vm476_vm0, %v2183_v62  ;;  %5204 = vmatmul.msk.f32.gmra.mxu0 %vm476_vm0, %v3042_v37  ;;  %v2156_v56 = vld [vmem:[#allocation2 + $0xc0] sm:$0xff] }
 0x2f1   : > { %5245 = vmatmul.msk.f32.gmra.mxu2 %vm476_vm0, %v3413_v39  ;;  %5223 = vmatmul.msk.f32.gmra.mxu1 %vm476_vm0, %v3209_v11  ;;  %v3056_v10 = vld [vmem:[#allocation3 + $0x88] sm:$0x1] }
 0x2f2   : > { %2495 = vst.msk [vmem:[#allocation2 + $0xb0] sm:$0xff] %vm476_vm0, %v2467_v43  ;;  %5218 = vmatmul.msk.f32.gmra.mxu3 %vm476_vm0, %v3056_v10  ;;  %v1524_v27 = vpop.permute.xlu2 %1523  ;;  %v2364_v59 = vpop.permute.xlu1 %2363  ;;  %v1587_v43 = vld [vmem:[#allocation2 + $0xc8] sm:$0xff] }
 0x2f3   : > { %v1560_v3 = vmul.f32 %v6626_v25, %v1524_v27  ;;  %v2084_v9 = vpop.permute.xlu0 %2083  ;;  %v2412_v2 = vmul.f32 %v6661_v22, %v2364_v59  ;;  %v3212_v27 = vld [vmem:[#allocation3 + $0x22] sm:$0xff]  ;;  %v6884_v59 = vld [vmem:[#allocation3 + $0x2c] sm:$0xff] }
 0x2f4   : > { %v2128_v17 = vmul.f32 %v6632_v51, %v2084_v9 }
 0x2f5   : > { %v2723_v36 = vld [vmem:[#allocation2 + $0xa8] sm:$0xff]  ;;  %v1616_v12 = vadd.f32 %v1588_v55, %v1560_v3  ;;  %v2922_v3 = vld [vmem:[#allocation2 + $0xa0] sm:$0xff] }
 0x2f6   : > { %v2751_v31 = vadd.f32 %v2723_v36, %v2695_v38  ;;  %v2184_v33 = vadd.f32 %v2156_v56, %v2128_v17  ;;  %v2698_v36 = vmul.f32 %v6847_v20, %v6792_v0 }
 0x2f7   : > { %v2440_v50 = vld [vmem:[#allocation2 + $0xb8] sm:$0xff]  ;;  %1644 = vst.msk [vmem:[#allocation2 + $0xd0] sm:$0xff] %vm476_vm0, %v1616_v12 }
 0x2f8   : > { %2779 = vst.msk [vmem:[#allocation2 + $0xa8] sm:$0xff] %vm476_vm0, %v2751_v31  ;;  %v2468_v44 = vadd.f32 %v2440_v50, %v2412_v2  ;;  %5205 = vmatmul.msk.f32.gmra.mxu0 %vm476_vm0, %v3043_v53 }
 0x2f9   : > { %5246 = vmatmul.msk.f32.gmra.mxu2 %vm476_vm0, %v3414_v46  ;;  %v2724_v49 = vld [vmem:[#allocation2 + $0xb0] sm:$0xff]  ;;  %2212 = vst.msk [vmem:[#allocation2 + $0xc0] sm:$0xff] %vm476_vm0, %v2184_v33  ;;  %5224 = vmatmul.msk.f32.gmra.mxu1 %vm476_vm0, %v3210_v23 }
 0x2fa   : > { %v2752_v61 = vadd.f32 %v2724_v49, %v2696_v7  ;;  %2496 = vst.msk [vmem:[#allocation2 + $0xb8] sm:$0xff] %vm476_vm0, %v2468_v44  ;;  %5264 = vmatmul.msk.f32.vlgmr.msrb.gmra.mxu3 %vm476_vm0, %v3043_v53  ;;  %v2649_v58 = vpop.permute.xlu1 %2648  ;;  %v6903_v53 = vld [vmem:[#allocation3 + $0x34] sm:$0xff]  ;;  %v3213_v46 = vld [vmem:[#allocation3 + $0x2a] sm:$0xff] }
 0x2fb   : > { %v2369_v47 = vpop.permute.xlu0 %2368  ;;  %v2697_v13 = vmul.f32 %v6847_v20, %v2649_v58 }
 0x2fc   : > { %2780 = vst.msk [vmem:[#allocation2 + $0xb0] sm:$0xff] %vm476_vm0, %v2752_v61  ;;  %v2413_v42 = vmul.f32 %v6661_v22, %v2369_v47 }
 0x2ff   : > { %v2807_v26 = vld [vmem:[#allocation2 + $0xa8] sm:$0xff] }
 0x300   : > { %v2839_v24 = vadd.f32 %v6759_v6, %v2807_v26  ;;  %v2441_v40 = vld [vmem:[#allocation2 + $0xc0] sm:$0xff]  ;;  %5206 = vmatmul.msk.f32.gmra.mxu0 %vm476_vm0, %v3044_v15  ;;  %v1873_v26 = vld [vmem:[#allocation2 + $0xd0] sm:$0xff] }
 0x301   : > { %5247 = vmatmul.msk.f32.gmra.mxu2 %vm476_vm0, %v6871_v30  ;;  %v2725_v32 = vld [vmem:[#allocation2 + $0xb8] sm:$0xff]  ;;  %v2469_v5 = vadd.f32 %v2441_v40, %v2413_v42  ;;  %5225 = vmatmul.msk.f32.gmra.mxu1 %vm476_vm0, %v3211_v41 }
 0x302   : > { %v2867_v57 = vmax.f32 %v2839_v24, 0.0  ;;  %v2753_v4 = vadd.f32 %v2725_v32, %v2697_v13  ;;  %5265 = vmatmul.msk.f32.gmra.mxu3 %vm476_vm0, %v3044_v15  ;;  %v1804_v34 = vpop.permute.xlu1 %1803  ;;  %v1589_v15 = vld [vmem:[#allocation2 + $0xd8] sm:$0x3f] }
 0x303   : > { %v2808_v62 = vld [vmem:[#allocation2 + $0xb0] sm:$0xff]  ;;  %v1519_v18 = vpop.permute.xlu0 %1518  ;;  %2497 = vst.msk [vmem:[#allocation2 + $0xc0] sm:$0xff] %vm476_vm0, %v2469_v5  ;;  %v1844_v0 = vmul.f32 %v6549_v14, %v1804_v34  ;;  %v1814_v34 = vpop.permute.xlu2 %1813 }
 0x304   : > { %2895 = vst.msk [vmem:[#allocation2 + $0xa8] sm:$0xff] %vm476_vm0, %v2867_v57  ;;  %v2840_v37 = vadd.f32 %v6759_v6, %v2808_v62  ;;  %v1559_v39 = vmul.f32 %v6626_v25, %v1519_v18  ;;  %v3214_v41 = vld [vmem:[#allocation3 + $0x32] sm:$0xff] }
 0x305   : > { %2781 = vst.msk [vmem:[#allocation2 + $0xb8] sm:$0xff] %vm476_vm0, %v2753_v4  ;;  %v6936_v4 = vld [vmem:[#allocation3 + $0x40] sm:$0xff] }
 0x306   : > { %v2868_v11 = vmax.f32 %v2840_v37, 0.0  ;;  %v1615_v10 = vadd.f32 %v1587_v43, %v1559_v39  ;;  %v5473_v43 = vld [vmem:[%s7543_s1 + $0x5] ss:$0 sm:$0xff] }
 0x308   : > { %2896 = vst.msk [vmem:[#allocation2 + $0xb0] sm:$0xff] %vm476_vm0, %v2868_v11  ;;  %5285 = vmatmul.msk.f32.vlgmr.msrb.gmra.mxu0 %vm476_vm0, %v3212_v27  ;;  %v1846_v11 = vmul.f32 %v5473_v43, %v1814_v34 }
 0x309   : > { %5248 = vmatmul.msk.f32.gmra.mxu2 %vm476_vm0, %v6884_v59  ;;  %1643 = vst.msk [vmem:[#allocation2 + $0xc8] sm:$0xff] %vm476_vm0, %v1615_v10  ;;  %5226 = vmatmul.msk.f32.gmra.mxu1 %vm476_vm0, %v3212_v27 }
 0x30a   : > { %5266 = vmatmul.msk.f32.gmra.mxu3 %vm476_vm0, %v6750_v21  ;;  %v6894_v38 = vpop.permute.xlu1 %2658  ;;  %v2726_v56 = vld [vmem:[#allocation2 + $0xc0] sm:$0xff] }
 0x30b   : > { %v2950_v9 = vld [vmem:[#allocation2 + $0xa1] sm:$0xff]  ;;  %v6898_v17 = vpop.permute.xlu0 %2373  ;;  %v2754_v2 = vadd.f32 %v2726_v56, %v2698_v36 }
 0x30c   : > { %v2809_v55 = vld [vmem:[#allocation2 + $0xb8] sm:$0xff]  ;;  %v2978_v31 = vmax.f32 %v2922_v3, %v2950_v9  ;;  %v2923_v7 = vld [vmem:[#allocation2 + $0xa8] sm:$0xff]  ;;  %v2414_v56 = vmul.f32 %v6661_v22, %v6898_v17 }
 0x30d   : > { %v2841_v12 = vadd.f32 %v6759_v6, %v2809_v55  ;;  %v3158_v33 = vpop.f32.mrf.mxu2  ;;  %2782 = vst.msk [vmem:[#allocation2 + $0xc0] sm:$0xff] %vm476_vm0, %v2754_v2  ;;  %v3215_v9 = vld [vmem:[#allocation3 + $0x3a] sm:$0xff]  ;;  %v6948_v36 = vld [vmem:[#allocation3 + $0x44] sm:$0xff] }
 0x30e   : > { %v3004_v50 = vmax.f32 %v6776_v52, %v2978_v31  ;;  %3197 = vst.msk [vmem:[#allocation4 + $0x40] sm:$0xff] %vm3188_vm3, %v3158_v33  ;;  %v2379_v33 = vpop.permute.xlu2 %2378 }
 0x30f   : > { %v2869_v21 = vmax.f32 %v2841_v12, 0.0  ;;  %v2951_v44 = vld [vmem:[#allocation2 + $0xa9] sm:$0xff] }
 0x310   : > { %v1872_v23 = vld [vmem:[#allocation2 + $0xc8] sm:$0xff]  ;;  %5286 = vmatmul.msk.f32.gmra.mxu0 %vm476_vm0, %v3213_v46  ;;  %v6911_v52 = vmax.f32 %v2923_v7, %v2951_v44  ;;  %3030 = vst.msk [vmem:[#allocation3 + $0x90] sm:$0xff] %vm476_vm0, %v3004_v50  ;;  %v2924_v57 = vld [vmem:[#allocation2 + $0xb0] sm:$0xff]  ;;  %v2415_v7 = vmul.f32 %v6661_v22, %v2379_v33 }
 0x311   : > { %2897 = vst.msk [vmem:[#allocation2 + $0xb8] sm:$0xff] %vm476_vm0, %v2869_v21  ;;  %5249 = vmatmul.msk.f32.gmra.mxu2 %vm476_vm0, %v6903_v53  ;;  %v1900_v49 = vadd.f32 %v1872_v23, %v1844_v0  ;;  %5227 = vmatmul.msk.f32.gmra.mxu1 %vm476_vm0, %v3213_v46  ;;  %v6966_v44 = vld [vmem:[#allocation3 + $0x42] sm:$0xff] }
 0x312   : > { %5267 = vmatmul.msk.f32.gmra.mxu3 %vm476_vm0, %v6781_v45  ;;  %v1809_v61 = vpop.permute.xlu1 %1808  ;;  %v3005_v58 = vmax.f32 %v6802_v54, %v6911_v52  ;;  %v6925_v54 = vld [vmem:[#allocation3 + $0x3c] sm:$0xff] }
 0x313   : > { %1928 = vst.msk [vmem:[#allocation2 + $0xc8] sm:$0xff] %vm476_vm0, %v1900_v49  ;;  %v1845_v47 = vmul.f32 %v6549_v14, %v1809_v61  ;;  %v1529_v16 = vpop.permute.xlu0 %1528 }
 0x314   : > { %v1561_v24 = vmul.f32 %v6626_v25, %v1529_v16  ;;  %3031 = vst.msk [vmem:[#allocation3 + $0x98] sm:$0xff] %vm476_vm0, %v3005_v58  ;;  %v2810_v13 = vld [vmem:[#allocation2 + $0xc0] sm:$0xff]  ;;  %v2129_v25 = vmul.f32 %v6632_v51, %v6830_v35  ;;  %v2699_v16 = vmul.f32 %v6847_v20, %v6894_v38 }
 0x315   : > { %v1901_v42 = vadd.f32 %v1873_v26, %v1845_v47  ;;  %v2842_v45 = vadd.f32 %v6759_v6, %v2810_v13  ;;  %v5324_v58 = vld [vmem:[%s7545_s3 + $0x60] sm:$0xff]  ;;  %v5345_v47 = vld [vmem:[%s7545_s3 + $0x70] sm:$0xff] }
 0x316   : > { %v1617_v40 = vadd.f32 %v1589_v15, %v1561_v24  ;;  %4316 = vmatpush.msra.mxu2 %v5324_v58  ;;  %4519 = vmatpush.msra.mxu3 %v5345_v47  ;;  %v6994_v13 = vld [vmem:[#allocation3 + $0x4a] sm:$0xff] }
 0x317   : > { %1929 = vst.msk [vmem:[#allocation2 + $0xd0] sm:$0xff] %vm476_vm0, %v1901_v42  ;;  %v2870_v5 = vmax.f32 %v2842_v45, 0.0 }
 0x318   : > { %v2952_v32 = vld [vmem:[#allocation2 + $0xb1] sm:$0xff]  ;;  %1645 = vst.msk [vmem:[#allocation2 + $0xd8] sm:$0x3f] %vm504_vm1, %v1617_v40  ;;  %5287 = vmatmul.msk.f32.gmra.mxu0 %vm476_vm0, %v3214_v41 }
 0x319   : > { %5250 = vmatmul.msk.f32.gmra.mxu2 %vm476_vm0, %v6925_v54  ;;  %v6931_v14 = vmax.f32 %v2924_v57, %v2952_v32  ;;  %5228 = vmatmul.msk.f32.gmra.mxu1 %vm476_vm0, %v3214_v41  ;;  %2898 = vst.msk [vmem:[#allocation2 + $0xc0] sm:$0xff] %vm476_vm0, %v2870_v5  ;;  %v6996_v40 = vld [vmem:[#allocation3 + $0x54] sm:$0xff]  ;;  %v5366_v57 = vld [vmem:[%s7545_s3 + $0x80] sm:$0xff] }
 0x31a   : > { %v2157_v62 = vld [vmem:[#allocation2 + $0xc8] sm:$0xff]  ;;  %5268 = vmatmul.msk.f32.gmra.mxu3 %vm476_vm0, %v6936_v4  ;;  %v2099_v21 = vpop.permute.xlu1 %2098  ;;  %4722 = vmatpush.msra.mxu0 %v5366_v57  ;;  %v7096_v57 = vld [vmem:[#allocation3 + $0x7a] sm:$0xff] }
 0x31b   : > { %v3006_v18 = vmax.f32 %v2978_v31, %v6931_v14  ;;  %v2185_v37 = vadd.f32 %v2157_v62, %v2129_v25  ;;  %v2094_v39 = vpop.permute.xlu0 %2093  ;;  %v2925_v31 = vld [vmem:[#allocation2 + $0xb8] sm:$0xff]  ;;  %v2131_v23 = vmul.f32 %v6632_v51, %v2099_v21  ;;  %v7048_v21 = vld [vmem:[#allocation3 + $0x62] sm:$0xff] }
 0x31c   : > { %v2130_v35 = vmul.f32 %v6632_v51, %v2094_v39  ;;  %v5303_v51 = vld [vmem:[%s7545_s3 + $0x50] sm:$0xff] }
 0x31d   : > { %3032 = vst.msk [vmem:[#allocation3 + $0xa0] sm:$0xff] %vm476_vm0, %v3006_v18  ;;  %4113 = vmatpush.msra.mxu1 %v5303_v51  ;;  %v7015_v62 = vld [vmem:[#allocation3 + $0x52] sm:$0xff]  ;;  %v2669_v18 = vpop.permute.xlu2 %2668 }
 0x31e   : > { %2213 = vst.msk [vmem:[#allocation2 + $0xc8] sm:$0xff] %vm476_vm0, %v2185_v37  ;;  %v2158_v10 = vld [vmem:[#allocation2 + $0xd0] sm:$0xff] }
 0x31f   : > { %v1874_v27 = vld [vmem:[#allocation2 + $0xd8] sm:$0x3f]  ;;  %v2186_v3 = vadd.f32 %v2158_v10, %v2130_v35  ;;  %v2701_v35 = vmul.f32 %v6847_v20, %v2669_v18 }
 0x320   : > { %v1902_v55 = vadd.f32 %v1874_v27, %v1846_v11  ;;  %5288 = vmatmul.msk.f32.gmra.mxu0 %vm476_vm0, %v3215_v9  ;;  %v2953_v12 = vld [vmem:[#allocation2 + $0xb9] sm:$0xff] }
 0x321   : > { %5251 = vmatmul.msk.f32.gmra.mxu2 %vm476_vm0, %v6948_v36  ;;  %2214 = vst.msk [vmem:[#allocation2 + $0xd0] sm:$0xff] %vm476_vm0, %v2186_v3  ;;  %5229 = vmatmul.msk.f32.gmra.mxu1 %vm476_vm0, %v3215_v9  ;;  %v6960_v2 = vmax.f32 %v2925_v31, %v2953_v12  ;;  %v7033_v31 = vld [vmem:[#allocation3 + $0x5a] sm:$0xff] }
 0x322   : > { %1930 = vst.msk [vmem:[#allocation2 + $0xd8] sm:$0x3f] %vm504_vm1, %v1902_v55  ;;  %5269 = vmatmul.msk.f32.gmra.mxu3 %vm476_vm0, %v6595_v63  ;;  %v6968_v63 = vld [vmem:[#allocation3 + $0x4c] sm:$0xff]  ;;  %v2664_v24 = vpop.permute.xlu1 %2663 }
 0x323   : > { %v3007_v46 = vmax.f32 %v6911_v52, %v6960_v2  ;;  %v2384_v15 = vpop.permute.xlu0 %2383  ;;  %v2700_v38 = vmul.f32 %v6847_v20, %v2664_v24  ;;  %v2926_v20 = vld [vmem:[#allocation2 + $0xc0] sm:$0xff] }
 0x324   : > { %v2416_v45 = vmul.f32 %v6661_v22, %v2384_v15  ;;  %v7017_v22 = vld [vmem:[#allocation3 + $0x5c] sm:$0xff]  ;;  %v7080_v15 = vld [vmem:[#allocation3 + $0x72] sm:$0xff] }
 0x325   : > { %v2442_v50 = vld [vmem:[#allocation2 + $0xc8] sm:$0xff]  ;;  %3033 = vst.msk [vmem:[#allocation3 + $0xa8] sm:$0xff] %vm476_vm0, %v3007_v46 }
 0x326   : > { %v2470_v0 = vadd.f32 %v2442_v50, %v2414_v56 }
 0x328   : > { %2498 = vst.msk [vmem:[#allocation2 + $0xc8] sm:$0xff] %vm476_vm0, %v2470_v0  ;;  %v2443_v17 = vld [vmem:[#allocation2 + $0xd0] sm:$0xff]  ;;  %5289 = vmatmul.msk.f32.gmra.mxu0 %vm476_vm0, %v6966_v44 }
 0x329   : > { %5252 = vmatmul.msk.f32.gmra.mxu2 %vm476_vm0, %v6968_v63  ;;  %v2159_v52 = vld [vmem:[#allocation2 + $0xd8] sm:$0x3f]  ;;  %v2471_v49 = vadd.f32 %v2443_v17, %v2415_v7  ;;  %5230 = vmatmul.msk.f32.gmra.mxu1 %vm476_vm0, %v6966_v44  ;;  %v7050_v0 = vld [vmem:[#allocation3 + $0x6c] sm:$0xff] }
 0x32a   : > { %v2187_v61 = vadd.f32 %v2159_v52, %v2131_v23  ;;  %5270 = vmatmul.msk.f32.gmra.mxu3 %vm476_vm0, %v6617_v1 }
 0x32b   : > { %2499 = vst.msk [vmem:[#allocation2 + $0xd0] sm:$0xff] %vm476_vm0, %v2471_v49  ;;  %v7067_v49 = vld [vmem:[#allocation3 + $0x6a] sm:$0xff] }
 0x32c   : > { %2215 = vst.msk [vmem:[#allocation2 + $0xd8] sm:$0x3f] %vm504_vm1, %v2187_v61  ;;  %v7069_v61 = vld [vmem:[#allocation3 + $0x74] sm:$0xff] }
 0x32d   : > { %v3161_v1 = vpop.f32.mrf.mxu2 }
 0x32e   : > { %3198 = vst.msk [vmem:[#allocation4 + $0x48] sm:$0xff] %vm3188_vm3, %v3161_v1 }
 0x32f   : > { %v2727_v26 = vld [vmem:[#allocation2 + $0xc8] sm:$0xff] }
 0x330   : > { %v2755_v42 = vadd.f32 %v2727_v26, %v2699_v16  ;;  %5290 = vmatmul.msk.f32.gmra.mxu0 %vm476_vm0, %v6994_v13 }
 0x331   : > { %5253 = vmatmul.msk.f32.gmra.mxu2 %vm476_vm0, %v6996_v40  ;;  %5231 = vmatmul.msk.f32.gmra.mxu1 %vm476_vm0, %v6994_v13 }
 0x332   : > { %2783 = vst.msk [vmem:[#allocation2 + $0xc8] sm:$0xff] %vm476_vm0, %v2755_v42  ;;  %v2728_v41 = vld [vmem:[#allocation2 + $0xd0] sm:$0xff]  ;;  %5271 = vmatmul.msk.f32.gmra.mxu3 %vm476_vm0, %v6649_v29 }
 0x333   : > { %v2756_v32 = vadd.f32 %v2728_v41, %v2700_v38  ;;  %v2444_v25 = vld [vmem:[#allocation2 + $0xd8] sm:$0x3f] }
 0x334   : > { %v2472_v5 = vadd.f32 %v2444_v25, %v2416_v45  ;;  %v7082_v38 = vld [vmem:[#allocation3 + $0x7c] sm:$0xff] }
 0x335   : > { %2784 = vst.msk [vmem:[#allocation2 + $0xd0] sm:$0xff] %vm476_vm0, %v2756_v32  ;;  %v3164_v34 = vpop.f32.mrf.mxu2  ;;  %v7098_v32 = vld [vmem:[#allocation3 + $0x84] sm:$0xff] }
 0x336   : > { %2500 = vst.msk [vmem:[#allocation2 + $0xd8] sm:$0x3f] %vm504_vm1, %v2472_v5 }
 0x337   : > { %3199 = vst.msk [vmem:[#allocation4 + $0x50] sm:$0xff] %vm3188_vm3, %v3164_v34 }
 0x338   : > { %5291 = vmatmul.msk.f32.gmra.mxu0 %vm476_vm0, %v7015_v62 }
 0x339   : > { %v2811_v29 = vld [vmem:[#allocation2 + $0xc8] sm:$0xff]  ;;  %5254 = vmatmul.msk.f32.gmra.mxu2 %vm476_vm0, %v7017_v22  ;;  %5232 = vmatmul.msk.f32.gmra.mxu1 %vm476_vm0, %v7015_v62 }
 0x33a   : > { %v2843_v37 = vadd.f32 %v6759_v6, %v2811_v29  ;;  %5272 = vmatmul.msk.f32.gmra.mxu3 %vm476_vm0, %v6677_v19  ;;  %v7035_v19 = vld [vmem:[#allocation3 + $0x64] sm:$0xff] }
 0x33c   : > { %v2871_v39 = vmax.f32 %v2843_v37, 0.0  ;;  %v2812_v43 = vld [vmem:[#allocation2 + $0xd0] sm:$0xff]  ;;  %v3173_v11 = vpop.f32.mrf.mxu3  ;;  %v7112_v37 = vld [vmem:[#allocation3 + $0x82] sm:$0xff] }
 0x33d   : > { %v2844_v10 = vadd.f32 %v6759_v6, %v2812_v43  ;;  %v2729_v27 = vld [vmem:[#allocation2 + $0xd8] sm:$0x3f]  ;;  %v3167_v3 = vpop.f32.mrf.mxu2  ;;  %3202 = vst.msk [vmem:[#allocation4 + $0x68] sm:$0xff] %vm3188_vm3, %v3173_v11 }
 0x33e   : > { %2899 = vst.msk [vmem:[#allocation2 + $0xc8] sm:$0xff] %vm476_vm0, %v2871_v39  ;;  %v2757_v9 = vadd.f32 %v2729_v27, %v2701_v35  ;;  %v3428_v39 = vld [vmem:[#allocation3 + $0x8c] sm:$0x1]  ;;  %v7120_v35 = vld [vmem:[#allocation3 + $0x90] sm:$0xff] }
 0x33f   : > { %3200 = vst.msk [vmem:[#allocation4 + $0x58] sm:$0xff] %vm3188_vm3, %v3167_v3  ;;  %v2872_v55 = vmax.f32 %v2844_v10, 0.0 }
 0x340   : > { %2785 = vst.msk [vmem:[#allocation2 + $0xd8] sm:$0x3f] %vm504_vm1, %v2757_v9  ;;  %5292 = vmatmul.msk.f32.gmra.mxu0 %vm476_vm0, %v7033_v31 }
 0x341   : > { %5255 = vmatmul.msk.f32.gmra.mxu2 %vm476_vm0, %v7035_v19  ;;  %2900 = vst.msk [vmem:[#allocation2 + $0xd0] sm:$0xff] %vm476_vm0, %v2872_v55  ;;  %5233 = vmatmul.msk.f32.gmra.mxu1 %vm476_vm0, %v7033_v31  ;;  %v7126_v55 = vld [vmem:[#allocation3 + $0x8a] sm:$0xff] }
 0x342   : > { %5273 = vmatmul.msk.f32.gmra.mxu3 %vm476_vm0, %v6646_v28 }
 0x345   : > { %v2954_v12 = vld [vmem:[#allocation2 + $0xc1] sm:$0xff]  ;;  %v3170_v56 = vpop.f32.mrf.mxu2 }
 0x346   : > { %v2982_v33 = vmax.f32 %v2926_v20, %v2954_v12  ;;  %3201 = vst.msk [vmem:[#allocation4 + $0x60] sm:$0xff] %vm3188_vm3, %v3170_v56  ;;  %v2927_v28 = vld [vmem:[#allocation2 + $0xc8] sm:$0xff]  ;;  %v7134_v56 = vld [vmem:[#allocation3 + $0x98] sm:$0xff] }
 0x347   : > { %v2813_v50 = vld [vmem:[#allocation2 + $0xd8] sm:$0x3f]  ;;  %v3225_v20 = vld [vmem:[#allocation3 + $0x8a] sm:$0x1] }
 0x348   : > { %v3008_v46 = vmax.f32 %v6931_v14, %v2982_v33  ;;  %v2845_v7 = vadd.f32 %v6759_v6, %v2813_v50  ;;  %5293 = vmatmul.msk.f32.gmra.mxu0 %vm476_vm0, %v7048_v21  ;;  %v2955_v23 = vld [vmem:[#allocation2 + $0xc9] sm:$0xff] }
 0x349   : > { %5256 = vmatmul.msk.f32.gmra.mxu2 %vm476_vm0, %v7050_v0  ;;  %5234 = vmatmul.msk.f32.gmra.mxu1 %vm476_vm0, %v7048_v21  ;;  %v2983_v17 = vmax.f32 %v2927_v28, %v2955_v23 }
 0x34a   : > { %3034 = vst.msk [vmem:[#allocation3 + $0xb0] sm:$0xff] %vm476_vm0, %v3008_v46  ;;  %v2873_v52 = vmax.f32 %v2845_v7, 0.0  ;;  %5274 = vmatmul.msk.f32.gmra.mxu3 %vm476_vm0, %v6738_v48  ;;  %v2928_v48 = vld [vmem:[#allocation2 + $0xd0] sm:$0xff] }
 0x34b   : > { %v3009_v6 = vmax.f32 %v6960_v2, %v2983_v17 }
 0x34c   : > { %2901 = vst.msk [vmem:[#allocation2 + $0xd8] sm:$0x3f] %vm504_vm1, %v2873_v52  ;;  %v4224_v52 = vld [vmem:[#allocation3 + $0x48] sm:$0xff] }
 0x34d   : > { %3035 = vst.msk [vmem:[#allocation3 + $0xb8] sm:$0xff] %vm476_vm0, %v3009_v6 }
 0x34e   : > { %v3134_v14 = vpop.f32.mrf.mxu0 }
 0x34f   : > { %3189 = vst.msk [vmem:[#allocation4] sm:$0xff] %vm3188_vm3, %v3134_v14  ;;  %v7149_v14 = vld [vmem:[#allocation3 + $0xa0] sm:$0xff] }
 0x350   : > { %5294 = vmatmul.msk.f32.gmra.mxu0 %vm476_vm0, %v7067_v49 }
 0x351   : > { %5257 = vmatmul.msk.f32.gmra.mxu2 %vm476_vm0, %v7069_v61  ;;  %5235 = vmatmul.msk.f32.gmra.mxu1 %vm476_vm0, %v7067_v49 }
 0x352   : > { %5275 = vmatmul.msk.f32.gmra.mxu3 %vm476_vm0, %v6764_v8 }
 0x353   : > { %v2956_v2 = vld [vmem:[#allocation2 + $0xd1] sm:$0xff]  ;;  %v2957_v58 = vld [vmem:[#allocation2 + $0xd9] sm:$0x1f] }
 0x354   : > { %v2929_v51 = vld [vmem:[#allocation2 + $0xd8] sm:$0x1f]  ;;  %v2984_v47 = vmax.f32 %v2928_v48, %v2956_v2 }
 0x355   : > { %v2985_v16 = vmax.f32 %v2929_v51, %v2957_v58 }
 0x356   : > { %v3152_v1 = vpop.f32.mrf.mxu1  ;;  %v3010_v26 = vmax.f32 %v2982_v33, %v2984_v47  ;;  %v3357_v29 = vld [vmem:[#allocation4] sm:$0xff] }
 0x357   : > { %v3011_v24 = vmax.f32 %v2983_v17, %v2985_v16  ;;  %v3176_v42 = vpop.f32.mrf.mxu3  ;;  %3195 = vst.msk [vmem:[#allocation4 + $0x30] sm:$0xff] %vm3188_vm3, %v3152_v1  ;;  %v7141_v17 = vld [vmem:[#allocation3 + $0x92] sm:$0xff] }
 0x358   : > { %3203 = vst.msk [vmem:[#allocation4 + $0x70] sm:$0xff] %vm3188_vm3, %v3176_v42  ;;  %5295 = vmatmul.msk.f32.gmra.mxu0 %vm476_vm0, %v7080_v15  ;;  %v7155_v42 = vld [vmem:[#allocation3 + $0x9a] sm:$0xff] }
 0x359   : > { %5258 = vmatmul.msk.f32.gmra.mxu2 %vm476_vm0, %v7082_v38  ;;  %5236 = vmatmul.msk.f32.gmra.mxu1 %vm476_vm0, %v7080_v15  ;;  %3036 = vst.msk [vmem:[#allocation3 + $0xc0] sm:$0xff] %vm476_vm0, %v3010_v26 }
 0x35a   : > { %5276 = vmatmul.msk.f32.gmra.mxu3 %vm476_vm0, %v6818_v60  ;;  %3038 = vst.msk [vmem:[#allocation3 + $0xc8] sm:$0x1f] %vm3037_vm4, %v3011_v24  ;;  %v7107_v60 = vld [vmem:[#allocation3 + $0x88] sm:$0xff] }
 0x35d   : > { %v3137_v8 = vpop.f32.mrf.mxu0 }
 0x35e   : > { %3190 = vst.msk [vmem:[#allocation4 + $0x8] sm:$0xff] %vm3188_vm3, %v3137_v8  ;;  %v3155_v41 = vpop.f32.mrf.mxu1 }
 0x35f   : > { %v3179_v45 = vpop.f32.mrf.mxu3  ;;  %3196 = vst.msk [vmem:[#allocation4 + $0x38] sm:$0xff] %vm3188_vm3, %v3155_v41  ;;  %v3631_v41 = vld [vmem:[#allocation3 + $0xa8] sm:$0x1] }
 0x360   : > { %3204 = vst.msk [vmem:[#allocation4 + $0x78] sm:$0xff] %vm3188_vm3, %v3179_v45  ;;  %5296 = vmatmul.msk.f32.gmra.mxu0 %vm476_vm0, %v7096_v57 }
 0x361   : > { %5259 = vmatmul.msk.f32.gmra.mxu2 %vm476_vm0, %v7098_v32  ;;  %5237 = vmatmul.msk.f32.gmra.mxu1 %vm476_vm0, %v7096_v57 }
 0x362   : > { %5277 = vmatmul.msk.f32.gmra.mxu3 %vm476_vm0, %v7107_v60 }
 0x364   : > { %v3506_v25 = vpop.f32.mrf.mxu2 }
 0x365   : > { %v3140_v5 = vpop.f32.mrf.mxu0  ;;  %v3358_v3 = vld [vmem:[#allocation4 + $0x8] sm:$0xff] }
 0x366   : > { %3191 = vst.msk [vmem:[#allocation4 + $0x10] sm:$0xff] %vm3188_vm3, %v3140_v5  ;;  %v3303_v34 = vpop.f32.mrf.mxu1 }
 0x367   : > { %v3375_v18 = vadd.f32 %v3357_v29, %v3303_v34 }
 0x368   : > { %5297 = vmatmul.msk.f32.gmra.mxu0 %vm476_vm0, %v7112_v37 }
 0x369   : > { %5260 = vmatmul.msk.f32.gmra.mxu2 %vm476_vm0, %v3428_v39  ;;  %3393 = vst.msk [vmem:[#allocation4] sm:$0xff] %vm3188_vm3, %v3375_v18  ;;  %5238 = vmatmul.msk.f32.gmra.mxu1 %vm476_vm0, %v7112_v37 }
 0x36a   : > { %5278 = vmatmul.msk.f32.gmra.mxu3 %vm476_vm0, %v7120_v35 }
 0x36c   : > { %v3509_v43 = vpop.f32.mrf.mxu2 }
 0x36d   : > { %v3143_v11 = vpop.f32.mrf.mxu0  ;;  %v3182_v10 = vpop.f32.mrf.mxu3  ;;  %v3359_v28 = vld [vmem:[#allocation4 + $0x10] sm:$0xff] }
 0x36e   : > { %3192 = vst.msk [vmem:[#allocation4 + $0x18] sm:$0xff] %vm3188_vm3, %v3143_v11  ;;  %v3306_v27 = vpop.f32.mrf.mxu1 }
 0x36f   : > { %3205 = vst.msk [vmem:[#allocation4 + $0x80] sm:$0xff] %vm3188_vm3, %v3182_v10  ;;  %v3376_v9 = vadd.f32 %v3358_v3, %v3306_v27  ;;  %v7166_v27 = vld [vmem:[#allocation3 + $0xa2] sm:$0xff]  ;;  %v4226_v3 = vld [vmem:[#allocation3 + $0x58] sm:$0xff] }
 0x370   : > { %5298 = vmatmul.msk.f32.gmra.mxu0 %vm476_vm0, %v7126_v55  ;;  %v3560_v12 = vld [vmem:[#allocation4] sm:$0xff] }
 0x371   : > { %5327 = vmatmul.msk.f32.vlgmr.msra.gmra.mxu2 %vm476_vm0, %v6936_v4  ;;  %3394 = vst.msk [vmem:[#allocation4 + $0x8] sm:$0xff] %vm3188_vm3, %v3376_v9  ;;  %5239 = vmatmul.msk.f32.gmra.mxu1 %vm476_vm0, %v3225_v20  ;;  %v3578_v33 = vadd.f32 %v3560_v12, %v3506_v25 }
 0x372   : > { %5279 = vmatmul.msk.f32.gmra.mxu3 %vm476_vm0, %v7134_v56 }
 0x373   : > { %3596 = vst.msk [vmem:[#allocation4] sm:$0xff] %vm3188_vm3, %v3578_v33 }
 0x374   : > { %v3512_v50 = vpop.f32.mrf.mxu2 }
 0x375   : > { %v3146_v46 = vpop.f32.mrf.mxu0  ;;  %v3185_v7 = vpop.f32.mrf.mxu3  ;;  %v3360_v1 = vld [vmem:[#allocation4 + $0x18] sm:$0xff] }
 0x376   : > { %3193 = vst.msk [vmem:[#allocation4 + $0x20] sm:$0xff] %vm3188_vm3, %v3146_v46  ;;  %v3309_v4 = vpop.f32.mrf.mxu1 }
 0x377   : > { %3207 = vst.msk [vmem:[#allocation4 + $0x88] sm:$0x1] %vm3206_vm5, %v3185_v7  ;;  %v3377_v23 = vadd.f32 %v3359_v28, %v3309_v4 }
 0x378   : > { %5299 = vmatmul.msk.f32.gmra.mxu0 %vm476_vm0, %v7141_v17  ;;  %v3561_v6 = vld [vmem:[#allocation4 + $0x8] sm:$0xff] }
 0x379   : > { %5328 = vmatmul.msk.f32.gmra.mxu2 %vm476_vm0, %v4224_v52  ;;  %3395 = vst.msk [vmem:[#allocation4 + $0x10] sm:$0xff] %vm3188_vm3, %v3377_v23  ;;  %5306 = vmatmul.msk.f32.vlgmr.msra.gmra.mxu1 %vm476_vm0, %v6871_v30  ;;  %v3579_v48 = vadd.f32 %v3561_v6, %v3509_v43  ;;  %v4225_v30 = vld [vmem:[#allocation3 + $0x50] sm:$0xff]  ;;  %v3834_v6 = vld [vmem:[#allocation3 + $0xaa] sm:$0x1] }
 0x37a   : > { %5280 = vmatmul.msk.f32.gmra.mxu3 %vm476_vm0, %v7149_v14  ;;  %v3763_v47 = vld [vmem:[#allocation4] sm:$0xff] }
 0x37b   : > { %3597 = vst.msk [vmem:[#allocation4 + $0x8] sm:$0xff] %vm3188_vm3, %v3579_v48  ;;  %v4227_v48 = vld [vmem:[#allocation3 + $0x60] sm:$0xff] }
 0x37c   : > { %v3515_v2 = vpop.f32.mrf.mxu2 }
 0x37d   : > { %v3149_v51 = vpop.f32.mrf.mxu0  ;;  %v3709_v58 = vpop.f32.mrf.mxu3  ;;  %v3361_v39 = vld [vmem:[#allocation4 + $0x20] sm:$0xff] }
 0x37e   : > { %3194 = vst.msk [vmem:[#allocation4 + $0x28] sm:$0xff] %vm3188_vm3, %v3149_v51  ;;  %v3312_v16 = vpop.f32.mrf.mxu1  ;;  %v3781_v26 = vadd.f32 %v3763_v47, %v3709_v58 }
 0x37f   : > { %v3378_v24 = vadd.f32 %v3360_v1, %v3312_v16 }
 0x380   : > { %3799 = vst.msk [vmem:[#allocation4] sm:$0xff] %vm3188_vm3, %v3781_v26  ;;  %5300 = vmatmul.msk.f32.gmra.mxu0 %vm476_vm0, %v7155_v42  ;;  %v3562_v8 = vld [vmem:[#allocation4 + $0x10] sm:$0xff] }
 0x381   : > { %5329 = vmatmul.msk.f32.gmra.mxu2 %vm476_vm0, %v4225_v30  ;;  %3396 = vst.msk [vmem:[#allocation4 + $0x18] sm:$0xff] %vm3188_vm3, %v3378_v24  ;;  %5307 = vmatmul.msk.f32.gmra.mxu1 %vm476_vm0, %v6884_v59  ;;  %v3580_v45 = vadd.f32 %v3562_v8, %v3512_v50  ;;  %v3363_v26 = vld [vmem:[#allocation4 + $0x30] sm:$0xff] }
 0x382   : > { %5281 = vmatmul.msk.f32.gmra.mxu3 %vm476_vm0, %v3631_v41  ;;  %v3764_v34 = vld [vmem:[#allocation4 + $0x8] sm:$0xff]  ;;  %v4228_v41 = vld [vmem:[#allocation3 + $0x68] sm:$0xff] }
 0x383   : > { %3598 = vst.msk [vmem:[#allocation4 + $0x10] sm:$0xff] %vm3188_vm3, %v3580_v45 }
 0x384   : > { %v3518_v25 = vpop.f32.mrf.mxu2 }
 0x385   : > { %v3712_v5 = vpop.f32.mrf.mxu3  ;;  %v3912_v29 = vpop.f32.mrf.mxu0  ;;  %v3362_v4 = vld [vmem:[#allocation4 + $0x28] sm:$0xff] }
 0x386   : > { %v3315_v18 = vpop.f32.mrf.mxu1  ;;  %v3782_v43 = vadd.f32 %v3764_v34, %v3712_v5 }
 0x387   : > { %v3379_v11 = vadd.f32 %v3361_v39, %v3315_v18  ;;  %v3966_v10 = vld [vmem:[#allocation4] sm:$0xff]  ;;  %v3364_v39 = vld [vmem:[#allocation4 + $0x38] sm:$0xff] }
 0x388   : > { %3800 = vst.msk [vmem:[#allocation4 + $0x8] sm:$0xff] %vm3188_vm3, %v3782_v43  ;;  %v3984_v59 = vadd.f32 %v3966_v10, %v3912_v29  ;;  %5301 = vmatmul.msk.f32.gmra.mxu0 %vm476_vm0, %v7166_v27  ;;  %v3563_v9 = vld [vmem:[#allocation4 + $0x18] sm:$0xff] }
 0x389   : > { %5330 = vmatmul.msk.f32.gmra.mxu2 %vm476_vm0, %v4226_v3  ;;  %3397 = vst.msk [vmem:[#allocation4 + $0x20] sm:$0xff] %vm3188_vm3, %v3379_v11  ;;  %5308 = vmatmul.msk.f32.gmra.mxu1 %vm476_vm0, %v6903_v53  ;;  %v3581_v20 = vadd.f32 %v3563_v9, %v3515_v2  ;;  %v4229_v3 = vld [vmem:[#allocation3 + $0x70] sm:$0xff] }
 0x38a   : > { %4002 = vst.msk [vmem:[#allocation4] sm:$0xff] %vm3188_vm3, %v3984_v59  ;;  %5348 = vmatmul.msk.f32.vlgmr.msra.gmra.mxu3 %vm476_vm0, %v6966_v44  ;;  %v3765_v50 = vld [vmem:[#allocation4 + $0x10] sm:$0xff] }
 0x38b   : > { %3599 = vst.msk [vmem:[#allocation4 + $0x18] sm:$0xff] %vm3188_vm3, %v3581_v20 }
 0x38c   : > { %v3521_v12 = vpop.f32.mrf.mxu2 }
 0x38d   : > { %v3715_v33 = vpop.f32.mrf.mxu3  ;;  %v3915_v46 = vpop.f32.mrf.mxu0 }
 0x38e   : > { %v3318_v7 = vpop.f32.mrf.mxu1  ;;  %v3783_v28 = vadd.f32 %v3765_v50, %v3715_v33 }
 0x38f   : > { %v3380_v23 = vadd.f32 %v3362_v4, %v3318_v7  ;;  %v3967_v52 = vld [vmem:[#allocation4 + $0x8] sm:$0xff] }
 0x390   : > { %3801 = vst.msk [vmem:[#allocation4 + $0x10] sm:$0xff] %vm3188_vm3, %v3783_v28  ;;  %v3985_v53 = vadd.f32 %v3967_v52, %v3915_v46  ;;  %5302 = vmatmul.msk.f32.gmra.mxu0 %vm476_vm0, %v3834_v6  ;;  %v3564_v44 = vld [vmem:[#allocation4 + $0x20] sm:$0xff] }
 0x391   : > { %5331 = vmatmul.msk.f32.gmra.mxu2 %vm476_vm0, %v4227_v48  ;;  %3398 = vst.msk [vmem:[#allocation4 + $0x28] sm:$0xff] %vm3188_vm3, %v3380_v23  ;;  %5309 = vmatmul.msk.f32.gmra.mxu1 %vm476_vm0, %v6925_v54  ;;  %v3582_v2 = vadd.f32 %v3564_v44, %v3518_v25  ;;  %v3365_v46 = vld [vmem:[#allocation4 + $0x40] sm:$0xff]  ;;  %v4230_v23 = vld [vmem:[#allocation3 + $0x78] sm:$0xff] }
 0x392   : > { %4003 = vst.msk [vmem:[#allocation4 + $0x8] sm:$0xff] %vm3188_vm3, %v3985_v53  ;;  %5349 = vmatmul.msk.f32.gmra.mxu3 %vm476_vm0, %v6994_v13  ;;  %v3766_v47 = vld [vmem:[#allocation4 + $0x18] sm:$0xff] }
 0x393   : > { %3600 = vst.msk [vmem:[#allocation4 + $0x20] sm:$0xff] %vm3188_vm3, %v3582_v2 }
 0x394   : > { %v3524_v51 = vpop.f32.mrf.mxu2 }
 0x395   : > { %v3718_v58 = vpop.f32.mrf.mxu3  ;;  %v3918_v16 = vpop.f32.mrf.mxu0 }
 0x396   : > { %v3321_v1 = vpop.f32.mrf.mxu1  ;;  %v3784_v24 = vadd.f32 %v3766_v47, %v3718_v58 }
 0x397   : > { %v3381_v30 = vadd.f32 %v3363_v26, %v3321_v1  ;;  %v3968_v8 = vld [vmem:[#allocation4 + $0x10] sm:$0xff] }
 0x398   : > { %3802 = vst.msk [vmem:[#allocation4 + $0x18] sm:$0xff] %vm3188_vm3, %v3784_v24  ;;  %v3986_v54 = vadd.f32 %v3968_v8, %v3918_v16  ;;  %5369 = vmatmul.msk.f32.vlgmr.msra.gmra.mxu0 %vm476_vm0, %v6948_v36  ;;  %v3565_v13 = vld [vmem:[#allocation4 + $0x28] sm:$0xff]  ;;  %v4231_v1 = vld [vmem:[#allocation3 + $0x80] sm:$0xff] }
 0x399   : > { %5332 = vmatmul.msk.f32.gmra.mxu2 %vm476_vm0, %v4228_v41  ;;  %3399 = vst.msk [vmem:[#allocation4 + $0x30] sm:$0xff] %vm3188_vm3, %v3381_v30  ;;  %5310 = vmatmul.msk.f32.gmra.mxu1 %vm476_vm0, %v6948_v36  ;;  %v3583_v45 = vadd.f32 %v3565_v13, %v3521_v12  ;;  %v3367_v13 = vld [vmem:[#allocation4 + $0x50] sm:$0xff] }
 0x39a   : > { %4004 = vst.msk [vmem:[#allocation4 + $0x10] sm:$0xff] %vm3188_vm3, %v3986_v54  ;;  %5350 = vmatmul.msk.f32.gmra.mxu3 %vm476_vm0, %v7015_v62  ;;  %v3767_v34 = vld [vmem:[#allocation4 + $0x20] sm:$0xff] }
 0x39b   : > { %3601 = vst.msk [vmem:[#allocation4 + $0x28] sm:$0xff] %vm3188_vm3, %v3583_v45 }
 0x39c   : > { %v3527_v25 = vpop.f32.mrf.mxu2 }
 0x39d   : > { %v3721_v5 = vpop.f32.mrf.mxu3  ;;  %v3921_v29 = vpop.f32.mrf.mxu0 }
 0x39e   : > { %v3324_v18 = vpop.f32.mrf.mxu1  ;;  %v3785_v43 = vadd.f32 %v3767_v34, %v3721_v5 }
 0x39f   : > { %v3382_v11 = vadd.f32 %v3364_v39, %v3324_v18  ;;  %v3969_v10 = vld [vmem:[#allocation4 + $0x18] sm:$0xff] }
 0x3a0   : > { %3803 = vst.msk [vmem:[#allocation4 + $0x20] sm:$0xff] %vm3188_vm3, %v3785_v43  ;;  %v3987_v36 = vadd.f32 %v3969_v10, %v3921_v29  ;;  %5370 = vmatmul.msk.f32.gmra.mxu0 %vm476_vm0, %v6968_v63  ;;  %v3566_v62 = vld [vmem:[#allocation4 + $0x30] sm:$0xff] }
 0x3a1   : > { %5333 = vmatmul.msk.f32.gmra.mxu2 %vm476_vm0, %v4229_v3  ;;  %3400 = vst.msk [vmem:[#allocation4 + $0x38] sm:$0xff] %vm3188_vm3, %v3382_v11  ;;  %5311 = vmatmul.msk.f32.gmra.mxu1 %vm476_vm0, %v6968_v63  ;;  %v3584_v59 = vadd.f32 %v3566_v62, %v3524_v51  ;;  %v3366_v51 = vld [vmem:[#allocation4 + $0x48] sm:$0xff]  ;;  %v3368_v11 = vld [vmem:[#allocation4 + $0x58] sm:$0xff] }
 0x3a2   : > { %4005 = vst.msk [vmem:[#allocation4 + $0x18] sm:$0xff] %vm3188_vm3, %v3987_v36  ;;  %5351 = vmatmul.msk.f32.gmra.mxu3 %vm476_vm0, %v7033_v31  ;;  %v3768_v12 = vld [vmem:[#allocation4 + $0x28] sm:$0xff] }
 0x3a3   : > { %3602 = vst.msk [vmem:[#allocation4 + $0x30] sm:$0xff] %vm3188_vm3, %v3584_v59 }
 0x3a4   : > { %v3530_v9 = vpop.f32.mrf.mxu2 }
 0x3a5   : > { %v3724_v20 = vpop.f32.mrf.mxu3  ;;  %v3924_v33 = vpop.f32.mrf.mxu0 }
 0x3a6   : > { %v3327_v50 = vpop.f32.mrf.mxu1  ;;  %v3786_v7 = vadd.f32 %v3768_v12, %v3724_v20 }
 0x3a7   : > { %v3383_v4 = vadd.f32 %v3365_v46, %v3327_v50  ;;  %v3970_v28 = vld [vmem:[#allocation4 + $0x20] sm:$0xff] }
 0x3a8   : > { %3804 = vst.msk [vmem:[#allocation4 + $0x28] sm:$0xff] %vm3188_vm3, %v3786_v7  ;;  %v3988_v63 = vadd.f32 %v3970_v28, %v3924_v33  ;;  %5371 = vmatmul.msk.f32.gmra.mxu0 %vm476_vm0, %v6996_v40  ;;  %v3567_v31 = vld [vmem:[#allocation4 + $0x38] sm:$0xff]  ;;  %v3369_v33 = vld [vmem:[#allocation4 + $0x60] sm:$0xff] }
 0x3a9   : > { %5334 = vmatmul.msk.f32.gmra.mxu2 %vm476_vm0, %v4230_v23  ;;  %3401 = vst.msk [vmem:[#allocation4 + $0x40] sm:$0xff] %vm3188_vm3, %v3383_v4  ;;  %5312 = vmatmul.msk.f32.gmra.mxu1 %vm476_vm0, %v6996_v40  ;;  %v3585_v52 = vadd.f32 %v3567_v31, %v3527_v25 }
 0x3aa   : > { %4006 = vst.msk [vmem:[#allocation4 + $0x20] sm:$0xff] %vm3188_vm3, %v3988_v63  ;;  %5352 = vmatmul.msk.f32.gmra.mxu3 %vm476_vm0, %v7048_v21  ;;  %v3769_v53 = vld [vmem:[#allocation4 + $0x30] sm:$0xff] }
 0x3ab   : > { %3603 = vst.msk [vmem:[#allocation4 + $0x38] sm:$0xff] %vm3188_vm3, %v3585_v52  ;;  %v3370_v52 = vld [vmem:[#allocation4 + $0x68] sm:$0xff] }
 0x3ac   : > { %v3533_v6 = vpop.f32.mrf.mxu2 }
 0x3ad   : > { %v3727_v48 = vpop.f32.mrf.mxu3  ;;  %v3927_v44 = vpop.f32.mrf.mxu0 }
 0x3ae   : > { %v3330_v2 = vpop.f32.mrf.mxu1  ;;  %v3787_v58 = vadd.f32 %v3769_v53, %v3727_v48 }
 0x3af   : > { %v3384_v47 = vadd.f32 %v3366_v51, %v3330_v2  ;;  %v3971_v16 = vld [vmem:[#allocation4 + $0x28] sm:$0xff] }
 0x3b0   : > { %3805 = vst.msk [vmem:[#allocation4 + $0x30] sm:$0xff] %vm3188_vm3, %v3787_v58  ;;  %v3989_v40 = vadd.f32 %v3971_v16, %v3927_v44  ;;  %5372 = vmatmul.msk.f32.gmra.mxu0 %vm476_vm0, %v7017_v22  ;;  %v3568_v21 = vld [vmem:[#allocation4 + $0x40] sm:$0xff]  ;;  %v3371_v16 = vld [vmem:[#allocation4 + $0x70] sm:$0xff] }
 0x3b1   : > { %5335 = vmatmul.msk.f32.gmra.mxu2 %vm476_vm0, %v4231_v1  ;;  %3402 = vst.msk [vmem:[#allocation4 + $0x48] sm:$0xff] %vm3188_vm3, %v3384_v47  ;;  %5313 = vmatmul.msk.f32.gmra.mxu1 %vm476_vm0, %v7017_v22  ;;  %v3586_v26 = vadd.f32 %v3568_v21, %v3530_v9 }
 0x3b2   : > { %4007 = vst.msk [vmem:[#allocation4 + $0x28] sm:$0xff] %vm3188_vm3, %v3989_v40  ;;  %5353 = vmatmul.msk.f32.gmra.mxu3 %vm476_vm0, %v7067_v49  ;;  %v3770_v8 = vld [vmem:[#allocation4 + $0x38] sm:$0xff] }
 0x3b3   : > { %3604 = vst.msk [vmem:[#allocation4 + $0x40] sm:$0xff] %vm3188_vm3, %v3586_v26  ;;  %v4236_v26 = vld [vmem:[#allocation3 + $0xa8] sm:$0xff] }
 0x3b4   : > { %v3536_v24 = vpop.f32.mrf.mxu2 }
 0x3b5   : > { %v3730_v30 = vpop.f32.mrf.mxu3  ;;  %v3930_v41 = vpop.f32.mrf.mxu0 }
 0x3b6   : > { %v3333_v54 = vpop.f32.mrf.mxu1  ;;  %v3788_v45 = vadd.f32 %v3770_v8, %v3730_v30 }
 0x3b7   : > { %v3385_v25 = vadd.f32 %v3367_v13, %v3333_v54  ;;  %v3972_v5 = vld [vmem:[#allocation4 + $0x30] sm:$0xff] }
 0x3b8   : > { %3806 = vst.msk [vmem:[#allocation4 + $0x38] sm:$0xff] %vm3188_vm3, %v3788_v45  ;;  %v3990_v22 = vadd.f32 %v3972_v5, %v3930_v41  ;;  %5373 = vmatmul.msk.f32.gmra.mxu0 %vm476_vm0, %v7035_v19  ;;  %v3569_v49 = vld [vmem:[#allocation4 + $0x48] sm:$0xff]  ;;  %v3372_v45 = vld [vmem:[#allocation4 + $0x78] sm:$0xff] }
 0x3b9   : > { %5336 = vmatmul.msk.f32.gmra.mxu2 %vm476_vm0, %v7107_v60  ;;  %3403 = vst.msk [vmem:[#allocation4 + $0x50] sm:$0xff] %vm3188_vm3, %v3385_v25  ;;  %5314 = vmatmul.msk.f32.gmra.mxu1 %vm476_vm0, %v7035_v19  ;;  %v3587_v34 = vadd.f32 %v3569_v49, %v3533_v6  ;;  %v4033_v49 = vld [vmem:[#allocation3 + $0x8c] sm:$0xff] }
 0x3ba   : > { %4008 = vst.msk [vmem:[#allocation4 + $0x30] sm:$0xff] %vm3188_vm3, %v3990_v22  ;;  %5354 = vmatmul.msk.f32.gmra.mxu3 %vm476_vm0, %v7080_v15  ;;  %v3771_v60 = vld [vmem:[#allocation4 + $0x40] sm:$0xff] }
 0x3bb   : > { %3605 = vst.msk [vmem:[#allocation4 + $0x48] sm:$0xff] %vm3188_vm3, %v3587_v34  ;;  %v4237_v34 = vld [vmem:[#allocation3 + $0xb0] sm:$0xff] }
 0x3bc   : > { %v3539_v29 = vpop.f32.mrf.mxu2 }
 0x3bd   : > { %v3733_v18 = vpop.f32.mrf.mxu3  ;;  %v3933_v39 = vpop.f32.mrf.mxu0 }
 0x3be   : > { %v3336_v43 = vpop.f32.mrf.mxu1  ;;  %v3789_v10 = vadd.f32 %v3771_v60, %v3733_v18 }
 0x3bf   : > { %v3386_v3 = vadd.f32 %v3368_v11, %v3336_v43  ;;  %v3973_v36 = vld [vmem:[#allocation4 + $0x38] sm:$0xff] }
 0x3c0   : > { %3807 = vst.msk [vmem:[#allocation4 + $0x40] sm:$0xff] %vm3188_vm3, %v3789_v10  ;;  %v3991_v19 = vadd.f32 %v3973_v36, %v3933_v39  ;;  %5374 = vmatmul.msk.f32.gmra.mxu0 %vm476_vm0, %v7050_v0  ;;  %v3570_v15 = vld [vmem:[#allocation4 + $0x50] sm:$0xff]  ;;  %v3373_v10 = vld [vmem:[#allocation4 + $0x80] sm:$0xff] }
 0x3c1   : > { %5337 = vmatmul.msk.f32.gmra.mxu2 %vm476_vm0, %v7120_v35  ;;  %3404 = vst.msk [vmem:[#allocation4 + $0x58] sm:$0xff] %vm3188_vm3, %v3386_v3  ;;  %5315 = vmatmul.msk.f32.gmra.mxu1 %vm476_vm0, %v7050_v0  ;;  %v3588_v62 = vadd.f32 %v3570_v15, %v3536_v24  ;;  %v4034_v15 = vld [vmem:[#allocation3 + $0x94] sm:$0xff] }
 0x3c2   : > { %4009 = vst.msk [vmem:[#allocation4 + $0x38] sm:$0xff] %vm3188_vm3, %v3991_v19  ;;  %5355 = vmatmul.msk.f32.gmra.mxu3 %vm476_vm0, %v7096_v57  ;;  %v3772_v35 = vld [vmem:[#allocation4 + $0x48] sm:$0xff] }
 0x3c3   : > { %3606 = vst.msk [vmem:[#allocation4 + $0x50] sm:$0xff] %vm3188_vm3, %v3588_v62  ;;  %v4238_v62 = vld [vmem:[#allocation3 + $0xb8] sm:$0xff] }
 0x3c4   : > { %v3542_v59 = vpop.f32.mrf.mxu2 }
 0x3c5   : > { %v3736_v9 = vpop.f32.mrf.mxu3  ;;  %v3936_v20 = vpop.f32.mrf.mxu0 }
 0x3c6   : > { %v3339_v12 = vpop.f32.mrf.mxu1  ;;  %v3790_v50 = vadd.f32 %v3772_v35, %v3736_v9 }
 0x3c7   : > { %v3387_v46 = vadd.f32 %v3369_v33, %v3339_v12  ;;  %v3974_v7 = vld [vmem:[#allocation4 + $0x40] sm:$0xff] }
 0x3c8   : > { %3808 = vst.msk [vmem:[#allocation4 + $0x48] sm:$0xff] %vm3188_vm3, %v3790_v50  ;;  %v3992_v0 = vadd.f32 %v3974_v7, %v3936_v20  ;;  %5375 = vmatmul.msk.f32.gmra.mxu0 %vm476_vm0, %v7069_v61  ;;  %v3571_v57 = vld [vmem:[#allocation4 + $0x58] sm:$0xff] }
 0x3c9   : > { %5338 = vmatmul.msk.f32.gmra.mxu2 %vm476_vm0, %v7134_v56  ;;  %3405 = vst.msk [vmem:[#allocation4 + $0x60] sm:$0xff] %vm3188_vm3, %v3387_v46  ;;  %5316 = vmatmul.msk.f32.gmra.mxu1 %vm476_vm0, %v7069_v61  ;;  %v3589_v4 = vadd.f32 %v3571_v57, %v3539_v29  ;;  %v3374_v46 = vld [vmem:[#allocation4 + $0x88] sm:$0x1] }
 0x3ca   : > { %4010 = vst.msk [vmem:[#allocation4 + $0x40] sm:$0xff] %vm3188_vm3, %v3992_v0  ;;  %5356 = vmatmul.msk.f32.gmra.mxu3 %vm476_vm0, %v7112_v37  ;;  %v3773_v56 = vld [vmem:[#allocation4 + $0x50] sm:$0xff] }
 0x3cb   : > { %3607 = vst.msk [vmem:[#allocation4 + $0x58] sm:$0xff] %vm3188_vm3, %v3589_v4  ;;  %v4035_v4 = vld [vmem:[#allocation3 + $0x9c] sm:$0xff] }
 0x3cc   : > { %v3545_v28 = vpop.f32.mrf.mxu2 }
 0x3cd   : > { %v3739_v23 = vpop.f32.mrf.mxu3  ;;  %v3939_v63 = vpop.f32.mrf.mxu0 }
 0x3ce   : > { %v3342_v31 = vpop.f32.mrf.mxu1  ;;  %v3791_v6 = vadd.f32 %v3773_v56, %v3739_v23  ;;  %v4439_v56 = vld [vmem:[#allocation3 + $0xaa] sm:$0xff] }
 0x3cf   : > { %v3388_v48 = vadd.f32 %v3370_v52, %v3342_v31  ;;  %v3975_v53 = vld [vmem:[#allocation4 + $0x48] sm:$0xff]  ;;  %v5391_v31 = vld [vmem:[%s7547_s5 + $0x28] sm:$0xf] }
 0x3d0   : > { %3809 = vst.msk [vmem:[#allocation4 + $0x50] sm:$0xff] %vm3188_vm3, %v3791_v6  ;;  %v3993_v61 = vadd.f32 %v3975_v53, %v3939_v63  ;;  %5376 = vmatmul.msk.f32.gmra.mxu0 %vm476_vm0, %v7082_v38  ;;  %v3572_v37 = vld [vmem:[#allocation4 + $0x60] sm:$0xff]  ;;  %5392 = vmatpush.msk.msrb.mxu2 %vm4994_vm6, %v5391_v31 }
 0x3d1   : > { %5339 = vmatmul.msk.f32.gmra.mxu2 %vm476_vm0, %v7149_v14  ;;  %3406 = vst.msk [vmem:[#allocation4 + $0x68] sm:$0xff] %vm3188_vm3, %v3388_v48  ;;  %5317 = vmatmul.msk.f32.gmra.mxu1 %vm476_vm0, %v7082_v38  ;;  %v3590_v44 = vadd.f32 %v3572_v37, %v3542_v59  ;;  %v4990_v6 = vld [vmem:[%s7547_s5 + $0x10] sm:$0xf]  ;;  %v5396_v48 = vld [vmem:[%s7547_s5 + $0x40] sm:$0xf] }
 0x3d2   : > { %4011 = vst.msk [vmem:[#allocation4 + $0x48] sm:$0xff] %vm3188_vm3, %v3993_v61  ;;  %5357 = vmatmul.msk.f32.gmra.mxu3 %vm476_vm0, %v7126_v55  ;;  %v3774_v14 = vld [vmem:[#allocation4 + $0x58] sm:$0xff]  ;;  %5387 = vmatpush.msk.msrb.mxu1 %vm4994_vm6, %v4990_v6  ;;  %v4173_v6 = vld [vmem:[#allocation4 + $0x20] sm:$0xff] }
 0x3d3   : > { %3608 = vst.msk [vmem:[#allocation4 + $0x60] sm:$0xff] %vm3188_vm3, %v3590_v44  ;;  %5397 = vmatpush.msk.msrb.mxu3 %vm4994_vm6, %v5396_v48 }
 0x3d4   : > { %v3548_v2 = vpop.f32.mrf.mxu2 }
 0x3d5   : > { %v3742_v51 = vpop.f32.mrf.mxu3  ;;  %v3942_v58 = vpop.f32.mrf.mxu0 }
 0x3d6   : > { %v3345_v47 = vpop.f32.mrf.mxu1  ;;  %v3792_v1 = vadd.f32 %v3774_v14, %v3742_v51  ;;  %v4169_v51 = vld [vmem:[#allocation4] sm:$0xff] }
 0x3d7   : > { %v3389_v40 = vadd.f32 %v3371_v16, %v3345_v47  ;;  %v3976_v21 = vld [vmem:[#allocation4 + $0x50] sm:$0xff]  ;;  %v4240_v16 = vld [vmem:[#allocation3 + $0xc8] sm:$0x1] }
 0x3d8   : > { %3810 = vst.msk [vmem:[#allocation4 + $0x58] sm:$0xff] %vm3188_vm3, %v3792_v1  ;;  %v3994_v38 = vadd.f32 %v3976_v21, %v3942_v58  ;;  %5377 = vmatmul.msk.f32.gmra.mxu0 %vm476_vm0, %v7098_v32  ;;  %v3573_v55 = vld [vmem:[#allocation4 + $0x68] sm:$0xff]  ;;  %v4036_v47 = vld [vmem:[#allocation3 + $0xa4] sm:$0xff] }
 0x3d9   : > { %5340 = vmatmul.msk.f32.gmra.mxu2 %vm476_vm0, %v4236_v26  ;;  %3407 = vst.msk [vmem:[#allocation4 + $0x70] sm:$0xff] %vm3188_vm3, %v3389_v40  ;;  %5318 = vmatmul.msk.f32.gmra.mxu1 %vm476_vm0, %v7098_v32  ;;  %v3591_v24 = vadd.f32 %v3573_v55, %v3545_v28  ;;  %v4239_v28 = vld [vmem:[#allocation3 + $0xc0] sm:$0xff]  ;;  %v4440_v26 = vld [vmem:[#allocation3 + $0xb2] sm:$0xff] }
 0x3da   : > { %4012 = vst.msk [vmem:[#allocation4 + $0x50] sm:$0xff] %vm3188_vm3, %v3994_v38  ;;  %5358 = vmatmul.msk.f32.gmra.mxu3 %vm476_vm0, %v7141_v17  ;;  %v3775_v41 = vld [vmem:[#allocation4 + $0x60] sm:$0xff] }
 0x3db   : > { %3609 = vst.msk [vmem:[#allocation4 + $0x68] sm:$0xff] %vm3188_vm3, %v3591_v24 }
 0x3dc   : > { %v3551_v30 = vpop.f32.mrf.mxu2 }
 0x3dd   : > { %v3745_v8 = vpop.f32.mrf.mxu3  ;;  %v3945_v54 = vpop.f32.mrf.mxu0 }
 0x3de   : > { %v3348_v13 = vpop.f32.mrf.mxu1  ;;  %v3793_v25 = vadd.f32 %v3775_v41, %v3745_v8 }
 0x3df   : > { %v3390_v5 = vadd.f32 %v3372_v45, %v3348_v13  ;;  %v3977_v22 = vld [vmem:[#allocation4 + $0x58] sm:$0xff] }
 0x3e0   : > { %3811 = vst.msk [vmem:[#allocation4 + $0x60] sm:$0xff] %vm3188_vm3, %v3793_v25  ;;  %v3995_v32 = vadd.f32 %v3977_v22, %v3945_v54  ;;  %5378 = vmatmul.msk.f32.gmra.mxu0 %vm476_vm0, %v4033_v49  ;;  %v3574_v17 = vld [vmem:[#allocation4 + $0x70] sm:$0xff]  ;;  %v4170_v54 = vld [vmem:[#allocation4 + $0x8] sm:$0xff]  ;;  %v4642_v25 = vld [vmem:[#allocation3 + $0xac] sm:$0xff] }
 0x3e1   : > { %5341 = vmatmul.msk.f32.gmra.mxu2 %vm476_vm0, %v4237_v34  ;;  %3408 = vst.msk [vmem:[#allocation4 + $0x78] sm:$0xff] %vm3188_vm3, %v3390_v5  ;;  %5319 = vmatmul.msk.f32.gmra.mxu1 %vm476_vm0, %v4033_v49  ;;  %v3592_v29 = vadd.f32 %v3574_v17, %v3548_v2  ;;  %v4037_v22 = vld [vmem:[#allocation3 + $0xac] sm:$0x1]  ;;  %v4441_v34 = vld [vmem:[#allocation3 + $0xba] sm:$0xff] }
 0x3e2   : > { %4013 = vst.msk [vmem:[#allocation4 + $0x58] sm:$0xff] %vm3188_vm3, %v3995_v32  ;;  %5359 = vmatmul.msk.f32.gmra.mxu3 %vm476_vm0, %v7155_v42  ;;  %v3776_v39 = vld [vmem:[#allocation4 + $0x68] sm:$0xff] }
 0x3e3   : > { %3610 = vst.msk [vmem:[#allocation4 + $0x70] sm:$0xff] %vm3188_vm3, %v3592_v29 }
 0x3e4   : > { %v3554_v18 = vpop.f32.mrf.mxu2 }
 0x3e5   : > { %v3748_v60 = vpop.f32.mrf.mxu3  ;;  %v3948_v43 = vpop.f32.mrf.mxu0 }
 0x3e6   : > { %v3351_v11 = vpop.f32.mrf.mxu1  ;;  %v3794_v3 = vadd.f32 %v3776_v39, %v3748_v60 }
 0x3e7   : > { %v3391_v36 = vadd.f32 %v3373_v10, %v3351_v11  ;;  %v3978_v19 = vld [vmem:[#allocation4 + $0x60] sm:$0xff]  ;;  %v4171_v11 = vld [vmem:[#allocation4 + $0x10] sm:$0xff] }
 0x3e8   : > { %3812 = vst.msk [vmem:[#allocation4 + $0x68] sm:$0xff] %vm3188_vm3, %v3794_v3  ;;  %v3996_v59 = vadd.f32 %v3978_v19, %v3948_v43  ;;  %5379 = vmatmul.msk.f32.gmra.mxu0 %vm476_vm0, %v4034_v15  ;;  %v3575_v42 = vld [vmem:[#allocation4 + $0x78] sm:$0xff] }
 0x3e9   : > { %5342 = vmatmul.msk.f32.gmra.mxu2 %vm476_vm0, %v4238_v62  ;;  %3409 = vst.msk [vmem:[#allocation4 + $0x80] sm:$0xff] %vm3188_vm3, %v3391_v36  ;;  %5320 = vmatmul.msk.f32.gmra.mxu1 %vm476_vm0, %v4034_v15  ;;  %v3593_v9 = vadd.f32 %v3575_v42, %v3551_v30  ;;  %v4643_v36 = vld [vmem:[#allocation3 + $0xb4] sm:$0xff]  ;;  %v4442_v62 = vld [vmem:[#allocation3 + $0xc2] sm:$0xff] }
 0x3ea   : > { %4014 = vst.msk [vmem:[#allocation4 + $0x60] sm:$0xff] %vm3188_vm3, %v3996_v59  ;;  %5360 = vmatmul.msk.f32.gmra.mxu3 %vm476_vm0, %v7166_v27  ;;  %v3777_v12 = vld [vmem:[#allocation4 + $0x70] sm:$0xff] }
 0x3eb   : > { %3611 = vst.msk [vmem:[#allocation4 + $0x78] sm:$0xff] %vm3188_vm3, %v3593_v9 }
 0x3ec   : > { %v3557_v35 = vpop.f32.mrf.mxu2 }
 0x3ed   : > { %v3751_v20 = vpop.f32.mrf.mxu3  ;;  %v3951_v33 = vpop.f32.mrf.mxu0 }
 0x3ee   : > { %v3354_v50 = vpop.f32.mrf.mxu1  ;;  %v3795_v7 = vadd.f32 %v3777_v12, %v3751_v20 }
 0x3ef   : > { %v3392_v0 = vadd.f32 %v3374_v46, %v3354_v50  ;;  %v3979_v57 = vld [vmem:[#allocation4 + $0x68] sm:$0xff] }
 0x3f0   : > { %3813 = vst.msk [vmem:[#allocation4 + $0x70] sm:$0xff] %vm3188_vm3, %v3795_v7  ;;  %v3997_v23 = vadd.f32 %v3979_v57, %v3951_v33  ;;  %5380 = vmatmul.msk.f32.gmra.mxu0 %vm476_vm0, %v4035_v4  ;;  %v3576_v27 = vld [vmem:[#allocation4 + $0x80] sm:$0xff]  ;;  %v4172_v33 = vld [vmem:[#allocation4 + $0x18] sm:$0xff] }
 0x3f1   : > { %5343 = vmatmul.msk.f32.gmra.mxu2 %vm476_vm0, %v4239_v28  ;;  %3410 = vst.msk [vmem:[#allocation4 + $0x88] sm:$0x1] %vm3206_vm5, %v3392_v0  ;;  %5321 = vmatmul.msk.f32.gmra.mxu1 %vm476_vm0, %v4035_v4  ;;  %v3594_v63 = vadd.f32 %v3576_v27, %v3554_v18  ;;  %v4644_v0 = vld [vmem:[#allocation3 + $0xbc] sm:$0xff]  ;;  %v4443_v28 = vld [vmem:[#allocation3 + $0xca] sm:$0x1] }
 0x3f2   : > { %4015 = vst.msk [vmem:[#allocation4 + $0x68] sm:$0xff] %vm3188_vm3, %v3997_v23  ;;  %5361 = vmatmul.msk.f32.gmra.mxu3 %vm476_vm0, %v4439_v56  ;;  %v3778_v61 = vld [vmem:[#allocation4 + $0x78] sm:$0xff] }
 0x3f3   : > { %3612 = vst.msk [vmem:[#allocation4 + $0x80] sm:$0xff] %vm3188_vm3, %v3594_v63 }
 0x3f4   : > { %v4318_v52 = vpop.f32.mrf.mxu2 }
 0x3f5   : > { %v3754_v53 = vpop.f32.mrf.mxu3  ;;  %v3954_v37 = vpop.f32.mrf.mxu0 }
 0x3f6   : > { %v3796_v44 = vadd.f32 %v3778_v61, %v3754_v53  ;;  %v4115_v2 = vpop.f32.mrf.mxu1 }
 0x3f7   : > { %v3980_v14 = vld [vmem:[#allocation4 + $0x70] sm:$0xff]  ;;  %v4187_v58 = vadd.f32 %v4169_v51, %v4115_v2 }
 0x3f8   : > { %v3577_v1 = vld [vmem:[#allocation4 + $0x88] sm:$0x1]  ;;  %3814 = vst.msk [vmem:[#allocation4 + $0x78] sm:$0xff] %vm3188_vm3, %v3796_v44  ;;  %v3998_v40 = vadd.f32 %v3980_v14, %v3954_v37  ;;  %5381 = vmatmul.msk.f32.gmra.mxu0 %vm476_vm0, %v4036_v47  ;;  %v4645_v37 = vld [vmem:[#allocation3 + $0xc4] sm:$0xff] }
 0x3f9   : > { %5344 = vmatmul.msk.f32.gmra.mxu2 %vm476_vm0, %v4240_v16  ;;  %v3595_v21 = vadd.f32 %v3577_v1, %v3557_v35  ;;  %4205 = vst.msk [vmem:[#allocation4] sm:$0xff] %vm3188_vm3, %v4187_v58  ;;  %5322 = vmatmul.msk.f32.gmra.mxu1 %vm476_vm0, %v4036_v47  ;;  %v7365_v1 = vld [vmem:[%s7546_s4] ss:$0 sm:$0xff] }
 0x3fa   : > { %4016 = vst.msk [vmem:[#allocation4 + $0x70] sm:$0xff] %vm3188_vm3, %v3998_v40  ;;  %5362 = vmatmul.msk.f32.gmra.mxu3 %vm476_vm0, %v4440_v26  ;;  %v3779_v24 = vld [vmem:[#allocation4 + $0x80] sm:$0xff] }
 0x3fb   : > { %3613 = vst.msk [vmem:[#allocation4 + $0x88] sm:$0x1] %vm3206_vm5, %v3595_v21  ;;  %v4174_v21 = vld [vmem:[#allocation4 + $0x28] sm:$0xff] }
 0x3fc   : > { %v4321_v38 = vpop.f32.mrf.mxu2 }
 0x3fd   : > { %v3757_v55 = vpop.f32.mrf.mxu3  ;;  %v3957_v30 = vpop.f32.mrf.mxu0 }
 0x3fe   : > { %v3797_v8 = vadd.f32 %v3779_v24, %v3757_v55  ;;  %v4118_v41 = vpop.f32.mrf.mxu1  ;;  %v4646_v24 = vld [vmem:[#allocation3 + $0xcc] sm:$0x1] }
 0x3ff   : > { %v3981_v13 = vld [vmem:[#allocation4 + $0x78] sm:$0xff]  ;;  %v4188_v45 = vadd.f32 %v4170_v54, %v4118_v41 }
 0x400   : > { %3815 = vst.msk [vmem:[#allocation4 + $0x80] sm:$0xff] %vm3188_vm3, %v3797_v8  ;;  %v3999_v5 = vadd.f32 %v3981_v13, %v3957_v30  ;;  %5382 = vmatmul.msk.f32.gmra.mxu0 %vm476_vm0, %v4642_v25  ;;  %v4372_v49 = vld [vmem:[#allocation4] sm:$0xff] }
 0x401   : > { %4206 = vst.msk [vmem:[#allocation4 + $0x8] sm:$0xff] %vm3188_vm3, %v4188_v45  ;;  %5323 = vmatmul.msk.f32.gmra.mxu1 %vm476_vm0, %v4037_v22  ;;  %v4390_v32 = vadd.f32 %v4372_v49, %v4318_v52 }
 0x402   : > { %4017 = vst.msk [vmem:[#allocation4 + $0x78] sm:$0xff] %vm3188_vm3, %v3999_v5  ;;  %5363 = vmatmul.msk.f32.gmra.mxu3 %vm476_vm0, %v4441_v34  ;;  %v3780_v18 = vld [vmem:[#allocation4 + $0x88] sm:$0x1] }
 0x403   : > { %4408 = vst.msk [vmem:[#allocation4] sm:$0xff] %vm3188_vm3, %v4390_v32  ;;  %v4175_v32 = vld [vmem:[#allocation4 + $0x30] sm:$0xff] }
 0x404   : > { %v4324_v17 = vpop.f32.mrf.mxu2 }
 0x405   : > { %v3760_v29 = vpop.f32.mrf.mxu3  ;;  %v3960_v60 = vpop.f32.mrf.mxu0 }
 0x406   : > { %v3798_v39 = vadd.f32 %v3780_v18, %v3760_v29  ;;  %v4121_v43 = vpop.f32.mrf.mxu1 }
 0x407   : > { %v3982_v10 = vld [vmem:[#allocation4 + $0x80] sm:$0xff]  ;;  %v4189_v3 = vadd.f32 %v4171_v11, %v4121_v43 }
 0x408   : > { %3816 = vst.msk [vmem:[#allocation4 + $0x88] sm:$0x1] %vm3206_vm5, %v3798_v39  ;;  %v4000_v19 = vadd.f32 %v3982_v10, %v3960_v60  ;;  %5383 = vmatmul.msk.f32.gmra.mxu0 %vm476_vm0, %v4643_v36  ;;  %v4373_v15 = vld [vmem:[#allocation4 + $0x8] sm:$0xff] }
 0x409   : > { %4207 = vst.msk [vmem:[#allocation4 + $0x10] sm:$0xff] %vm3188_vm3, %v4189_v3  ;;  %v4391_v59 = vadd.f32 %v4373_v15, %v4321_v38 }
 0x40a   : > { %4018 = vst.msk [vmem:[#allocation4 + $0x80] sm:$0xff] %vm3188_vm3, %v4000_v19  ;;  %5364 = vmatmul.msk.f32.gmra.mxu3 %vm476_vm0, %v4442_v62  ;;  %v4575_v20 = vld [vmem:[#allocation4] sm:$0xff] }
 0x40b   : > { %4409 = vst.msk [vmem:[#allocation4 + $0x8] sm:$0xff] %vm3188_vm3, %v4391_v59 }
 0x40c   : > { %v4327_v42 = vpop.f32.mrf.mxu2 }
 0x40d   : > { %v3963_v9 = vpop.f32.mrf.mxu0  ;;  %v4521_v35 = vpop.f32.mrf.mxu3 }
 0x40e   : > { %v4124_v12 = vpop.f32.mrf.mxu1  ;;  %v4593_v50 = vadd.f32 %v4575_v20, %v4521_v35 }
 0x40f   : > { %v3983_v46 = vld [vmem:[#allocation4 + $0x88] sm:$0x1]  ;;  %v4190_v7 = vadd.f32 %v4172_v33, %v4124_v12 }
 0x410   : > { %v4001_v57 = vadd.f32 %v3983_v46, %v3963_v9  ;;  %4611 = vst.msk [vmem:[#allocation4] sm:$0xff] %vm3188_vm3, %v4593_v50  ;;  %5384 = vmatmul.msk.f32.gmra.mxu0 %vm476_vm0, %v4644_v0  ;;  %v4374_v4 = vld [vmem:[#allocation4 + $0x10] sm:$0xff] }
 0x411   : > { %4208 = vst.msk [vmem:[#allocation4 + $0x18] sm:$0xff] %vm3188_vm3, %v4190_v7  ;;  %v4392_v23 = vadd.f32 %v4374_v4, %v4324_v17  ;;  %v4177_v4 = vld [vmem:[#allocation4 + $0x40] sm:$0xff] }
 0x412   : > { %4019 = vst.msk [vmem:[#allocation4 + $0x88] sm:$0x1] %vm3206_vm5, %v4001_v57  ;;  %5365 = vmatmul.msk.f32.gmra.mxu3 %vm476_vm0, %v4443_v28  ;;  %v4576_v63 = vld [vmem:[#allocation4 + $0x8] sm:$0xff] }
 0x413   : > { %4410 = vst.msk [vmem:[#allocation4 + $0x10] sm:$0xff] %vm3188_vm3, %v4392_v23 }
 0x414   : > { %v4330_v27 = vpop.f32.mrf.mxu2 }
 0x415   : > { %v4524_v56 = vpop.f32.mrf.mxu3  ;;  %v4724_v31 = vpop.f32.mrf.mxu0 }
 0x416   : > { %v4127_v52 = vpop.f32.mrf.mxu1  ;;  %v4594_v48 = vadd.f32 %v4576_v63, %v4524_v56 }
 0x417   : > { %v4191_v53 = vadd.f32 %v4173_v6, %v4127_v52  ;;  %v4778_v61 = vld [vmem:[#allocation4] sm:$0xff]  ;;  %v4989_v52 = vld [vmem:[%s7547_s5 + $0x8] sm:$0xff]  ;;  %v5395_v6 = vld [vmem:[%s7547_s5 + $0x38] sm:$0xff] }
 0x418   : > { %4612 = vst.msk [vmem:[#allocation4 + $0x8] sm:$0xff] %vm3188_vm3, %v4594_v48  ;;  %v4796_v44 = vadd.f32 %v4778_v61, %v4724_v31  ;;  %5385 = vmatmul.msk.f32.gmra.mxu0 %vm476_vm0, %v4645_v37  ;;  %v4375_v2 = vld [vmem:[#allocation4 + $0x18] sm:$0xff]  ;;  %v5390_v31 = vld [vmem:[%s7547_s5 + $0x20] sm:$0xff]  ;;  %5012 = vmatpush.msrb.mxu1 %v4989_v52 }
 0x419   : > { %4209 = vst.msk [vmem:[#allocation4 + $0x20] sm:$0xff] %vm3188_vm3, %v4191_v53  ;;  %v4393_v51 = vadd.f32 %v4375_v2, %v4327_v42  ;;  %v4176_v42 = vld [vmem:[#allocation4 + $0x38] sm:$0xff]  ;;  %5044 = vmatpush.msrb.mxu2 %v5390_v31  ;;  %5076 = vmatpush.msrb.mxu3 %v5395_v6 }
 0x41a   : > { %4814 = vst.msk [vmem:[#allocation4] sm:$0xff] %vm3188_vm3, %v4796_v44  ;;  %v4577_v47 = vld [vmem:[#allocation4 + $0x10] sm:$0xff] }
 0x41b   : > { %4411 = vst.msk [vmem:[#allocation4 + $0x18] sm:$0xff] %vm3188_vm3, %v4393_v51 }
 0x41c   : > { %v4333_v14 = vpop.f32.mrf.mxu2 }
 0x41d   : > { %v4527_v58 = vpop.f32.mrf.mxu3  ;;  %v4727_v16 = vpop.f32.mrf.mxu0 }
 0x41e   : > { %v4130_v40 = vpop.f32.mrf.mxu1  ;;  %v4595_v26 = vadd.f32 %v4577_v47, %v4527_v58 }
 0x41f   : > { %v4192_v38 = vadd.f32 %v4174_v21, %v4130_v40  ;;  %v4779_v55 = vld [vmem:[#allocation4 + $0x8] sm:$0xff] }
 0x420   : > { %4613 = vst.msk [vmem:[#allocation4 + $0x10] sm:$0xff] %vm3188_vm3, %v4595_v26  ;;  %v4797_v30 = vadd.f32 %v4779_v55, %v4727_v16  ;;  %5386 = vmatmul.msk.f32.gmra.mxu0 %vm476_vm0, %v4646_v24  ;;  %v4376_v8 = vld [vmem:[#allocation4 + $0x20] sm:$0xff]  ;;  %v4178_v26 = vld [vmem:[#allocation4 + $0x48] sm:$0xff] }
 0x421   : > { %v4832_v41 = vld [vmem:[#allocation4] sm:$0xff]  ;;  %4210 = vst.msk [vmem:[#allocation4 + $0x28] sm:$0xff] %vm3188_vm3, %v4192_v38  ;;  %v4394_v54 = vadd.f32 %v4376_v8, %v4330_v27 }
 0x422   : > { %v4854_v13 = vadd.f32 %v7365_v1, %v4832_v41  ;;  %4815 = vst.msk [vmem:[#allocation4 + $0x8] sm:$0xff] %vm3188_vm3, %v4797_v30  ;;  %v4578_v22 = vld [vmem:[#allocation4 + $0x18] sm:$0xff] }
 0x423   : > { %4412 = vst.msk [vmem:[#allocation4 + $0x20] sm:$0xff] %vm3188_vm3, %v4394_v54 }
 0x424   : > { %v4336_v45 = vpop.f32.mrf.mxu2  ;;  %v4872_v25 = vmax.f32 %v4854_v13, 0.0 }
 0x425   : > { %v4530_v5 = vpop.f32.mrf.mxu3  ;;  %v4730_v49 = vpop.f32.mrf.mxu0 }
 0x426   : > { %4890 = vst.msk [vmem:[#allocation4] sm:$0xff] %vm3188_vm3, %v4872_v25  ;;  %v4133_v34 = vpop.f32.mrf.mxu1  ;;  %v4596_v17 = vadd.f32 %v4578_v22, %v4530_v5 }
 0x427   : > { %v4193_v29 = vadd.f32 %v4175_v32, %v4133_v34  ;;  %v4780_v18 = vld [vmem:[#allocation4 + $0x10] sm:$0xff] }
 0x428   : > { %4614 = vst.msk [vmem:[#allocation4 + $0x18] sm:$0xff] %vm3188_vm3, %v4596_v17  ;;  %v4798_v60 = vadd.f32 %v4780_v18, %v4730_v49  ;;  %v4377_v39 = vld [vmem:[#allocation4 + $0x28] sm:$0xff]  ;;  %v4179_v32 = vld [vmem:[#allocation4 + $0x50] sm:$0xff] }
 0x429   : > { %v4833_v43 = vld [vmem:[#allocation4 + $0x8] sm:$0xff]  ;;  %4211 = vst.msk [vmem:[#allocation4 + $0x30] sm:$0xff] %vm3188_vm3, %v4193_v29  ;;  %v4395_v11 = vadd.f32 %v4377_v39, %v4333_v14 }
 0x42a   : > { %v4855_v10 = vadd.f32 %v7365_v1, %v4833_v43  ;;  %4816 = vst.msk [vmem:[#allocation4 + $0x10] sm:$0xff] %vm3188_vm3, %v4798_v60  ;;  %v4579_v15 = vld [vmem:[#allocation4 + $0x20] sm:$0xff]  ;;  %v4988_v60 = vld [vmem:[%s7547_s5] sm:$0xff]  ;;  %v5389_v39 = vld [vmem:[%s7547_s5 + $0x18] sm:$0xff] }
 0x42b   : > { %4413 = vst.msk [vmem:[#allocation4 + $0x28] sm:$0xff] %vm3188_vm3, %v4395_v11  ;;  %5013 = vmatpush.msrb.mxu1 %v4988_v60  ;;  %5045 = vmatpush.msrb.mxu2 %v5389_v39 }
 0x42c   : > { %v4339_v3 = vpop.f32.mrf.mxu2  ;;  %v4873_v36 = vmax.f32 %v4855_v10, 0.0 }
 0x42d   : > { %v4533_v19 = vpop.f32.mrf.mxu3  ;;  %v4733_v62 = vpop.f32.mrf.mxu0 }
 0x42e   : > { %4891 = vst.msk [vmem:[#allocation4 + $0x8] sm:$0xff] %vm3188_vm3, %v4873_v36  ;;  %v4136_v59 = vpop.f32.mrf.mxu1  ;;  %v4597_v9 = vadd.f32 %v4579_v15, %v4533_v19 }
 0x42f   : > { %v4194_v35 = vadd.f32 %v4176_v42, %v4136_v59  ;;  %v4781_v20 = vld [vmem:[#allocation4 + $0x18] sm:$0xff] }
 0x430   : > { %4615 = vst.msk [vmem:[#allocation4 + $0x20] sm:$0xff] %vm3188_vm3, %v4597_v9  ;;  %v4799_v12 = vadd.f32 %v4781_v20, %v4733_v62  ;;  %v4378_v33 = vld [vmem:[#allocation4 + $0x30] sm:$0xff] }
 0x431   : > { %v4834_v50 = vld [vmem:[#allocation4 + $0x10] sm:$0xff]  ;;  %4212 = vst.msk [vmem:[#allocation4 + $0x38] sm:$0xff] %vm3188_vm3, %v4194_v35  ;;  %v4396_v46 = vadd.f32 %v4378_v33, %v4336_v45  ;;  %v4180_v35 = vld [vmem:[#allocation4 + $0x58] sm:$0xff] }
 0x432   : > { %v4856_v7 = vadd.f32 %v7365_v1, %v4834_v50  ;;  %4817 = vst.msk [vmem:[#allocation4 + $0x18] sm:$0xff] %vm3188_vm3, %v4799_v12  ;;  %v4580_v23 = vld [vmem:[#allocation4 + $0x28] sm:$0xff] }
 0x433   : > { %4414 = vst.msk [vmem:[#allocation4 + $0x30] sm:$0xff] %vm3188_vm3, %v4396_v46 }
 0x434   : > { %v4342_v0 = vpop.f32.mrf.mxu2  ;;  %v4874_v57 = vmax.f32 %v4856_v7, 0.0 }
 0x435   : > { %v4536_v28 = vpop.f32.mrf.mxu3  ;;  %v4736_v27 = vpop.f32.mrf.mxu0 }
 0x436   : > { %4892 = vst.msk [vmem:[#allocation4 + $0x10] sm:$0xff] %vm3188_vm3, %v4874_v57  ;;  %v4139_v56 = vpop.f32.mrf.mxu1  ;;  %v4598_v63 = vadd.f32 %v4580_v23, %v4536_v28  ;;  %v4908_v28 = vld [vmem:[#allocation4] sm:$0xff] }
 0x437   : > { %v4195_v48 = vadd.f32 %v4177_v4, %v4139_v56  ;;  %v4782_v53 = vld [vmem:[#allocation4 + $0x20] sm:$0xff] }
 0x438   : > { %4616 = vst.msk [vmem:[#allocation4 + $0x28] sm:$0xff] %vm3188_vm3, %v4598_v63  ;;  %v4800_v61 = vadd.f32 %v4782_v53, %v4736_v27  ;;  %v4379_v37 = vld [vmem:[#allocation4 + $0x38] sm:$0xff]  ;;  %v4925_v4 = vld [vmem:[#allocation4 + $0x2] sm:$0xff] }
 0x439   : > { %v4835_v44 = vld [vmem:[#allocation4 + $0x18] sm:$0xff]  ;;  %4213 = vst.msk [vmem:[#allocation4 + $0x40] sm:$0xff] %vm3188_vm3, %v4195_v48  ;;  %v4397_v2 = vadd.f32 %v4379_v37, %v4339_v3  ;;  %v4942_v6 = vmax.f32 %v4908_v28, %v4925_v4  ;;  %v4181_v37 = vld [vmem:[#allocation4 + $0x60] sm:$0xff] }
 0x43a   : > { %v4857_v51 = vadd.f32 %v7365_v1, %v4835_v44  ;;  %4818 = vst.msk [vmem:[#allocation4 + $0x20] sm:$0xff] %vm3188_vm3, %v4800_v61  ;;  %v4581_v16 = vld [vmem:[#allocation4 + $0x30] sm:$0xff] }
 0x43b   : > { %4415 = vst.msk [vmem:[#allocation4 + $0x38] sm:$0xff] %vm3188_vm3, %v4397_v2 }
 0x43c   : > { %v4345_v14 = vpop.f32.mrf.mxu2  ;;  %v4875_v58 = vmax.f32 %v4857_v51, 0.0 }
 0x43d   : > { %v4539_v47 = vpop.f32.mrf.mxu3  ;;  %v4739_v40 = vpop.f32.mrf.mxu0 }
 0x43e   : > { %4893 = vst.msk [vmem:[#allocation4 + $0x18] sm:$0xff] %vm3188_vm3, %v4875_v58  ;;  %v4142_v21 = vpop.f32.mrf.mxu1  ;;  %v4599_v38 = vadd.f32 %v4581_v16, %v4539_v47 }
 0x43f   : > { %v4196_v55 = vadd.f32 %v4178_v26, %v4142_v21  ;;  %v4783_v24 = vld [vmem:[#allocation4 + $0x28] sm:$0xff] }
 0x440   : > { %4617 = vst.msk [vmem:[#allocation4 + $0x30] sm:$0xff] %vm3188_vm3, %v4599_v38  ;;  %v4801_v30 = vadd.f32 %v4783_v24, %v4739_v40  ;;  %v4380_v8 = vld [vmem:[#allocation4 + $0x40] sm:$0xff] }
 0x441   : > { %v4836_v41 = vld [vmem:[#allocation4 + $0x20] sm:$0xff]  ;;  %4214 = vst.msk [vmem:[#allocation4 + $0x48] sm:$0xff] %vm3188_vm3, %v4196_v55  ;;  %v4398_v54 = vadd.f32 %v4380_v8, %v4342_v0  ;;  %v4182_v8 = vld [vmem:[#allocation4 + $0x68] sm:$0xff] }
 0x442   : > { %v4858_v13 = vadd.f32 %v7365_v1, %v4836_v41  ;;  %4819 = vst.msk [vmem:[#allocation4 + $0x28] sm:$0xff] %vm3188_vm3, %v4801_v30  ;;  %v4582_v22 = vld [vmem:[#allocation4 + $0x38] sm:$0xff] }
 0x443   : > { %4416 = vst.msk [vmem:[#allocation4 + $0x40] sm:$0xff] %vm3188_vm3, %v4398_v54 }
 0x444   : > { %v4348_v45 = vpop.f32.mrf.mxu2  ;;  %v4876_v25 = vmax.f32 %v4858_v13, 0.0 }
 0x445   : > { %v4542_v5 = vpop.f32.mrf.mxu3  ;;  %v4742_v49 = vpop.f32.mrf.mxu0 }
 0x446   : > { %4894 = vst.msk [vmem:[#allocation4 + $0x20] sm:$0xff] %vm3188_vm3, %v4876_v25  ;;  %v4145_v34 = vpop.f32.mrf.mxu1  ;;  %v4600_v17 = vadd.f32 %v4582_v22, %v4542_v5 }
 0x447   : > { %v4197_v29 = vadd.f32 %v4179_v32, %v4145_v34  ;;  %v4784_v18 = vld [vmem:[#allocation4 + $0x30] sm:$0xff] }
 0x448   : > { %4618 = vst.msk [vmem:[#allocation4 + $0x38] sm:$0xff] %vm3188_vm3, %v4600_v17  ;;  %v4802_v43 = vadd.f32 %v4784_v18, %v4742_v49  ;;  %v4381_v11 = vld [vmem:[#allocation4 + $0x48] sm:$0xff] }
 0x449   : > { %v4837_v10 = vld [vmem:[#allocation4 + $0x28] sm:$0xff]  ;;  %4215 = vst.msk [vmem:[#allocation4 + $0x50] sm:$0xff] %vm3188_vm3, %v4197_v29  ;;  %v4399_v3 = vadd.f32 %v4381_v11, %v4345_v14  ;;  %v4183_v11 = vld [vmem:[#allocation4 + $0x70] sm:$0xff] }
 0x44a   : > { %v4859_v36 = vadd.f32 %v7365_v1, %v4837_v10  ;;  %4820 = vst.msk [vmem:[#allocation4 + $0x30] sm:$0xff] %vm3188_vm3, %v4802_v43  ;;  %v4583_v59 = vld [vmem:[#allocation4 + $0x40] sm:$0xff] }
 0x44b   : > { %4417 = vst.msk [vmem:[#allocation4 + $0x48] sm:$0xff] %vm3188_vm3, %v4399_v3 }
 0x44c   : > { %v4877_v19 = vmax.f32 %v4859_v36, 0.0  ;;  %v4351_v15 = vpop.f32.mrf.mxu2 }
 0x44d   : > { %v4545_v62 = vpop.f32.mrf.mxu3  ;;  %v4745_v42 = vpop.f32.mrf.mxu0  ;;  %v4912_v27 = vld [vmem:[#allocation4 + $0x20] sm:$0xff] }
 0x44e   : > { %4895 = vst.msk [vmem:[#allocation4 + $0x28] sm:$0xff] %vm3188_vm3, %v4877_v19  ;;  %v4148_v9 = vpop.f32.mrf.mxu1  ;;  %v4601_v20 = vadd.f32 %v4583_v59, %v4545_v62 }
 0x44f   : > { %v4198_v12 = vadd.f32 %v4180_v35, %v4148_v9  ;;  %v4785_v33 = vld [vmem:[#allocation4 + $0x38] sm:$0xff]  ;;  %v5394_v35 = vld [vmem:[%s7547_s5 + $0x30] sm:$0xff] }
 0x450   : > { %4619 = vst.msk [vmem:[#allocation4 + $0x40] sm:$0xff] %vm3188_vm3, %v4601_v20  ;;  %v4803_v50 = vadd.f32 %v4785_v33, %v4745_v42  ;;  %v4382_v46 = vld [vmem:[#allocation4 + $0x50] sm:$0xff]  ;;  %5077 = vmatpush.msrb.mxu3 %v5394_v35 }
 0x451   : > { %v4838_v7 = vld [vmem:[#allocation4 + $0x30] sm:$0xff]  ;;  %4216 = vst.msk [vmem:[#allocation4 + $0x58] sm:$0xff] %vm3188_vm3, %v4198_v12  ;;  %v4400_v0 = vadd.f32 %v4382_v46, %v4348_v45 }
 0x452   : > { %v4860_v57 = vadd.f32 %v7365_v1, %v4838_v7  ;;  %4821 = vst.msk [vmem:[#allocation4 + $0x38] sm:$0xff] %vm3188_vm3, %v4803_v50  ;;  %v4584_v31 = vld [vmem:[#allocation4 + $0x48] sm:$0xff]  ;;  %v4184_v7 = vld [vmem:[#allocation4 + $0x78] sm:$0xff] }
 0x453   : > { %4418 = vst.msk [vmem:[#allocation4 + $0x50] sm:$0xff] %vm3188_vm3, %v4400_v0 }
 0x454   : > { %v4878_v23 = vmax.f32 %v4860_v57, 0.0  ;;  %v4354_v53 = vpop.f32.mrf.mxu2 }
 0x455   : > { %v4929_v56 = vld [vmem:[#allocation4 + $0x22] sm:$0xff]  ;;  %v4548_v63 = vpop.f32.mrf.mxu3  ;;  %v4748_v52 = vpop.f32.mrf.mxu0 }
 0x456   : > { %v4946_v48 = vmax.f32 %v4912_v27, %v4929_v56  ;;  %4896 = vst.msk [vmem:[#allocation4 + $0x30] sm:$0xff] %vm3188_vm3, %v4878_v23  ;;  %v4151_v61 = vpop.f32.mrf.mxu1  ;;  %v4602_v44 = vadd.f32 %v4584_v31, %v4548_v63 }
 0x457   : > { %v4199_v2 = vadd.f32 %v4181_v37, %v4151_v61  ;;  %v4786_v51 = vld [vmem:[#allocation4 + $0x40] sm:$0xff] }
 0x458   : > { %4620 = vst.msk [vmem:[#allocation4 + $0x48] sm:$0xff] %vm3188_vm3, %v4602_v44  ;;  %v4804_v14 = vadd.f32 %v4786_v51, %v4748_v52  ;;  %v4959_v58 = vmax.f32 %v4942_v6, %v4946_v48  ;;  %v4383_v47 = vld [vmem:[#allocation4 + $0x58] sm:$0xff] }
 0x459   : > { %v4839_v16 = vld [vmem:[#allocation4 + $0x38] sm:$0xff]  ;;  %4217 = vst.msk [vmem:[#allocation4 + $0x60] sm:$0xff] %vm3188_vm3, %v4199_v2  ;;  %v4401_v40 = vadd.f32 %v4383_v47, %v4351_v15  ;;  %v4185_v2 = vld [vmem:[#allocation4 + $0x80] sm:$0xff] }
 0x45a   : > { %v4861_v21 = vadd.f32 %v7365_v1, %v4839_v16  ;;  %4822 = vst.msk [vmem:[#allocation4 + $0x40] sm:$0xff] %vm3188_vm3, %v4804_v14  ;;  %v4585_v55 = vld [vmem:[#allocation4 + $0x50] sm:$0xff] }
 0x45b   : > { %4972 = vst.msk [vmem:[#allocation5] sm:$0xff] %vm3188_vm3, %v4959_v58 }
 0x45c   : > { %v4879_v26 = vmax.f32 %v4861_v21, 0.0  ;;  %4419 = vst.msk [vmem:[#allocation4 + $0x58] sm:$0xff] %vm3188_vm3, %v4401_v40  ;;  %v4357_v45 = vpop.f32.mrf.mxu2 }
 0x45d   : > { %v4551_v38 = vpop.f32.mrf.mxu3  ;;  %v4751_v24 = vpop.f32.mrf.mxu0 }
 0x45e   : > { %4897 = vst.msk [vmem:[#allocation4 + $0x38] sm:$0xff] %vm3188_vm3, %v4879_v26  ;;  %v4154_v30 = vpop.f32.mrf.mxu1  ;;  %v4603_v41 = vadd.f32 %v4585_v55, %v4551_v38 }
 0x45f   : > { %v4200_v54 = vadd.f32 %v4182_v8, %v4154_v30  ;;  %v4787_v13 = vld [vmem:[#allocation4 + $0x48] sm:$0xff] }
 0x460   : > { %4621 = vst.msk [vmem:[#allocation4 + $0x50] sm:$0xff] %vm3188_vm3, %v4603_v41  ;;  %v4805_v25 = vadd.f32 %v4787_v13, %v4751_v24  ;;  %v4384_v5 = vld [vmem:[#allocation4 + $0x60] sm:$0xff]  ;;  %v4186_v13 = vld [vmem:[#allocation4 + $0x88] sm:$0x1] }
 0x461   : > { %v4840_v22 = vld [vmem:[#allocation4 + $0x40] sm:$0xff]  ;;  %4218 = vst.msk [vmem:[#allocation4 + $0x68] sm:$0xff] %vm3188_vm3, %v4200_v54  ;;  %v4402_v49 = vadd.f32 %v4384_v5, %v4354_v53 }
 0x462   : > { %v4862_v34 = vadd.f32 %v7365_v1, %v4840_v22  ;;  %v4987_v32 = vld [vmem:[#allocation5] sm:$0x1]  ;;  %v5019_v17 = vld [vmem:[#allocation5 + $0x4] sm:$0x1]  ;;  %4823 = vst.msk [vmem:[#allocation4 + $0x48] sm:$0xff] %vm3188_vm3, %v4805_v25 }
 0x463   : > { %5388 = vmatmul.msk.f32.vlgmr.msrb.gmra.mxu1 %vm3188_vm3, %v4987_v32  ;;  %5393 = vmatmul.msk.f32.vlgmr.msrb.gmra.mxu2 %vm3188_vm3, %v5019_v17  ;;  %4420 = vst.msk [vmem:[#allocation4 + $0x60] sm:$0xff] %vm3188_vm3, %v4402_v49  ;;  %v4586_v60 = vld [vmem:[#allocation4 + $0x58] sm:$0xff] }
 0x464   : > { %v4880_v29 = vmax.f32 %v4862_v34, 0.0  ;;  %v4360_v42 = vpop.f32.mrf.mxu2 }
 0x465   : > { %v4554_v18 = vpop.f32.mrf.mxu3  ;;  %v4754_v39 = vpop.f32.mrf.mxu0 }
 0x466   : > { %4898 = vst.msk [vmem:[#allocation4 + $0x40] sm:$0xff] %vm3188_vm3, %v4880_v29  ;;  %v4157_v43 = vpop.f32.mrf.mxu1  ;;  %v4604_v10 = vadd.f32 %v4586_v60, %v4554_v18  ;;  %v5401_v29 = vld [vmem:[%s7547_s5 + $0x58] sm:$0xf] }
 0x467   : > { %v4201_v3 = vadd.f32 %v4183_v11, %v4157_v43  ;;  %v4788_v36 = vld [vmem:[#allocation4 + $0x50] sm:$0xff]  ;;  %5402 = vmatpush.msk.msra.mxu1 %vm4994_vm6, %v5401_v29  ;;  %v5400_v11 = vld [vmem:[%s7547_s5 + $0x50] sm:$0xff] }
 0x468   : > { %4622 = vst.msk [vmem:[#allocation4 + $0x58] sm:$0xff] %vm3188_vm3, %v4604_v10  ;;  %v4806_v19 = vadd.f32 %v4788_v36, %v4754_v39  ;;  %v4385_v15 = vld [vmem:[#allocation4 + $0x68] sm:$0xff]  ;;  %v5399_v36 = vld [vmem:[%s7547_s5 + $0x48] sm:$0xff] }
 0x469   : > { %4219 = vst.msk [vmem:[#allocation4 + $0x70] sm:$0xff] %vm3188_vm3, %v4201_v3  ;;  %v4403_v62 = vadd.f32 %v4385_v15, %v4357_v45  ;;  %v4841_v59 = vld [vmem:[#allocation4 + $0x48] sm:$0xff]  ;;  %5108 = vmatpush.msra.mxu1 %v5400_v11 }
 0x46a   : > { %v4863_v9 = vadd.f32 %v7365_v1, %v4841_v59  ;;  %4824 = vst.msk [vmem:[#allocation4 + $0x50] sm:$0xff] %vm3188_vm3, %v4806_v19  ;;  %v4587_v33 = vld [vmem:[#allocation4 + $0x60] sm:$0xff] }
 0x46b   : > { %4421 = vst.msk [vmem:[#allocation4 + $0x68] sm:$0xff] %vm3188_vm3, %v4403_v62  ;;  %5109 = vmatpush.msra.mxu1 %v5399_v36 }
 0x46c   : > { %v4881_v20 = vmax.f32 %v4863_v9, 0.0  ;;  %v4363_v31 = vpop.f32.mrf.mxu2 }
 0x46d   : > { %v4557_v12 = vpop.f32.mrf.mxu3  ;;  %v4757_v50 = vpop.f32.mrf.mxu0  ;;  %v7454_v61 = vld [vmem:[#allocation4 + $0x40] sm:$0xff] }
 0x46e   : > { %v4160_v46 = vpop.f32.mrf.mxu1  ;;  %v4605_v0 = vadd.f32 %v4587_v33, %v4557_v12  ;;  %4899 = vst.msk [vmem:[#allocation4 + $0x48] sm:$0xff] %vm3188_vm3, %v4881_v20 }
 0x46f   : > { %v4202_v57 = vadd.f32 %v4184_v7, %v4160_v46  ;;  %v4789_v4 = vld [vmem:[#allocation4 + $0x58] sm:$0xff] }
 0x470   : > { %4623 = vst.msk [vmem:[#allocation4 + $0x60] sm:$0xff] %vm3188_vm3, %v4605_v0  ;;  %v4807_v28 = vadd.f32 %v4789_v4, %v4757_v50  ;;  %v4386_v23 = vld [vmem:[#allocation4 + $0x70] sm:$0xff] }
 0x471   : > { %4220 = vst.msk [vmem:[#allocation4 + $0x78] sm:$0xff] %vm3188_vm3, %v4202_v57  ;;  %v4404_v27 = vadd.f32 %v4386_v23, %v4360_v42  ;;  %v4842_v56 = vld [vmem:[#allocation4 + $0x50] sm:$0xff] }
 0x472   : > { %v4864_v63 = vadd.f32 %v7365_v1, %v4842_v56  ;;  %4825 = vst.msk [vmem:[#allocation4 + $0x58] sm:$0xff] %vm3188_vm3, %v4807_v28  ;;  %v4588_v48 = vld [vmem:[#allocation4 + $0x68] sm:$0xff] }
 0x473   : > { %4422 = vst.msk [vmem:[#allocation4 + $0x70] sm:$0xff] %vm3188_vm3, %v4404_v27 }
 0x474   : > { %v4882_v52 = vmax.f32 %v4864_v63, 0.0  ;;  %v4366_v41 = vpop.f32.mrf.mxu2 }
 0x475   : > { %v4560_v6 = vpop.f32.mrf.mxu3  ;;  %v4760_v53 = vpop.f32.mrf.mxu0  ;;  %v7456_v37 = vld [vmem:[#allocation4 + $0x42] sm:$0xff] }
 0x476   : > { %v4163_v44 = vpop.f32.mrf.mxu1  ;;  %v4606_v51 = vadd.f32 %v4588_v48, %v4560_v6  ;;  %v4950_v14 = vmax.f32 %v7454_v61, %v7456_v37  ;;  %4900 = vst.msk [vmem:[#allocation4 + $0x50] sm:$0xff] %vm3188_vm3, %v4882_v52 }
 0x477   : > { %v4203_v58 = vadd.f32 %v4185_v2, %v4163_v44  ;;  %v4790_v47 = vld [vmem:[#allocation4 + $0x60] sm:$0xff] }
 0x478   : > { %4624 = vst.msk [vmem:[#allocation4 + $0x68] sm:$0xff] %vm3188_vm3, %v4606_v51  ;;  %v4808_v16 = vadd.f32 %v4790_v47, %v4760_v53  ;;  %v4387_v40 = vld [vmem:[#allocation4 + $0x78] sm:$0xff] }
 0x479   : > { %4221 = vst.msk [vmem:[#allocation4 + $0x80] sm:$0xff] %vm3188_vm3, %v4203_v58  ;;  %v4405_v21 = vadd.f32 %v4387_v40, %v4363_v31  ;;  %v4843_v26 = vld [vmem:[#allocation4 + $0x58] sm:$0xff] }
 0x47a   : > { %4826 = vst.msk [vmem:[#allocation4 + $0x60] sm:$0xff] %vm3188_vm3, %v4808_v16  ;;  %v4865_v38 = vadd.f32 %v7365_v1, %v4843_v26  ;;  %v4589_v30 = vld [vmem:[#allocation4 + $0x70] sm:$0xff] }
 0x47b   : > { %4423 = vst.msk [vmem:[#allocation4 + $0x78] sm:$0xff] %vm3188_vm3, %v4405_v21 }
 0x47c   : > { %v4883_v55 = vmax.f32 %v4865_v38, 0.0  ;;  %v4369_v19 = vpop.f32.mrf.mxu2 }
 0x47d   : > { %v4563_v24 = vpop.f32.mrf.mxu3  ;;  %v4763_v8 = vpop.f32.mrf.mxu0 }
 0x47e   : > { %v4166_v54 = vpop.f32.mrf.mxu1  ;;  %v4607_v45 = vadd.f32 %v4589_v30, %v4563_v24  ;;  %4901 = vst.msk [vmem:[#allocation4 + $0x58] sm:$0xff] %vm3188_vm3, %v4883_v55  ;;  %v4986_v24 = vld [vmem:[%s7548_s6] sm:$0x1] }
 0x47f   : > { %v4204_v25 = vadd.f32 %v4186_v13, %v4166_v54  ;;  %v4791_v5 = vld [vmem:[#allocation4 + $0x68] sm:$0xff] }
 0x480   : > { %4625 = vst.msk [vmem:[#allocation4 + $0x70] sm:$0xff] %vm3188_vm3, %v4607_v45  ;;  %v4809_v22 = vadd.f32 %v4791_v5, %v4763_v8  ;;  %v4388_v49 = vld [vmem:[#allocation4 + $0x80] sm:$0xff] }
 0x481   : > { %v4844_v34 = vld [vmem:[#allocation4 + $0x60] sm:$0xff]  ;;  %4222 = vst.msk [vmem:[#allocation4 + $0x88] sm:$0x1] %vm3206_vm5, %v4204_v25  ;;  %v4406_v32 = vadd.f32 %v4388_v49, %v4366_v41 }
 0x482   : > { %v4866_v17 = vadd.f32 %v7365_v1, %v4844_v34  ;;  %4827 = vst.msk [vmem:[#allocation4 + $0x68] sm:$0xff] %vm3188_vm3, %v4809_v22  ;;  %v4590_v39 = vld [vmem:[#allocation4 + $0x78] sm:$0xff] }
 0x483   : > { %4424 = vst.msk [vmem:[#allocation4 + $0x80] sm:$0xff] %vm3188_vm3, %v4406_v32 }
 0x484   : > { %v4884_v18 = vmax.f32 %v4866_v17, 0.0 }
 0x485   : > { %v4566_v60 = vpop.f32.mrf.mxu3  ;;  %v4766_v43 = vpop.f32.mrf.mxu0 }
 0x486   : > { %4902 = vst.msk [vmem:[#allocation4 + $0x60] sm:$0xff] %vm3188_vm3, %v4884_v18  ;;  %v4608_v10 = vadd.f32 %v4590_v39, %v4566_v60 }
 0x487   : > { %v4792_v3 = vld [vmem:[#allocation4 + $0x70] sm:$0xff] }
 0x488   : > { %v4389_v15 = vld [vmem:[#allocation4 + $0x88] sm:$0x1]  ;;  %4626 = vst.msk [vmem:[#allocation4 + $0x78] sm:$0xff] %vm3188_vm3, %v4608_v10  ;;  %v4810_v62 = vadd.f32 %v4792_v3, %v4766_v43 }
 0x489   : > { %v4407_v59 = vadd.f32 %v4389_v15, %v4369_v19  ;;  %v4845_v42 = vld [vmem:[#allocation4 + $0x68] sm:$0xff] }
 0x48a   : > { %v4867_v9 = vadd.f32 %v7365_v1, %v4845_v42  ;;  %4828 = vst.msk [vmem:[#allocation4 + $0x70] sm:$0xff] %vm3188_vm3, %v4810_v62  ;;  %v4591_v12 = vld [vmem:[#allocation4 + $0x80] sm:$0xff] }
 0x48b   : > { %4425 = vst.msk [vmem:[#allocation4 + $0x88] sm:$0x1] %vm3206_vm5, %v4407_v59 }
 0x48c   : > { %v4885_v35 = vmax.f32 %v4867_v9, 0.0 }
 0x48d   : > { %v4569_v20 = vpop.f32.mrf.mxu3  ;;  %v4769_v33 = vpop.f32.mrf.mxu0  ;;  %v4920_v28 = vld [vmem:[#allocation4 + $0x60] sm:$0xff] }
 0x48e   : > { %4903 = vst.msk [vmem:[#allocation4 + $0x68] sm:$0xff] %vm3188_vm3, %v4885_v35  ;;  %v4609_v50 = vadd.f32 %v4591_v12, %v4569_v20 }
 0x48f   : > { %v4793_v46 = vld [vmem:[#allocation4 + $0x78] sm:$0xff] }
 0x490   : > { %4627 = vst.msk [vmem:[#allocation4 + $0x80] sm:$0xff] %vm3188_vm3, %v4609_v50  ;;  %v4811_v7 = vadd.f32 %v4793_v46, %v4769_v33 }
 0x491   : > { %v4846_v0 = vld [vmem:[#allocation4 + $0x70] sm:$0xff] }
 0x492   : > { %v4868_v57 = vadd.f32 %v7365_v1, %v4846_v0  ;;  %4829 = vst.msk [vmem:[#allocation4 + $0x78] sm:$0xff] %vm3188_vm3, %v4811_v7  ;;  %v4592_v56 = vld [vmem:[#allocation4 + $0x88] sm:$0x1] }
 0x494   : > { %v4886_v4 = vmax.f32 %v4868_v57, 0.0 }
 0x495   : > { %v4937_v23 = vld [vmem:[#allocation4 + $0x62] sm:$0xff]  ;;  %v4572_v27 = vpop.f32.mrf.mxu3  ;;  %v4772_v63 = vpop.f32.mrf.mxu0 }
 0x496   : > { %v4954_v31 = vmax.f32 %v4920_v28, %v4937_v23  ;;  %4904 = vst.msk [vmem:[#allocation4 + $0x70] sm:$0xff] %vm3188_vm3, %v4886_v4  ;;  %v4610_v52 = vadd.f32 %v4592_v56, %v4572_v27 }
 0x497   : > { %v4794_v6 = vld [vmem:[#allocation4 + $0x80] sm:$0xff] }
 0x498   : > { %4628 = vst.msk [vmem:[#allocation4 + $0x88] sm:$0x1] %vm3206_vm5, %v4610_v52  ;;  %v4812_v48 = vadd.f32 %v4794_v6, %v4772_v63  ;;  %v4967_v53 = vmax.f32 %v4950_v14, %v4954_v31 }
 0x499   : > { %v4847_v44 = vld [vmem:[#allocation4 + $0x78] sm:$0xff] }
 0x49a   : > { %4830 = vst.msk [vmem:[#allocation4 + $0x80] sm:$0xff] %vm3188_vm3, %v4812_v48  ;;  %v4869_v2 = vadd.f32 %v7365_v1, %v4847_v44 }
 0x49b   : > { %4980 = vst.msk [vmem:[#allocation5 + $0x40] sm:$0xff] %vm3188_vm3, %v4967_v53 }
 0x49c   : > { %v4887_v51 = vmax.f32 %v4869_v2, 0.0 }
 0x49d   : > { %v4775_v58 = vpop.f32.mrf.mxu0 }
 0x49e   : > { %4905 = vst.msk [vmem:[#allocation4 + $0x78] sm:$0xff] %vm3188_vm3, %v4887_v51 }
 0x49f   : > { %v4795_v47 = vld [vmem:[#allocation4 + $0x88] sm:$0x1] }
 0x4a0   : > { %v4813_v16 = vadd.f32 %v4795_v47, %v4775_v58 }
 0x4a1   : > { %v4848_v40 = vld [vmem:[#allocation4 + $0x80] sm:$0xff] }
 0x4a2   : > { %v4870_v21 = vadd.f32 %v7365_v1, %v4848_v40  ;;  %v5051_v26 = vld [vmem:[#allocation5 + $0x40] sm:$0x1]  ;;  %v5083_v61 = vld [vmem:[#allocation5 + $0x44] sm:$0x1]  ;;  %4831 = vst.msk [vmem:[#allocation4 + $0x88] sm:$0x1] %vm3206_vm5, %v4813_v16 }
 0x4a3   : > { %5398 = vmatmul.msk.f32.vlgmr.msrb.gmra.mxu3 %vm3188_vm3, %v5051_v26  ;;  %5403 = vmatmul.msk.f32.vlgmr.msra.gmra.mxu1 %vm3188_vm3, %v5083_v61 }
 0x4a4   : > { %v4888_v37 = vmax.f32 %v4870_v21, 0.0 }
 0x4a6   : > { %4906 = vst.msk [vmem:[#allocation4 + $0x80] sm:$0xff] %vm3188_vm3, %v4888_v37 }
 0x4a9   : > { %v4849_v14 = vld [vmem:[#allocation4 + $0x88] sm:$0x1] }
 0x4aa   : > { %v4871_v38 = vadd.f32 %v7365_v1, %v4849_v14 }
 0x4ac   : > { %v4889_v55 = vmax.f32 %v4871_v38, 0.0 }
 0x4ae   : > { %4907 = vst.msk [vmem:[#allocation4 + $0x88] sm:$0x1] %vm3206_vm5, %v4889_v55 }
 0x4e0   : > { %v5015_v30 = vpop.f32.mrf.mxu1 }
 0x4e1   : > { %v5018_v41 = vadd.f32 %v5015_v30, %v4986_v24 }
 0x4e6   : > { %v5047_v8 = vpop.f32.mrf.mxu2 }
 0x4e7   : > { %v5050_v54 = vadd.f32 %v5047_v8, %v5018_v41 }
 0x520   : > { %v5111_v1 = vpop.f32.mrf.mxu1 }
 0x526   : > { %v5079_v13 = vpop.f32.mrf.mxu3 }
 0x527   : > { %v5082_v45 = vadd.f32 %v5079_v13, %v5050_v54 }
 0x529   : > { %v5114_v25 = vadd.f32 %v5111_v1, %v5082_v45 }
 0x52b   : > { %v5115_v5 = vmax.f32 %v5114_v25, 0.0 }
 0x52d   : > { %5117 = vst.msk [vmem:[%s270_s23] sm:$0x1] %vm5116_vm7, %v5115_v5 }
 0x52e   : > { %5501 = shalt.err (!%p5498_p3)
}
 0x52f   : > { %5413 = dma.vmem_to_hbm [thread:$0]  (%p5617_p5), %s5130_s29, 16, %s5132_s8, %s5119_s9  }
 0x530 PF: > { %p5419_p4 = scmp.ge.s32.totalorder %s5536_s27, 2  ;;  %s5143_s19 = sand.u32 1, %s5524_s24  }
 0x531   : > { %s5144_s20 = scalar_lea.sflag [#allocation7], %s5143_s19 }
 0x532   : > { %p5416_p7 = pnand %p5419_p4, %p5621_p6 }
 0x534   : > { %p5417_p8 = pneg %p5416_p7 }
 0x536   : > { %5519 = dma.done.wait (%p5417_p8), %s5144_s20, 16  }
 0x537   : > { %5521 = vsyncadd (%p5417_p8), %s5144_s20, 4294967280  ;;  %p17_p9 = scmp.ge.s32.totalorder %s5604_s30, 4   ;;  %s7552_s24 = smov %s5528_s25 }
 0x538   : > { %s7553_s25 = smov %s5532_s26  ;;  %s7554_s26 = smov %s5615_s10 }
 0x539   : > { %s7555_s27 = smov %s5604_s30  ;;  %19 = sbr.rel (!%p17_p9) target bundleno = 3 (0x3), region = 102 }
 0x53e   :  { %5149 = vsyncpa [#allocation7], 1 }
 0x53f   :  { %5151 = vsyncpa [#allocation7 + $0x1], 1 }

</bundles_post_ra>
